<compile_context>
chip_gen: v7x
topology: tpu7x:2x2x1
jax: 0.10.0
libtpu: 0.0.40
codegen_flags: <defaults>
</compile_context>

<pallas_src>
import functools

import jax
import jax.numpy as jnp
from jax.experimental import pallas as pl
from jax.experimental.pallas import tpu as pltpu


def _round_up(x, m):
    return (x + m - 1) // m * m


def _vmem_limit_bytes():
    try:
        cap = pltpu.get_tpu_info().vmem_capacity_bytes
    except Exception:
        cap = 64 << 20  # conservative (v7x-sized) default
    return min(int(cap * 3 // 4), 96 << 20)


_VMEM_LIMIT = _vmem_limit_bytes()


# ---------------------------------------------------------------------------
# Kernels
# ---------------------------------------------------------------------------
def _conv_fused_kernel(p_ref, w_ref, b_ref, o_ref, acc_ref, *,
                       do_act, negative_slope):
    """K-tiled matmul + bias + optional LeakyReLU (layers without InstanceNorm)."""
    k = pl.program_id(2)

    @pl.when(k == 0)
    def _():
        acc_ref[...] = jnp.zeros_like(acc_ref)

    acc_ref[...] += jnp.dot(p_ref[0], w_ref[...],
                            preferred_element_type=jnp.float32)

    @pl.when(k == pl.num_programs(2) - 1)
    def _():
        x = acc_ref[...] + b_ref[...]                 # f32 epilogue
        if do_act:
            x = jnp.where(x > 0, x, negative_slope * x)
        o_ref[0] = x.astype(o_ref.dtype)


def _conv_stats_kernel(p_ref, w_ref, o_ref, stats_ref, acc_ref):
    """K-tiled matmul + per-(n, c) sum / sum-of-squares accumulated across the
    M grid axis (pre-InstanceNorm layers; bias cancels under the norm)."""
    m = pl.program_id(1)
    k = pl.program_id(2)

    @pl.when(k == 0)
    def _():
        acc_ref[...] = jnp.zeros_like(acc_ref)

    @pl.when(jnp.logical_and(m == 0, k == 0))
    def _():
        stats_ref[...] = jnp.zeros_like(stats_ref)

    acc_ref[...] += jnp.dot(p_ref[0], w_ref[...],
                            preferred_element_type=jnp.float32)

    @pl.when(k == pl.num_programs(2) - 1)
    def _():
        x = acc_ref[...]                              # (tm, Coutp) f32
        o_ref[0] = x.astype(o_ref.dtype)
        upd = jnp.concatenate(
            [jnp.sum(x, axis=0, keepdims=True),
             jnp.sum(x * x, axis=0, keepdims=True)], axis=0)   # (2, Coutp)
        stats_ref[0] += upd


def _instnorm_act_kernel(y_ref, stats_ref, o_ref, *, inv_m, eps,
                         do_act, negative_slope):
    """InstanceNorm2d(affine=False) + optional LeakyReLU; f32 math, cast on store."""
    x = y_ref[0]                                      # (tm, Coutp) f32
    stats = stats_ref[0]                              # (2, Coutp)
    mean = stats[0:1, :] * inv_m
    var = stats[1:2, :] * inv_m - mean * mean
    var = jnp.maximum(var, 0.0)
    x = (x - mean) * jax.lax.rsqrt(var + eps)
    if do_act:
        x = jnp.where(x > 0, x, negative_slope * x)
    o_ref[0] = x.astype(o_ref.dtype)


# ---------------------------------------------------------------------------
# Per-layer wrapper
# ---------------------------------------------------------------------------
def _conv_layer_pallas(patches, w2d, b2d, m_valid, *, do_norm, do_act,
                       out_dtype, negative_slope=0.2, eps=1e-5):
    """patches: [N, Mp, Kp] bf16 (zero padded); w2d: [Kp, Coutp] bf16;
    b2d: [1, Coutp] f32. Returns [N, Mp, Coutp] in out_dtype."""
    N, Mp, Kp = patches.shape
    _, Coutp = w2d.shape

    tm = min(512, Mp)
    assert Mp % tm == 0
    tk = 512 if Kp % 512 == 0 else (256 if Kp % 256 == 0 else 128)
    tk = min(tk, Kp)
    grid = (N, Mp // tm, Kp // tk)

    cost = pl.CostEstimate(
        flops=2 * N * Mp * Kp * Coutp,
        transcendentals=0,
        bytes_accessed=int(patches.size * patches.dtype.itemsize
                           + w2d.size * w2d.dtype.itemsize * (Mp // tm)
                           + N * Mp * Coutp * jnp.dtype(out_dtype).itemsize))

    p_spec = pl.BlockSpec((1, tm, tk), lambda n, m, k: (n, m, k))
    w_spec = pl.BlockSpec((tk, Coutp), lambda n, m, k: (k, 0))
    y_spec = pl.BlockSpec((1, tm, Coutp), lambda n, m, k: (n, m, 0))

    if not do_norm:
        return pl.pallas_call(
            functools.partial(_conv_fused_kernel, do_act=do_act,
                              negative_slope=negative_slope),
            out_shape=jax.ShapeDtypeStruct((N, Mp, Coutp), out_dtype),
            grid=grid,
            in_specs=[p_spec, w_spec,
                      pl.BlockSpec((1, Coutp), lambda n, m, k: (0, 0))],
            out_specs=y_spec,
            scratch_shapes=[pltpu.VMEM((tm, Coutp), jnp.float32)],
            compiler_params=pltpu.CompilerParams(
                dimension_semantics=("parallel", "parallel", "arbitrary"),
                vmem_limit_bytes=_VMEM_LIMIT),
            cost_estimate=cost,
        )(patches, w2d, b2d)

    # (1) conv + per-instance sum / sum-of-squares (stats resident across M, K)
    y, stats = pl.pallas_call(
        _conv_stats_kernel,
        out_shape=(jax.ShapeDtypeStruct((N, Mp, Coutp), jnp.float32),
                   jax.ShapeDtypeStruct((N, 2, Coutp), jnp.float32)),
        grid=grid,
        in_specs=[p_spec, w_spec],
        out_specs=(y_spec,
                   pl.BlockSpec((1, 2, Coutp), lambda n, m, k: (n, 0, 0))),
        scratch_shapes=[pltpu.VMEM((tm, Coutp), jnp.float32)],
        compiler_params=pltpu.CompilerParams(
            # stats output is revisited across the M and K axes -> arbitrary
            dimension_semantics=("parallel", "arbitrary", "arbitrary"),
            vmem_limit_bytes=_VMEM_LIMIT),
        cost_estimate=cost,
    )(patches, w2d)

    # (2) normalize + LeakyReLU
    return pl.pallas_call(
        functools.partial(_instnorm_act_kernel, inv_m=1.0 / m_valid, eps=eps,
                          do_act=do_act, negative_slope=negative_slope),
        out_shape=jax.ShapeDtypeStruct((N, Mp, Coutp), out_dtype),
        grid=(N, Mp // tm),
        in_specs=[pl.BlockSpec((1, tm, Coutp), lambda n, m: (n, m, 0)),
                  pl.BlockSpec((1, 2, Coutp), lambda n, m: (n, 0, 0))],
        out_specs=pl.BlockSpec((1, tm, Coutp), lambda n, m: (n, m, 0)),
        compiler_params=pltpu.CompilerParams(
            dimension_semantics=("parallel", "parallel"),
            vmem_limit_bytes=_VMEM_LIMIT),
    )(y, stats)


# ---------------------------------------------------------------------------
# Pure-JAX glue: NHWC im2col, params, forward
# ---------------------------------------------------------------------------
def _im2col_nhwc(x, k, stride, padding):
    """x: [N, H, W, C]. Returns (patches [N, Ho*Wo, k*k*C], Ho, Wo).

    K ordering is (kh, kw, cin), matching a PyTorch conv weight (Cout, Cin,
    kh, kw) transposed to (kh, kw, Cin, Cout) and reshaped to (k*k*Cin, Cout).
    """
    N, H, W, C = x.shape
    xp = jnp.pad(x, ((0, 0), (padding, padding), (padding, padding), (0, 0)))
    Ho = (H + 2 * padding - k) // stride + 1
    Wo = (W + 2 * padding - k) // stride + 1
    cols = []
    for kh in range(k):
        for kw in range(k):
            cols.append(xp[:, kh:kh + stride * Ho:stride,
                           kw:kw + stride * Wo:stride, :])       # [N, Ho, Wo, C]
    p = jnp.stack(cols, axis=3)                                  # [N, Ho, Wo, k*k, C]
    return p.reshape(N, Ho * Wo, k * k * C), Ho, Wo


def _layer_cfgs(in_channels):
    # (cin, cout, k, stride, pad, with_norm, with_act)
    return [
        (in_channels, 64, 4, 2, 1, False, True),
        (64, 128, 4, 2, 1, True, True),
        (128, 256, 4, 2, 1, True, True),
        (256, 512, 4, 1, 1, True, True),
        (512, 1, 4, 1, 1, False, False),
    ]


def init_discriminator_params(key, in_channels):
    """Deterministic synthetic init; shapes match the PyTorch module.
    Weights stored pre-padded in the Pallas layout:
      w2d [Kp, Coutp] bf16 (K ordered (kh, kw, cin)),  b2d [1, Coutp] f32."""
    params = []
    for i, (cin, cout, k, s, p, norm, act) in enumerate(_layer_cfgs(in_channels)):
        kw_key, kb_key = jax.random.split(jax.random.fold_in(key, i))
        w = jax.random.normal(kw_key, (cout, cin, k, k), jnp.float32) * 0.05
        b = jax.random.normal(kb_key, (cout,), jnp.float32) * 0.01
        K = cin * k * k
        Kp = _round_up(K, 128)
        Coutp = _round_up(cout, 128)
        w2d = jnp.transpose(w, (2, 3, 1, 0)).reshape(K, cout)    # (kh,kw,cin) x cout
        w2d = jnp.pad(w2d, ((0, Kp - K), (0, Coutp - cout))).astype(jnp.bfloat16)
        b2d = jnp.pad(b.reshape(1, cout), ((0, 0), (0, Coutp - cout)))
        params.append(dict(w2d=w2d, b2d=b2d, cout=cout, k=k, stride=s, pad=p,
                           norm=norm, act=act))
    return params


def discriminator_forward(x_nchw, params):
    """x: [N, C, H, W] float32 (PyTorch layout). Returns [N, 1, H', W'] logits."""
    x = jnp.transpose(x_nchw, (0, 2, 3, 1))          # NHWC, channels-last lanes
    n_layers = len(params)
    for li, layer in enumerate(params):
        is_last = li == n_layers - 1
        # TODO(synk): im2col still materializes a k*k-expanded copy in HBM
        # (worst on layer 1); in-kernel patch formation / lax.conv for that
        # layer would remove the bandwidth amplification.
        patches, Ho, Wo = _im2col_nhwc(x, layer["k"], layer["stride"],
                                       layer["pad"])
        N, M, K = patches.shape
        Kp, _ = layer["w2d"].shape
        Mp = _round_up(M, 8)
        if Mp > 512:
            Mp = _round_up(Mp, 512)
        patches = jnp.pad(patches, ((0, 0), (0, Mp - M), (0, Kp - K)))
        patches = patches.astype(jnp.bfloat16)
        out_dtype = jnp.float32 if is_last else jnp.bfloat16
        out = _conv_layer_pallas(patches, layer["w2d"], layer["b2d"], M,
                                 do_norm=layer["norm"], do_act=layer["act"],
                                 out_dtype=out_dtype)
        cout = layer["cout"]
        x = out[:, :M, :cout].reshape(N, Ho, Wo, cout)
    return jnp.transpose(x, (0, 3, 1, 2))            # back to NCHW logits
    # TODO(synk): set_requires_grad is a training-time utility; no inference equivalent.


if __name__ == "__main__":
    key = jax.random.PRNGKey(0)
    in_channels = 4
    # 32x32 spatial is the smallest input for which all five 4x4 convs
    # (strides 2,2,2,1,1) produce a non-empty PatchGAN output map.
    x = jax.random.normal(jax.random.fold_in(key, 100),
                          (2, in_channels, 32, 32), jnp.float32)
    params = init_discriminator_params(key, in_channels)
    fwd = jax.jit(lambda inp: discriminator_forward(inp, params))
    y = jax.block_until_ready(fwd(x))
    assert y.shape == (2, 1, 2, 2), y.shape
    assert bool(jnp.all(jnp.isfinite(y)))
    print("KERNEL_OK")
</pallas_src>

<mosaic_0001>
module attributes {stable_mosaic.version = 11 : i64} {
  func.func @_conv_fused_kernel(%arg0: i32, %arg1: i32, %arg2: i32, %arg3: memref<1x256x128xbf16, #tpu.memory_space<vmem>>, %arg4: memref<128x128xbf16, #tpu.memory_space<vmem>>, %arg5: memref<1x128xf32, #tpu.memory_space<vmem>>, %arg6: memref<1x256x128xbf16, #tpu.memory_space<vmem>>, %arg7: memref<256x128xf32, #tpu.memory_space<vmem>>) attributes {dimension_semantics = [#tpu.dimension_semantics<parallel>, #tpu.dimension_semantics<parallel>, #tpu.dimension_semantics<arbitrary>], iteration_bounds = array<i64: 2, 1, 1>, scalar_prefetch = 0 : i64, scratch_operands = 1 : i64, tpu.core_type = #tpu.core_type<tc>, window_params = [{transform_indices = @transform_0, window_bounds = array<i64: 1, 256, 128>}, {transform_indices = @transform_1, window_bounds = array<i64: 128, 128>}, {pipeline_mode = #tpu.pipeline_mode<synchronous>, transform_indices = @transform_2, window_bounds = array<i64: 1, 128>}, {transform_indices = @transform_3, window_bounds = array<i64: 1, 256, 128>}]} {
    %c0_i32 = arith.constant 0 : i32
    %0 = arith.cmpi eq, %arg2, %c0_i32 : i32
    %1 = arith.extui %0 : i1 to i32
    %c0_i32_0 = arith.constant 0 : i32
    %2 = arith.cmpi ne, %1, %c0_i32_0 : i32
    scf.if %2 {
      %cst_11 = arith.constant 0.000000e+00 : f32
      %13 = vector.broadcast %cst_11 : f32 to vector<256x128xf32>
      %c0_12 = arith.constant 0 : index
      %c0_13 = arith.constant 0 : index
      %14 = vector.load %arg7[%c0_12, %c0_13] : memref<256x128xf32, #tpu.memory_space<vmem>>, vector<256x128xf32>
      tpu.vector_store %arg7[%c0_12, %c0_13], %13 {strides = array<i32>} : memref<256x128xf32, #tpu.memory_space<vmem>>, vector<256x128xf32>,
    } else {
    }
    %c0 = arith.constant 0 : index
    %c0_1 = arith.constant 0 : index
    %3 = vector.load %arg7[%c0, %c0_1] : memref<256x128xf32, #tpu.memory_space<vmem>>, vector<256x128xf32>
    %c0_2 = arith.constant 0 : index
    %c0_3 = arith.constant 0 : index
    %c0_4 = arith.constant 0 : index
    %4 = vector.load %arg3[%c0_2, %c0_3, %c0_4] : memref<1x256x128xbf16, #tpu.memory_space<vmem>>, vector<1x256x128xbf16>
    %5 = vector.shape_cast %4 : vector<1x256x128xbf16> to vector<256x128xbf16>
    %c0_5 = arith.constant 0 : index
    %c0_6 = arith.constant 0 : index
    %6 = vector.load %arg4[%c0_5, %c0_6] : memref<128x128xbf16, #tpu.memory_space<vmem>>, vector<128x128xbf16>
    %cst = arith.constant dense<0.000000e+00> : vector<256x128xf32>
    %7 = tpu.matmul %5, %6, %cst {dimension_numbers = #tpu.dot_dimension_numbers<[1], [0], [0], [1], [0, 0, 1, 1], [], []>} : vector<256x128xbf16>, vector<128x128xbf16>, vector<256x128xf32> -> vector<256x128xf32>
    %8 = arith.addf %3, %7 : vector<256x128xf32>
    %c0_7 = arith.constant 0 : index
    %c0_8 = arith.constant 0 : index
    %9 = vector.load %arg7[%c0_7, %c0_8] : memref<256x128xf32, #tpu.memory_space<vmem>>, vector<256x128xf32>
    tpu.vector_store %arg7[%c0_7, %c0_8], %8 {strides = array<i32>} : memref<256x128xf32, #tpu.memory_space<vmem>>, vector<256x128xf32>,
    %c0_i32_9 = arith.constant 0 : i32
    %10 = arith.cmpi eq, %arg2, %c0_i32_9 : i32
    %11 = arith.extui %10 : i1 to i32
    %c0_i32_10 = arith.constant 0 : i32
    %12 = arith.cmpi ne, %11, %c0_i32_10 : i32
    scf.if %12 {
      %c0_11 = arith.constant 0 : index
      %c0_12 = arith.constant 0 : index
      %13 = vector.load %arg7[%c0_11, %c0_12] : memref<256x128xf32, #tpu.memory_space<vmem>>, vector<256x128xf32>
      %c0_13 = arith.constant 0 : index
      %c0_14 = arith.constant 0 : index
      %14 = vector.load %arg5[%c0_13, %c0_14] : memref<1x128xf32, #tpu.memory_space<vmem>>, vector<1x128xf32>
      %15 = vector.broadcast %14 : vector<1x128xf32> to vector<256x128xf32>
      %16 = arith.addf %13, %15 : vector<256x128xf32>
      %cst_15 = arith.constant 0.000000e+00 : f32
      %17 = vector.broadcast %cst_15 : f32 to vector<256x128xf32>
      %18 = arith.cmpf ogt, %16, %17 : vector<256x128xf32>
      %cst_16 = arith.constant 2.000000e-01 : f32
      %19 = vector.broadcast %cst_16 : f32 to vector<256x128xf32>
      %20 = arith.mulf %19, %16 : vector<256x128xf32>
      %21 = arith.select %18, %16, %20 : vector<256x128xi1>, vector<256x128xf32>
      %22 = arith.truncf %21 : vector<256x128xf32> to vector<256x128xbf16>
      %c0_17 = arith.constant 0 : index
      %c0_18 = arith.constant 0 : index
      %c0_19 = arith.constant 0 : index
      %23 = vector.load %arg6[%c0_17, %c0_18, %c0_19] : memref<1x256x128xbf16, #tpu.memory_space<vmem>>, vector<1x256x128xbf16>
      %24 = vector.shape_cast %23 : vector<1x256x128xbf16> to vector<256x128xbf16>
      %25 = vector.shape_cast %22 : vector<256x128xbf16> to vector<1x256x128xbf16>
      tpu.vector_store %arg6[%c0_17, %c0_18, %c0_19], %25 {strides = array<i32>} : memref<1x256x128xbf16, #tpu.memory_space<vmem>>, vector<1x256x128xbf16>,
    } else {
    }
    return
  }
  func.func @transform_0(%arg0: i32, %arg1: i32, %arg2: i32) -> (i32, i32, i32) {
    %c0_i32 = arith.constant 0 : i32
    return %arg0, %arg1, %arg2 : i32, i32, i32
  }
  func.func @transform_1(%arg0: i32, %arg1: i32, %arg2: i32) -> (i32, i32) {
    %c0_i32 = arith.constant 0 : i32
    %c0_i32_0 = arith.constant 0 : i32
    return %arg2, %c0_i32 : i32, i32
  }
  func.func @transform_2(%arg0: i32, %arg1: i32, %arg2: i32) -> (i32, i32) {
    %c0_i32 = arith.constant 0 : i32
    %c0_i32_0 = arith.constant 0 : i32
    %c0_i32_1 = arith.constant 0 : i32
    return %c0_i32, %c0_i32_0 : i32, i32
  }
  func.func @transform_3(%arg0: i32, %arg1: i32, %arg2: i32) -> (i32, i32, i32) {
    %c0_i32 = arith.constant 0 : i32
    %c0_i32_0 = arith.constant 0 : i32
    return %arg0, %arg1, %c0_i32 : i32, i32, i32
  }
}

module attributes {stable_mosaic.version = 11 : i64} {
  func.func @_conv_stats_kernel(%arg0: i32, %arg1: i32, %arg2: i32, %arg3: memref<1x64x512xbf16, #tpu.memory_space<vmem>>, %arg4: memref<512x128xbf16, #tpu.memory_space<vmem>>, %arg5: memref<1x64x128xf32, #tpu.memory_space<vmem>>, %arg6: memref<1x2x128xf32, #tpu.memory_space<vmem>>, %arg7: memref<64x128xf32, #tpu.memory_space<vmem>>) attributes {dimension_semantics = [#tpu.dimension_semantics<parallel>, #tpu.dimension_semantics<arbitrary>, #tpu.dimension_semantics<arbitrary>], iteration_bounds = array<i64: 2, 1, 2>, scalar_prefetch = 0 : i64, scratch_operands = 1 : i64, tpu.core_type = #tpu.core_type<tc>, window_params = [{transform_indices = @transform_0, window_bounds = array<i64: 1, 64, 512>}, {transform_indices = @transform_1, window_bounds = array<i64: 512, 128>}, {transform_indices = @transform_2, window_bounds = array<i64: 1, 64, 128>}, {transform_indices = @transform_3, window_bounds = array<i64: 1, 2, 128>}]} {
    %c0_i32 = arith.constant 0 : i32
    %0 = arith.cmpi eq, %arg2, %c0_i32 : i32
    %1 = arith.extui %0 : i1 to i32
    %c0_i32_0 = arith.constant 0 : i32
    %2 = arith.cmpi ne, %1, %c0_i32_0 : i32
    scf.if %2 {
      %cst_13 = arith.constant 0.000000e+00 : f32
      %18 = vector.broadcast %cst_13 : f32 to vector<64x128xf32>
      %c0_14 = arith.constant 0 : index
      %c0_15 = arith.constant 0 : index
      %19 = vector.load %arg7[%c0_14, %c0_15] : memref<64x128xf32, #tpu.memory_space<vmem>>, vector<64x128xf32>
      tpu.vector_store %arg7[%c0_14, %c0_15], %18 {strides = array<i32>} : memref<64x128xf32, #tpu.memory_space<vmem>>, vector<64x128xf32>,
    } else {
    }
    %c0_i32_1 = arith.constant 0 : i32
    %3 = arith.cmpi eq, %arg1, %c0_i32_1 : i32
    %c0_i32_2 = arith.constant 0 : i32
    %4 = arith.cmpi eq, %arg2, %c0_i32_2 : i32
    %5 = arith.andi %3, %4 : i1
    %6 = arith.extui %5 : i1 to i32
    %c0_i32_3 = arith.constant 0 : i32
    %7 = arith.cmpi ne, %6, %c0_i32_3 : i32
    scf.if %7 {
      %cst_13 = arith.constant 0.000000e+00 : f32
      %18 = vector.broadcast %cst_13 : f32 to vector<1x2x128xf32>
      %c0_14 = arith.constant 0 : index
      %c0_15 = arith.constant 0 : index
      %c0_16 = arith.constant 0 : index
      %19 = vector.load %arg6[%c0_14, %c0_15, %c0_16] : memref<1x2x128xf32, #tpu.memory_space<vmem>>, vector<1x2x128xf32>
      tpu.vector_store %arg6[%c0_14, %c0_15, %c0_16], %18 {strides = array<i32>} : memref<1x2x128xf32, #tpu.memory_space<vmem>>, vector<1x2x128xf32>,
    } else {
    }
    %c0 = arith.constant 0 : index
    %c0_4 = arith.constant 0 : index
    %8 = vector.load %arg7[%c0, %c0_4] : memref<64x128xf32, #tpu.memory_space<vmem>>, vector<64x128xf32>
    %c0_5 = arith.constant 0 : index
    %c0_6 = arith.constant 0 : index
    %c0_7 = arith.constant 0 : index
    %9 = vector.load %arg3[%c0_5, %c0_6, %c0_7] : memref<1x64x512xbf16, #tpu.memory_space<vmem>>, vector<1x64x512xbf16>
    %10 = vector.shape_cast %9 : vector<1x64x512xbf16> to vector<64x512xbf16>
    %c0_8 = arith.constant 0 : index
    %c0_9 = arith.constant 0 : index
    %11 = vector.load %arg4[%c0_8, %c0_9] : memref<512x128xbf16, #tpu.memory_space<vmem>>, vector<512x128xbf16>
    %cst = arith.constant dense<0.000000e+00> : vector<64x128xf32>
    %12 = tpu.matmul %10, %11, %cst {dimension_numbers = #tpu.dot_dimension_numbers<[1], [0], [0], [1], [0, 0, 1, 1], [], []>} : vector<64x512xbf16>, vector<512x128xbf16>, vector<64x128xf32> -> vector<64x128xf32>
    %13 = arith.addf %8, %12 : vector<64x128xf32>
    %c0_10 = arith.constant 0 : index
    %c0_11 = arith.constant 0 : index
    %14 = vector.load %arg7[%c0_10, %c0_11] : memref<64x128xf32, #tpu.memory_space<vmem>>, vector<64x128xf32>
    tpu.vector_store %arg7[%c0_10, %c0_11], %13 {strides = array<i32>} : memref<64x128xf32, #tpu.memory_space<vmem>>, vector<64x128xf32>,
    %c1_i32 = arith.constant 1 : i32
    %15 = arith.cmpi eq, %arg2, %c1_i32 : i32
    %16 = arith.extui %15 : i1 to i32
    %c0_i32_12 = arith.constant 0 : i32
    %17 = arith.cmpi ne, %16, %c0_i32_12 : i32
    scf.if %17 {
      %c0_13 = arith.constant 0 : index
      %c0_14 = arith.constant 0 : index
      %18 = vector.load %arg7[%c0_13, %c0_14] : memref<64x128xf32, #tpu.memory_space<vmem>>, vector<64x128xf32>
      %c0_15 = arith.constant 0 : index
      %c0_16 = arith.constant 0 : index
      %c0_17 = arith.constant 0 : index
      %19 = vector.load %arg5[%c0_15, %c0_16, %c0_17] : memref<1x64x128xf32, #tpu.memory_space<vmem>>, vector<1x64x128xf32>
      %20 = vector.shape_cast %19 : vector<1x64x128xf32> to vector<64x128xf32>
      %21 = vector.shape_cast %18 : vector<64x128xf32> to vector<1x64x128xf32>
      tpu.vector_store %arg5[%c0_15, %c0_16, %c0_17], %21 {strides = array<i32>} : memref<1x64x128xf32, #tpu.memory_space<vmem>>, vector<1x64x128xf32>,
      %cst_18 = arith.constant dense<0.000000e+00> : vector<128xf32>
      %22 = vector.multi_reduction <add>, %18, %cst_18 [0] : vector<64x128xf32> to vector<128xf32>
      %23 = vector.shape_cast %22 : vector<128xf32> to vector<1x128xf32>
      %24 = arith.mulf %18, %18 : vector<64x128xf32>
      %cst_19 = arith.constant dense<0.000000e+00> : vector<128xf32>
      %25 = vector.multi_reduction <add>, %24, %cst_19 [0] : vector<64x128xf32> to vector<128xf32>
      %26 = vector.shape_cast %25 : vector<128xf32> to vector<1x128xf32>
      %27 = tpu.concatenate %23, %26 in 0 : vector<1x128xf32>, vector<1x128xf32> -> vector<2x128xf32>
      %c0_20 = arith.constant 0 : index
      %c0_21 = arith.constant 0 : index
      %c0_22 = arith.constant 0 : index
      %28 = vector.load %arg6[%c0_20, %c0_21, %c0_22] : memref<1x2x128xf32, #tpu.memory_space<vmem>>, vector<1x2x128xf32>
      %29 = vector.shape_cast %28 : vector<1x2x128xf32> to vector<2x128xf32>
      %30 = arith.addf %29, %27 : vector<2x128xf32>
      %c0_23 = arith.constant 0 : index
      %c0_24 = arith.constant 0 : index
      %c0_25 = arith.constant 0 : index
      %31 = vector.load %arg6[%c0_23, %c0_24, %c0_25] : memref<1x2x128xf32, #tpu.memory_space<vmem>>, vector<1x2x128xf32>
      %32 = vector.shape_cast %31 : vector<1x2x128xf32> to vector<2x128xf32>
      %33 = vector.shape_cast %30 : vector<2x128xf32> to vector<1x2x128xf32>
      tpu.vector_store %arg6[%c0_23, %c0_24, %c0_25], %33 {strides = array<i32>} : memref<1x2x128xf32, #tpu.memory_space<vmem>>, vector<1x2x128xf32>,
    } else {
    }
    return
  }
  func.func @transform_0(%arg0: i32, %arg1: i32, %arg2: i32) -> (i32, i32, i32) {
    %c0_i32 = arith.constant 0 : i32
    return %arg0, %arg1, %arg2 : i32, i32, i32
  }
  func.func @transform_1(%arg0: i32, %arg1: i32, %arg2: i32) -> (i32, i32) {
    %c0_i32 = arith.constant 0 : i32
    %c0_i32_0 = arith.constant 0 : i32
    return %arg2, %c0_i32 : i32, i32
  }
  func.func @transform_2(%arg0: i32, %arg1: i32, %arg2: i32) -> (i32, i32, i32) {
    %c0_i32 = arith.constant 0 : i32
    %c0_i32_0 = arith.constant 0 : i32
    return %arg0, %arg1, %c0_i32 : i32, i32, i32
  }
  func.func @transform_3(%arg0: i32, %arg1: i32, %arg2: i32) -> (i32, i32, i32) {
    %c0_i32 = arith.constant 0 : i32
    %c0_i32_0 = arith.constant 0 : i32
    %c0_i32_1 = arith.constant 0 : i32
    return %arg0, %c0_i32, %c0_i32_0 : i32, i32, i32
  }
}

module attributes {stable_mosaic.version = 11 : i64} {
  func.func @_instnorm_act_kernel(%arg0: i32, %arg1: i32, %arg2: memref<1x64x128xf32, #tpu.memory_space<vmem>>, %arg3: memref<1x2x128xf32, #tpu.memory_space<vmem>>, %arg4: memref<1x64x128xbf16, #tpu.memory_space<vmem>>) attributes {dimension_semantics = [#tpu.dimension_semantics<parallel>, #tpu.dimension_semantics<parallel>], iteration_bounds = array<i64: 2, 1>, scalar_prefetch = 0 : i64, scratch_operands = 0 : i64, tpu.core_type = #tpu.core_type<tc>, window_params = [{transform_indices = @transform_0, window_bounds = array<i64: 1, 64, 128>}, {transform_indices = @transform_1, window_bounds = array<i64: 1, 2, 128>}, {transform_indices = @transform_2, window_bounds = array<i64: 1, 64, 128>}]} {
    %c0 = arith.constant 0 : index
    %c0_0 = arith.constant 0 : index
    %c0_1 = arith.constant 0 : index
    %0 = vector.load %arg2[%c0, %c0_0, %c0_1] : memref<1x64x128xf32, #tpu.memory_space<vmem>>, vector<1x64x128xf32>
    %1 = vector.shape_cast %0 : vector<1x64x128xf32> to vector<64x128xf32>
    %c0_2 = arith.constant 0 : index
    %c0_3 = arith.constant 0 : index
    %c0_4 = arith.constant 0 : index
    %2 = vector.load %arg3[%c0_2, %c0_3, %c0_4] : memref<1x2x128xf32, #tpu.memory_space<vmem>>, vector<1x2x128xf32>
    %3 = vector.shape_cast %2 : vector<1x2x128xf32> to vector<2x128xf32>
    %4 = vector.extract_strided_slice %3 {offsets = [0, 0], sizes = [1, 128], strides = [1, 1]} : vector<2x128xf32> to vector<1x128xf32>
    %cst = arith.constant 1.562500e-02 : f32
    %5 = vector.broadcast %cst : f32 to vector<1x128xf32>
    %6 = arith.mulf %4, %5 : vector<1x128xf32>
    %7 = vector.extract_strided_slice %3 {offsets = [1, 0], sizes = [1, 128], strides = [1, 1]} : vector<2x128xf32> to vector<1x128xf32>
    %cst_5 = arith.constant 1.562500e-02 : f32
    %8 = vector.broadcast %cst_5 : f32 to vector<1x128xf32>
    %9 = arith.mulf %7, %8 : vector<1x128xf32>
    %10 = arith.mulf %6, %6 : vector<1x128xf32>
    %11 = arith.subf %9, %10 : vector<1x128xf32>
    %cst_6 = arith.constant 0.000000e+00 : f32
    %12 = vector.broadcast %cst_6 : f32 to vector<1x128xf32>
    %13 = arith.maximumf %11, %12 : vector<1x128xf32>
    %14 = vector.broadcast %6 : vector<1x128xf32> to vector<64x128xf32>
    %15 = arith.subf %1, %14 : vector<64x128xf32>
    %cst_7 = arith.constant 9.99999974E-6 : f32
    %16 = vector.broadcast %cst_7 : f32 to vector<1x128xf32>
    %17 = arith.addf %13, %16 : vector<1x128xf32>
    %18 = math.rsqrt %17 : vector<1x128xf32>
    %19 = vector.broadcast %18 : vector<1x128xf32> to vector<64x128xf32>
    %20 = arith.mulf %15, %19 : vector<64x128xf32>
    %cst_8 = arith.constant 0.000000e+00 : f32
    %21 = vector.broadcast %cst_8 : f32 to vector<64x128xf32>
    %22 = arith.cmpf ogt, %20, %21 : vector<64x128xf32>
    %cst_9 = arith.constant 2.000000e-01 : f32
    %23 = vector.broadcast %cst_9 : f32 to vector<64x128xf32>
    %24 = arith.mulf %23, %20 : vector<64x128xf32>
    %25 = arith.select %22, %20, %24 : vector<64x128xi1>, vector<64x128xf32>
    %26 = arith.truncf %25 : vector<64x128xf32> to vector<64x128xbf16>
    %c0_10 = arith.constant 0 : index
    %c0_11 = arith.constant 0 : index
    %c0_12 = arith.constant 0 : index
    %27 = vector.load %arg4[%c0_10, %c0_11, %c0_12] : memref<1x64x128xbf16, #tpu.memory_space<vmem>>, vector<1x64x128xbf16>
    %28 = vector.shape_cast %27 : vector<1x64x128xbf16> to vector<64x128xbf16>
    %29 = vector.shape_cast %26 : vector<64x128xbf16> to vector<1x64x128xbf16>
    tpu.vector_store %arg4[%c0_10, %c0_11, %c0_12], %29 {strides = array<i32>} : memref<1x64x128xbf16, #tpu.memory_space<vmem>>, vector<1x64x128xbf16>,
    return
  }
  func.func @transform_0(%arg0: i32, %arg1: i32) -> (i32, i32, i32) {
    %c0_i32 = arith.constant 0 : i32
    %c0_i32_0 = arith.constant 0 : i32
    return %arg0, %arg1, %c0_i32 : i32, i32, i32
  }
  func.func @transform_1(%arg0: i32, %arg1: i32) -> (i32, i32, i32) {
    %c0_i32 = arith.constant 0 : i32
    %c0_i32_0 = arith.constant 0 : i32
    %c0_i32_1 = arith.constant 0 : i32
    return %arg0, %c0_i32, %c0_i32_0 : i32, i32, i32
  }
  func.func @transform_2(%arg0: i32, %arg1: i32) -> (i32, i32, i32) {
    %c0_i32 = arith.constant 0 : i32
    %c0_i32_0 = arith.constant 0 : i32
    return %arg0, %arg1, %c0_i32 : i32, i32, i32
  }
}

module attributes {stable_mosaic.version = 11 : i64} {
  func.func @_instnorm_act_kernel(%arg0: i32, %arg1: i32, %arg2: memref<1x16x256xf32, #tpu.memory_space<vmem>>, %arg3: memref<1x2x256xf32, #tpu.memory_space<vmem>>, %arg4: memref<1x16x256xbf16, #tpu.memory_space<vmem>>) attributes {dimension_semantics = [#tpu.dimension_semantics<parallel>, #tpu.dimension_semantics<parallel>], iteration_bounds = array<i64: 2, 1>, scalar_prefetch = 0 : i64, scratch_operands = 0 : i64, tpu.core_type = #tpu.core_type<tc>, window_params = [{transform_indices = @transform_0, window_bounds = array<i64: 1, 16, 256>}, {transform_indices = @transform_1, window_bounds = array<i64: 1, 2, 256>}, {transform_indices = @transform_2, window_bounds = array<i64: 1, 16, 256>}]} {
    %c0 = arith.constant 0 : index
    %c0_0 = arith.constant 0 : index
    %c0_1 = arith.constant 0 : index
    %0 = vector.load %arg2[%c0, %c0_0, %c0_1] : memref<1x16x256xf32, #tpu.memory_space<vmem>>, vector<1x16x256xf32>
    %1 = vector.shape_cast %0 : vector<1x16x256xf32> to vector<16x256xf32>
    %c0_2 = arith.constant 0 : index
    %c0_3 = arith.constant 0 : index
    %c0_4 = arith.constant 0 : index
    %2 = vector.load %arg3[%c0_2, %c0_3, %c0_4] : memref<1x2x256xf32, #tpu.memory_space<vmem>>, vector<1x2x256xf32>
    %3 = vector.shape_cast %2 : vector<1x2x256xf32> to vector<2x256xf32>
    %4 = vector.extract_strided_slice %3 {offsets = [0, 0], sizes = [1, 256], strides = [1, 1]} : vector<2x256xf32> to vector<1x256xf32>
    %cst = arith.constant 6.250000e-02 : f32
    %5 = vector.broadcast %cst : f32 to vector<1x256xf32>
    %6 = arith.mulf %4, %5 : vector<1x256xf32>
    %7 = vector.extract_strided_slice %3 {offsets = [1, 0], sizes = [1, 256], strides = [1, 1]} : vector<2x256xf32> to vector<1x256xf32>
    %cst_5 = arith.constant 6.250000e-02 : f32
    %8 = vector.broadcast %cst_5 : f32 to vector<1x256xf32>
    %9 = arith.mulf %7, %8 : vector<1x256xf32>
    %10 = arith.mulf %6, %6 : vector<1x256xf32>
    %11 = arith.subf %9, %10 : vector<1x256xf32>
    %cst_6 = arith.constant 0.000000e+00 : f32
    %12 = vector.broadcast %cst_6 : f32 to vector<1x256xf32>
    %13 = arith.maximumf %11, %12 : vector<1x256xf32>
    %14 = vector.broadcast %6 : vector<1x256xf32> to vector<16x256xf32>
    %15 = arith.subf %1, %14 : vector<16x256xf32>
    %cst_7 = arith.constant 9.99999974E-6 : f32
    %16 = vector.broadcast %cst_7 : f32 to vector<1x256xf32>
    %17 = arith.addf %13, %16 : vector<1x256xf32>
    %18 = math.rsqrt %17 : vector<1x256xf32>
    %19 = vector.broadcast %18 : vector<1x256xf32> to vector<16x256xf32>
    %20 = arith.mulf %15, %19 : vector<16x256xf32>
    %cst_8 = arith.constant 0.000000e+00 : f32
    %21 = vector.broadcast %cst_8 : f32 to vector<16x256xf32>
    %22 = arith.cmpf ogt, %20, %21 : vector<16x256xf32>
    %cst_9 = arith.constant 2.000000e-01 : f32
    %23 = vector.broadcast %cst_9 : f32 to vector<16x256xf32>
    %24 = arith.mulf %23, %20 : vector<16x256xf32>
    %25 = arith.select %22, %20, %24 : vector<16x256xi1>, vector<16x256xf32>
    %26 = arith.truncf %25 : vector<16x256xf32> to vector<16x256xbf16>
    %c0_10 = arith.constant 0 : index
    %c0_11 = arith.constant 0 : index
    %c0_12 = arith.constant 0 : index
    %27 = vector.load %arg4[%c0_10, %c0_11, %c0_12] : memref<1x16x256xbf16, #tpu.memory_space<vmem>>, vector<1x16x256xbf16>
    %28 = vector.shape_cast %27 : vector<1x16x256xbf16> to vector<16x256xbf16>
    %29 = vector.shape_cast %26 : vector<16x256xbf16> to vector<1x16x256xbf16>
    tpu.vector_store %arg4[%c0_10, %c0_11, %c0_12], %29 {strides = array<i32>} : memref<1x16x256xbf16, #tpu.memory_space<vmem>>, vector<1x16x256xbf16>,
    return
  }
  func.func @transform_0(%arg0: i32, %arg1: i32) -> (i32, i32, i32) {
    %c0_i32 = arith.constant 0 : i32
    %c0_i32_0 = arith.constant 0 : i32
    return %arg0, %arg1, %c0_i32 : i32, i32, i32
  }
  func.func @transform_1(%arg0: i32, %arg1: i32) -> (i32, i32, i32) {
    %c0_i32 = arith.constant 0 : i32
    %c0_i32_0 = arith.constant 0 : i32
    %c0_i32_1 = arith.constant 0 : i32
    return %arg0, %c0_i32, %c0_i32_0 : i32, i32, i32
  }
  func.func @transform_2(%arg0: i32, %arg1: i32) -> (i32, i32, i32) {
    %c0_i32 = arith.constant 0 : i32
    %c0_i32_0 = arith.constant 0 : i32
    return %arg0, %arg1, %c0_i32 : i32, i32, i32
  }
}

module attributes {stable_mosaic.version = 11 : i64} {
  func.func @_conv_stats_kernel(%arg0: i32, %arg1: i32, %arg2: i32, %arg3: memref<1x16x512xbf16, #tpu.memory_space<vmem>>, %arg4: memref<512x256xbf16, #tpu.memory_space<vmem>>, %arg5: memref<1x16x256xf32, #tpu.memory_space<vmem>>, %arg6: memref<1x2x256xf32, #tpu.memory_space<vmem>>, %arg7: memref<16x256xf32, #tpu.memory_space<vmem>>) attributes {dimension_semantics = [#tpu.dimension_semantics<parallel>, #tpu.dimension_semantics<arbitrary>, #tpu.dimension_semantics<arbitrary>], iteration_bounds = array<i64: 2, 1, 4>, scalar_prefetch = 0 : i64, scratch_operands = 1 : i64, tpu.core_type = #tpu.core_type<tc>, window_params = [{transform_indices = @transform_0, window_bounds = array<i64: 1, 16, 512>}, {transform_indices = @transform_1, window_bounds = array<i64: 512, 256>}, {transform_indices = @transform_2, window_bounds = array<i64: 1, 16, 256>}, {transform_indices = @transform_3, window_bounds = array<i64: 1, 2, 256>}]} {
    %c0_i32 = arith.constant 0 : i32
    %0 = arith.cmpi eq, %arg2, %c0_i32 : i32
    %1 = arith.extui %0 : i1 to i32
    %c0_i32_0 = arith.constant 0 : i32
    %2 = arith.cmpi ne, %1, %c0_i32_0 : i32
    scf.if %2 {
      %cst_13 = arith.constant 0.000000e+00 : f32
      %18 = vector.broadcast %cst_13 : f32 to vector<16x256xf32>
      %c0_14 = arith.constant 0 : index
      %c0_15 = arith.constant 0 : index
      %19 = vector.load %arg7[%c0_14, %c0_15] : memref<16x256xf32, #tpu.memory_space<vmem>>, vector<16x256xf32>
      tpu.vector_store %arg7[%c0_14, %c0_15], %18 {strides = array<i32>} : memref<16x256xf32, #tpu.memory_space<vmem>>, vector<16x256xf32>,
    } else {
    }
    %c0_i32_1 = arith.constant 0 : i32
    %3 = arith.cmpi eq, %arg1, %c0_i32_1 : i32
    %c0_i32_2 = arith.constant 0 : i32
    %4 = arith.cmpi eq, %arg2, %c0_i32_2 : i32
    %5 = arith.andi %3, %4 : i1
    %6 = arith.extui %5 : i1 to i32
    %c0_i32_3 = arith.constant 0 : i32
    %7 = arith.cmpi ne, %6, %c0_i32_3 : i32
    scf.if %7 {
      %cst_13 = arith.constant 0.000000e+00 : f32
      %18 = vector.broadcast %cst_13 : f32 to vector<1x2x256xf32>
      %c0_14 = arith.constant 0 : index
      %c0_15 = arith.constant 0 : index
      %c0_16 = arith.constant 0 : index
      %19 = vector.load %arg6[%c0_14, %c0_15, %c0_16] : memref<1x2x256xf32, #tpu.memory_space<vmem>>, vector<1x2x256xf32>
      tpu.vector_store %arg6[%c0_14, %c0_15, %c0_16], %18 {strides = array<i32>} : memref<1x2x256xf32, #tpu.memory_space<vmem>>, vector<1x2x256xf32>,
    } else {
    }
    %c0 = arith.constant 0 : index
    %c0_4 = arith.constant 0 : index
    %8 = vector.load %arg7[%c0, %c0_4] : memref<16x256xf32, #tpu.memory_space<vmem>>, vector<16x256xf32>
    %c0_5 = arith.constant 0 : index
    %c0_6 = arith.constant 0 : index
    %c0_7 = arith.constant 0 : index
    %9 = vector.load %arg3[%c0_5, %c0_6, %c0_7] : memref<1x16x512xbf16, #tpu.memory_space<vmem>>, vector<1x16x512xbf16>
    %10 = vector.shape_cast %9 : vector<1x16x512xbf16> to vector<16x512xbf16>
    %c0_8 = arith.constant 0 : index
    %c0_9 = arith.constant 0 : index
    %11 = vector.load %arg4[%c0_8, %c0_9] : memref<512x256xbf16, #tpu.memory_space<vmem>>, vector<512x256xbf16>
    %cst = arith.constant dense<0.000000e+00> : vector<16x256xf32>
    %12 = tpu.matmul %10, %11, %cst {dimension_numbers = #tpu.dot_dimension_numbers<[1], [0], [0], [1], [0, 0, 1, 1], [], []>} : vector<16x512xbf16>, vector<512x256xbf16>, vector<16x256xf32> -> vector<16x256xf32>
    %13 = arith.addf %8, %12 : vector<16x256xf32>
    %c0_10 = arith.constant 0 : index
    %c0_11 = arith.constant 0 : index
    %14 = vector.load %arg7[%c0_10, %c0_11] : memref<16x256xf32, #tpu.memory_space<vmem>>, vector<16x256xf32>
    tpu.vector_store %arg7[%c0_10, %c0_11], %13 {strides = array<i32>} : memref<16x256xf32, #tpu.memory_space<vmem>>, vector<16x256xf32>,
    %c3_i32 = arith.constant 3 : i32
    %15 = arith.cmpi eq, %arg2, %c3_i32 : i32
    %16 = arith.extui %15 : i1 to i32
    %c0_i32_12 = arith.constant 0 : i32
    %17 = arith.cmpi ne, %16, %c0_i32_12 : i32
    scf.if %17 {
      %c0_13 = arith.constant 0 : index
      %c0_14 = arith.constant 0 : index
      %18 = vector.load %arg7[%c0_13, %c0_14] : memref<16x256xf32, #tpu.memory_space<vmem>>, vector<16x256xf32>
      %c0_15 = arith.constant 0 : index
      %c0_16 = arith.constant 0 : index
      %c0_17 = arith.constant 0 : index
      %19 = vector.load %arg5[%c0_15, %c0_16, %c0_17] : memref<1x16x256xf32, #tpu.memory_space<vmem>>, vector<1x16x256xf32>
      %20 = vector.shape_cast %19 : vector<1x16x256xf32> to vector<16x256xf32>
      %21 = vector.shape_cast %18 : vector<16x256xf32> to vector<1x16x256xf32>
      tpu.vector_store %arg5[%c0_15, %c0_16, %c0_17], %21 {strides = array<i32>} : memref<1x16x256xf32, #tpu.memory_space<vmem>>, vector<1x16x256xf32>,
      %cst_18 = arith.constant dense<0.000000e+00> : vector<256xf32>
      %22 = vector.multi_reduction <add>, %18, %cst_18 [0] : vector<16x256xf32> to vector<256xf32>
      %23 = vector.shape_cast %22 : vector<256xf32> to vector<1x256xf32>
      %24 = arith.mulf %18, %18 : vector<16x256xf32>
      %cst_19 = arith.constant dense<0.000000e+00> : vector<256xf32>
      %25 = vector.multi_reduction <add>, %24, %cst_19 [0] : vector<16x256xf32> to vector<256xf32>
      %26 = vector.shape_cast %25 : vector<256xf32> to vector<1x256xf32>
      %27 = tpu.concatenate %23, %26 in 0 : vector<1x256xf32>, vector<1x256xf32> -> vector<2x256xf32>
      %c0_20 = arith.constant 0 : index
      %c0_21 = arith.constant 0 : index
      %c0_22 = arith.constant 0 : index
      %28 = vector.load %arg6[%c0_20, %c0_21, %c0_22] : memref<1x2x256xf32, #tpu.memory_space<vmem>>, vector<1x2x256xf32>
      %29 = vector.shape_cast %28 : vector<1x2x256xf32> to vector<2x256xf32>
      %30 = arith.addf %29, %27 : vector<2x256xf32>
      %c0_23 = arith.constant 0 : index
      %c0_24 = arith.constant 0 : index
      %c0_25 = arith.constant 0 : index
      %31 = vector.load %arg6[%c0_23, %c0_24, %c0_25] : memref<1x2x256xf32, #tpu.memory_space<vmem>>, vector<1x2x256xf32>
      %32 = vector.shape_cast %31 : vector<1x2x256xf32> to vector<2x256xf32>
      %33 = vector.shape_cast %30 : vector<2x256xf32> to vector<1x2x256xf32>
      tpu.vector_store %arg6[%c0_23, %c0_24, %c0_25], %33 {strides = array<i32>} : memref<1x2x256xf32, #tpu.memory_space<vmem>>, vector<1x2x256xf32>,
    } else {
    }
    return
  }
  func.func @transform_0(%arg0: i32, %arg1: i32, %arg2: i32) -> (i32, i32, i32) {
    %c0_i32 = arith.constant 0 : i32
    return %arg0, %arg1, %arg2 : i32, i32, i32
  }
  func.func @transform_1(%arg0: i32, %arg1: i32, %arg2: i32) -> (i32, i32) {
    %c0_i32 = arith.constant 0 : i32
    %c0_i32_0 = arith.constant 0 : i32
    return %arg2, %c0_i32 : i32, i32
  }
  func.func @transform_2(%arg0: i32, %arg1: i32, %arg2: i32) -> (i32, i32, i32) {
    %c0_i32 = arith.constant 0 : i32
    %c0_i32_0 = arith.constant 0 : i32
    return %arg0, %arg1, %c0_i32 : i32, i32, i32
  }
  func.func @transform_3(%arg0: i32, %arg1: i32, %arg2: i32) -> (i32, i32, i32) {
    %c0_i32 = arith.constant 0 : i32
    %c0_i32_0 = arith.constant 0 : i32
    %c0_i32_1 = arith.constant 0 : i32
    return %arg0, %c0_i32, %c0_i32_0 : i32, i32, i32
  }
}

module attributes {stable_mosaic.version = 11 : i64} {
  func.func @_instnorm_act_kernel(%arg0: i32, %arg1: i32, %arg2: memref<1x16x512xf32, #tpu.memory_space<vmem>>, %arg3: memref<1x2x512xf32, #tpu.memory_space<vmem>>, %arg4: memref<1x16x512xbf16, #tpu.memory_space<vmem>>) attributes {dimension_semantics = [#tpu.dimension_semantics<parallel>, #tpu.dimension_semantics<parallel>], iteration_bounds = array<i64: 2, 1>, scalar_prefetch = 0 : i64, scratch_operands = 0 : i64, tpu.core_type = #tpu.core_type<tc>, window_params = [{transform_indices = @transform_0, window_bounds = array<i64: 1, 16, 512>}, {transform_indices = @transform_1, window_bounds = array<i64: 1, 2, 512>}, {transform_indices = @transform_2, window_bounds = array<i64: 1, 16, 512>}]} {
    %c0 = arith.constant 0 : index
    %c0_0 = arith.constant 0 : index
    %c0_1 = arith.constant 0 : index
    %0 = vector.load %arg2[%c0, %c0_0, %c0_1] : memref<1x16x512xf32, #tpu.memory_space<vmem>>, vector<1x16x512xf32>
    %1 = vector.shape_cast %0 : vector<1x16x512xf32> to vector<16x512xf32>
    %c0_2 = arith.constant 0 : index
    %c0_3 = arith.constant 0 : index
    %c0_4 = arith.constant 0 : index
    %2 = vector.load %arg3[%c0_2, %c0_3, %c0_4] : memref<1x2x512xf32, #tpu.memory_space<vmem>>, vector<1x2x512xf32>
    %3 = vector.shape_cast %2 : vector<1x2x512xf32> to vector<2x512xf32>
    %4 = vector.extract_strided_slice %3 {offsets = [0, 0], sizes = [1, 512], strides = [1, 1]} : vector<2x512xf32> to vector<1x512xf32>
    %cst = arith.constant 0.111111112 : f32
    %5 = vector.broadcast %cst : f32 to vector<1x512xf32>
    %6 = arith.mulf %4, %5 : vector<1x512xf32>
    %7 = vector.extract_strided_slice %3 {offsets = [1, 0], sizes = [1, 512], strides = [1, 1]} : vector<2x512xf32> to vector<1x512xf32>
    %cst_5 = arith.constant 0.111111112 : f32
    %8 = vector.broadcast %cst_5 : f32 to vector<1x512xf32>
    %9 = arith.mulf %7, %8 : vector<1x512xf32>
    %10 = arith.mulf %6, %6 : vector<1x512xf32>
    %11 = arith.subf %9, %10 : vector<1x512xf32>
    %cst_6 = arith.constant 0.000000e+00 : f32
    %12 = vector.broadcast %cst_6 : f32 to vector<1x512xf32>
    %13 = arith.maximumf %11, %12 : vector<1x512xf32>
    %14 = vector.broadcast %6 : vector<1x512xf32> to vector<16x512xf32>
    %15 = arith.subf %1, %14 : vector<16x512xf32>
    %cst_7 = arith.constant 9.99999974E-6 : f32
    %16 = vector.broadcast %cst_7 : f32 to vector<1x512xf32>
    %17 = arith.addf %13, %16 : vector<1x512xf32>
    %18 = math.rsqrt %17 : vector<1x512xf32>
    %19 = vector.broadcast %18 : vector<1x512xf32> to vector<16x512xf32>
    %20 = arith.mulf %15, %19 : vector<16x512xf32>
    %cst_8 = arith.constant 0.000000e+00 : f32
    %21 = vector.broadcast %cst_8 : f32 to vector<16x512xf32>
    %22 = arith.cmpf ogt, %20, %21 : vector<16x512xf32>
    %cst_9 = arith.constant 2.000000e-01 : f32
    %23 = vector.broadcast %cst_9 : f32 to vector<16x512xf32>
    %24 = arith.mulf %23, %20 : vector<16x512xf32>
    %25 = arith.select %22, %20, %24 : vector<16x512xi1>, vector<16x512xf32>
    %26 = arith.truncf %25 : vector<16x512xf32> to vector<16x512xbf16>
    %c0_10 = arith.constant 0 : index
    %c0_11 = arith.constant 0 : index
    %c0_12 = arith.constant 0 : index
    %27 = vector.load %arg4[%c0_10, %c0_11, %c0_12] : memref<1x16x512xbf16, #tpu.memory_space<vmem>>, vector<1x16x512xbf16>
    %28 = vector.shape_cast %27 : vector<1x16x512xbf16> to vector<16x512xbf16>
    %29 = vector.shape_cast %26 : vector<16x512xbf16> to vector<1x16x512xbf16>
    tpu.vector_store %arg4[%c0_10, %c0_11, %c0_12], %29 {strides = array<i32>} : memref<1x16x512xbf16, #tpu.memory_space<vmem>>, vector<1x16x512xbf16>,
    return
  }
  func.func @transform_0(%arg0: i32, %arg1: i32) -> (i32, i32, i32) {
    %c0_i32 = arith.constant 0 : i32
    %c0_i32_0 = arith.constant 0 : i32
    return %arg0, %arg1, %c0_i32 : i32, i32, i32
  }
  func.func @transform_1(%arg0: i32, %arg1: i32) -> (i32, i32, i32) {
    %c0_i32 = arith.constant 0 : i32
    %c0_i32_0 = arith.constant 0 : i32
    %c0_i32_1 = arith.constant 0 : i32
    return %arg0, %c0_i32, %c0_i32_0 : i32, i32, i32
  }
  func.func @transform_2(%arg0: i32, %arg1: i32) -> (i32, i32, i32) {
    %c0_i32 = arith.constant 0 : i32
    %c0_i32_0 = arith.constant 0 : i32
    return %arg0, %arg1, %c0_i32 : i32, i32, i32
  }
}

module attributes {stable_mosaic.version = 11 : i64} {
  func.func @_conv_stats_kernel(%arg0: i32, %arg1: i32, %arg2: i32, %arg3: memref<1x16x512xbf16, #tpu.memory_space<vmem>>, %arg4: memref<512x512xbf16, #tpu.memory_space<vmem>>, %arg5: memref<1x16x512xf32, #tpu.memory_space<vmem>>, %arg6: memref<1x2x512xf32, #tpu.memory_space<vmem>>, %arg7: memref<16x512xf32, #tpu.memory_space<vmem>>) attributes {dimension_semantics = [#tpu.dimension_semantics<parallel>, #tpu.dimension_semantics<arbitrary>, #tpu.dimension_semantics<arbitrary>], iteration_bounds = array<i64: 2, 1, 8>, scalar_prefetch = 0 : i64, scratch_operands = 1 : i64, tpu.core_type = #tpu.core_type<tc>, window_params = [{transform_indices = @transform_0, window_bounds = array<i64: 1, 16, 512>}, {transform_indices = @transform_1, window_bounds = array<i64: 512, 512>}, {transform_indices = @transform_2, window_bounds = array<i64: 1, 16, 512>}, {transform_indices = @transform_3, window_bounds = array<i64: 1, 2, 512>}]} {
    %c0_i32 = arith.constant 0 : i32
    %0 = arith.cmpi eq, %arg2, %c0_i32 : i32
    %1 = arith.extui %0 : i1 to i32
    %c0_i32_0 = arith.constant 0 : i32
    %2 = arith.cmpi ne, %1, %c0_i32_0 : i32
    scf.if %2 {
      %cst_13 = arith.constant 0.000000e+00 : f32
      %18 = vector.broadcast %cst_13 : f32 to vector<16x512xf32>
      %c0_14 = arith.constant 0 : index
      %c0_15 = arith.constant 0 : index
      %19 = vector.load %arg7[%c0_14, %c0_15] : memref<16x512xf32, #tpu.memory_space<vmem>>, vector<16x512xf32>
      tpu.vector_store %arg7[%c0_14, %c0_15], %18 {strides = array<i32>} : memref<16x512xf32, #tpu.memory_space<vmem>>, vector<16x512xf32>,
    } else {
    }
    %c0_i32_1 = arith.constant 0 : i32
    %3 = arith.cmpi eq, %arg1, %c0_i32_1 : i32
    %c0_i32_2 = arith.constant 0 : i32
    %4 = arith.cmpi eq, %arg2, %c0_i32_2 : i32
    %5 = arith.andi %3, %4 : i1
    %6 = arith.extui %5 : i1 to i32
    %c0_i32_3 = arith.constant 0 : i32
    %7 = arith.cmpi ne, %6, %c0_i32_3 : i32
    scf.if %7 {
      %cst_13 = arith.constant 0.000000e+00 : f32
      %18 = vector.broadcast %cst_13 : f32 to vector<1x2x512xf32>
      %c0_14 = arith.constant 0 : index
      %c0_15 = arith.constant 0 : index
      %c0_16 = arith.constant 0 : index
      %19 = vector.load %arg6[%c0_14, %c0_15, %c0_16] : memref<1x2x512xf32, #tpu.memory_space<vmem>>, vector<1x2x512xf32>
      tpu.vector_store %arg6[%c0_14, %c0_15, %c0_16], %18 {strides = array<i32>} : memref<1x2x512xf32, #tpu.memory_space<vmem>>, vector<1x2x512xf32>,
    } else {
    }
    %c0 = arith.constant 0 : index
    %c0_4 = arith.constant 0 : index
    %8 = vector.load %arg7[%c0, %c0_4] : memref<16x512xf32, #tpu.memory_space<vmem>>, vector<16x512xf32>
    %c0_5 = arith.constant 0 : index
    %c0_6 = arith.constant 0 : index
    %c0_7 = arith.constant 0 : index
    %9 = vector.load %arg3[%c0_5, %c0_6, %c0_7] : memref<1x16x512xbf16, #tpu.memory_space<vmem>>, vector<1x16x512xbf16>
    %10 = vector.shape_cast %9 : vector<1x16x512xbf16> to vector<16x512xbf16>
    %c0_8 = arith.constant 0 : index
    %c0_9 = arith.constant 0 : index
    %11 = vector.load %arg4[%c0_8, %c0_9] : memref<512x512xbf16, #tpu.memory_space<vmem>>, vector<512x512xbf16>
    %cst = arith.constant dense<0.000000e+00> : vector<16x512xf32>
    %12 = tpu.matmul %10, %11, %cst {dimension_numbers = #tpu.dot_dimension_numbers<[1], [0], [0], [1], [0, 0, 1, 1], [], []>} : vector<16x512xbf16>, vector<512x512xbf16>, vector<16x512xf32> -> vector<16x512xf32>
    %13 = arith.addf %8, %12 : vector<16x512xf32>
    %c0_10 = arith.constant 0 : index
    %c0_11 = arith.constant 0 : index
    %14 = vector.load %arg7[%c0_10, %c0_11] : memref<16x512xf32, #tpu.memory_space<vmem>>, vector<16x512xf32>
    tpu.vector_store %arg7[%c0_10, %c0_11], %13 {strides = array<i32>} : memref<16x512xf32, #tpu.memory_space<vmem>>, vector<16x512xf32>,
    %c7_i32 = arith.constant 7 : i32
    %15 = arith.cmpi eq, %arg2, %c7_i32 : i32
    %16 = arith.extui %15 : i1 to i32
    %c0_i32_12 = arith.constant 0 : i32
    %17 = arith.cmpi ne, %16, %c0_i32_12 : i32
    scf.if %17 {
      %c0_13 = arith.constant 0 : index
      %c0_14 = arith.constant 0 : index
      %18 = vector.load %arg7[%c0_13, %c0_14] : memref<16x512xf32, #tpu.memory_space<vmem>>, vector<16x512xf32>
      %c0_15 = arith.constant 0 : index
      %c0_16 = arith.constant 0 : index
      %c0_17 = arith.constant 0 : index
      %19 = vector.load %arg5[%c0_15, %c0_16, %c0_17] : memref<1x16x512xf32, #tpu.memory_space<vmem>>, vector<1x16x512xf32>
      %20 = vector.shape_cast %19 : vector<1x16x512xf32> to vector<16x512xf32>
      %21 = vector.shape_cast %18 : vector<16x512xf32> to vector<1x16x512xf32>
      tpu.vector_store %arg5[%c0_15, %c0_16, %c0_17], %21 {strides = array<i32>} : memref<1x16x512xf32, #tpu.memory_space<vmem>>, vector<1x16x512xf32>,
      %cst_18 = arith.constant dense<0.000000e+00> : vector<512xf32>
      %22 = vector.multi_reduction <add>, %18, %cst_18 [0] : vector<16x512xf32> to vector<512xf32>
      %23 = vector.shape_cast %22 : vector<512xf32> to vector<1x512xf32>
      %24 = arith.mulf %18, %18 : vector<16x512xf32>
      %cst_19 = arith.constant dense<0.000000e+00> : vector<512xf32>
      %25 = vector.multi_reduction <add>, %24, %cst_19 [0] : vector<16x512xf32> to vector<512xf32>
      %26 = vector.shape_cast %25 : vector<512xf32> to vector<1x512xf32>
      %27 = tpu.concatenate %23, %26 in 0 : vector<1x512xf32>, vector<1x512xf32> -> vector<2x512xf32>
      %c0_20 = arith.constant 0 : index
      %c0_21 = arith.constant 0 : index
      %c0_22 = arith.constant 0 : index
      %28 = vector.load %arg6[%c0_20, %c0_21, %c0_22] : memref<1x2x512xf32, #tpu.memory_space<vmem>>, vector<1x2x512xf32>
      %29 = vector.shape_cast %28 : vector<1x2x512xf32> to vector<2x512xf32>
      %30 = arith.addf %29, %27 : vector<2x512xf32>
      %c0_23 = arith.constant 0 : index
      %c0_24 = arith.constant 0 : index
      %c0_25 = arith.constant 0 : index
      %31 = vector.load %arg6[%c0_23, %c0_24, %c0_25] : memref<1x2x512xf32, #tpu.memory_space<vmem>>, vector<1x2x512xf32>
      %32 = vector.shape_cast %31 : vector<1x2x512xf32> to vector<2x512xf32>
      %33 = vector.shape_cast %30 : vector<2x512xf32> to vector<1x2x512xf32>
      tpu.vector_store %arg6[%c0_23, %c0_24, %c0_25], %33 {strides = array<i32>} : memref<1x2x512xf32, #tpu.memory_space<vmem>>, vector<1x2x512xf32>,
    } else {
    }
    return
  }
  func.func @transform_0(%arg0: i32, %arg1: i32, %arg2: i32) -> (i32, i32, i32) {
    %c0_i32 = arith.constant 0 : i32
    return %arg0, %arg1, %arg2 : i32, i32, i32
  }
  func.func @transform_1(%arg0: i32, %arg1: i32, %arg2: i32) -> (i32, i32) {
    %c0_i32 = arith.constant 0 : i32
    %c0_i32_0 = arith.constant 0 : i32
    return %arg2, %c0_i32 : i32, i32
  }
  func.func @transform_2(%arg0: i32, %arg1: i32, %arg2: i32) -> (i32, i32, i32) {
    %c0_i32 = arith.constant 0 : i32
    %c0_i32_0 = arith.constant 0 : i32
    return %arg0, %arg1, %c0_i32 : i32, i32, i32
  }
  func.func @transform_3(%arg0: i32, %arg1: i32, %arg2: i32) -> (i32, i32, i32) {
    %c0_i32 = arith.constant 0 : i32
    %c0_i32_0 = arith.constant 0 : i32
    %c0_i32_1 = arith.constant 0 : i32
    return %arg0, %c0_i32, %c0_i32_0 : i32, i32, i32
  }
}

module attributes {stable_mosaic.version = 11 : i64} {
  func.func @_conv_fused_kernel(%arg0: i32, %arg1: i32, %arg2: i32, %arg3: memref<1x8x512xbf16, #tpu.memory_space<vmem>>, %arg4: memref<512x128xbf16, #tpu.memory_space<vmem>>, %arg5: memref<1x128xf32, #tpu.memory_space<vmem>>, %arg6: memref<1x8x128xf32, #tpu.memory_space<vmem>>, %arg7: memref<8x128xf32, #tpu.memory_space<vmem>>) attributes {dimension_semantics = [#tpu.dimension_semantics<parallel>, #tpu.dimension_semantics<parallel>, #tpu.dimension_semantics<arbitrary>], iteration_bounds = array<i64: 2, 1, 16>, scalar_prefetch = 0 : i64, scratch_operands = 1 : i64, tpu.core_type = #tpu.core_type<tc>, window_params = [{transform_indices = @transform_0, window_bounds = array<i64: 1, 8, 512>}, {transform_indices = @transform_1, window_bounds = array<i64: 512, 128>}, {pipeline_mode = #tpu.pipeline_mode<synchronous>, transform_indices = @transform_2, window_bounds = array<i64: 1, 128>}, {transform_indices = @transform_3, window_bounds = array<i64: 1, 8, 128>}]} {
    %c0_i32 = arith.constant 0 : i32
    %0 = arith.cmpi eq, %arg2, %c0_i32 : i32
    %1 = arith.extui %0 : i1 to i32
    %c0_i32_0 = arith.constant 0 : i32
    %2 = arith.cmpi ne, %1, %c0_i32_0 : i32
    scf.if %2 {
      %cst_10 = arith.constant 0.000000e+00 : f32
      %13 = vector.broadcast %cst_10 : f32 to vector<8x128xf32>
      %c0_11 = arith.constant 0 : index
      %c0_12 = arith.constant 0 : index
      %14 = vector.load %arg7[%c0_11, %c0_12] : memref<8x128xf32, #tpu.memory_space<vmem>>, vector<8x128xf32>
      tpu.vector_store %arg7[%c0_11, %c0_12], %13 {strides = array<i32>} : memref<8x128xf32, #tpu.memory_space<vmem>>, vector<8x128xf32>,
    } else {
    }
    %c0 = arith.constant 0 : index
    %c0_1 = arith.constant 0 : index
    %3 = vector.load %arg7[%c0, %c0_1] : memref<8x128xf32, #tpu.memory_space<vmem>>, vector<8x128xf32>
    %c0_2 = arith.constant 0 : index
    %c0_3 = arith.constant 0 : index
    %c0_4 = arith.constant 0 : index
    %4 = vector.load %arg3[%c0_2, %c0_3, %c0_4] : memref<1x8x512xbf16, #tpu.memory_space<vmem>>, vector<1x8x512xbf16>
    %5 = vector.shape_cast %4 : vector<1x8x512xbf16> to vector<8x512xbf16>
    %c0_5 = arith.constant 0 : index
    %c0_6 = arith.constant 0 : index
    %6 = vector.load %arg4[%c0_5, %c0_6] : memref<512x128xbf16, #tpu.memory_space<vmem>>, vector<512x128xbf16>
    %cst = arith.constant dense<0.000000e+00> : vector<8x128xf32>
    %7 = tpu.matmul %5, %6, %cst {dimension_numbers = #tpu.dot_dimension_numbers<[1], [0], [0], [1], [0, 0, 1, 1], [], []>} : vector<8x512xbf16>, vector<512x128xbf16>, vector<8x128xf32> -> vector<8x128xf32>
    %8 = arith.addf %3, %7 : vector<8x128xf32>
    %c0_7 = arith.constant 0 : index
    %c0_8 = arith.constant 0 : index
    %9 = vector.load %arg7[%c0_7, %c0_8] : memref<8x128xf32, #tpu.memory_space<vmem>>, vector<8x128xf32>
    tpu.vector_store %arg7[%c0_7, %c0_8], %8 {strides = array<i32>} : memref<8x128xf32, #tpu.memory_space<vmem>>, vector<8x128xf32>,
    %c15_i32 = arith.constant 15 : i32
    %10 = arith.cmpi eq, %arg2, %c15_i32 : i32
    %11 = arith.extui %10 : i1 to i32
    %c0_i32_9 = arith.constant 0 : i32
    %12 = arith.cmpi ne, %11, %c0_i32_9 : i32
    scf.if %12 {
      %c0_10 = arith.constant 0 : index
      %c0_11 = arith.constant 0 : index
      %13 = vector.load %arg7[%c0_10, %c0_11] : memref<8x128xf32, #tpu.memory_space<vmem>>, vector<8x128xf32>
      %c0_12 = arith.constant 0 : index
      %c0_13 = arith.constant 0 : index
      %14 = vector.load %arg5[%c0_12, %c0_13] : memref<1x128xf32, #tpu.memory_space<vmem>>, vector<1x128xf32>
      %15 = vector.broadcast %14 : vector<1x128xf32> to vector<8x128xf32>
      %16 = arith.addf %13, %15 : vector<8x128xf32>
      %c0_14 = arith.constant 0 : index
      %c0_15 = arith.constant 0 : index
      %c0_16 = arith.constant 0 : index
      %17 = vector.load %arg6[%c0_14, %c0_15, %c0_16] : memref<1x8x128xf32, #tpu.memory_space<vmem>>, vector<1x8x128xf32>
      %18 = vector.shape_cast %17 : vector<1x8x128xf32> to vector<8x128xf32>
      %19 = vector.shape_cast %16 : vector<8x128xf32> to vector<1x8x128xf32>
      tpu.vector_store %arg6[%c0_14, %c0_15, %c0_16], %19 {strides = array<i32>} : memref<1x8x128xf32, #tpu.memory_space<vmem>>, vector<1x8x128xf32>,
    } else {
    }
    return
  }
  func.func @transform_0(%arg0: i32, %arg1: i32, %arg2: i32) -> (i32, i32, i32) {
    %c0_i32 = arith.constant 0 : i32
    return %arg0, %arg1, %arg2 : i32, i32, i32
  }
  func.func @transform_1(%arg0: i32, %arg1: i32, %arg2: i32) -> (i32, i32) {
    %c0_i32 = arith.constant 0 : i32
    %c0_i32_0 = arith.constant 0 : i32
    return %arg2, %c0_i32 : i32, i32
  }
  func.func @transform_2(%arg0: i32, %arg1: i32, %arg2: i32) -> (i32, i32) {
    %c0_i32 = arith.constant 0 : i32
    %c0_i32_0 = arith.constant 0 : i32
    %c0_i32_1 = arith.constant 0 : i32
    return %c0_i32, %c0_i32_0 : i32, i32
  }
  func.func @transform_3(%arg0: i32, %arg1: i32, %arg2: i32) -> (i32, i32, i32) {
    %c0_i32 = arith.constant 0 : i32
    %c0_i32_0 = arith.constant 0 : i32
    return %arg0, %arg1, %c0_i32 : i32, i32, i32
  }
}

</mosaic_0001>

<bundles_post_ra>
// kernel: _lambda_.8
= control target key start
LH: loop header
LB: loop body
LE: loop exit
PB: predicated region body
PF: predicated region fallthrough
CT: control target
= control target key end

     0   :  { %s1552_s12 = smov 0   ;;  %s1554_s13 = smov 0   ;;  %s1695_s0 = inlined_call_operand.vmem [shape: bf16[2,256,128], index: 0, kind: input, shape index: {}]   ;;  %s1696_s1 = inlined_call_operand.vmem [shape: bf16[128,128], index: 1, kind: input, shape index: {}]   ;;  %s1697_s2 = inlined_call_operand.vmem [shape: f32[1,128], index: 2, kind: input, shape index: {}]   ;;  %s1698_s3 = inlined_call_operand.vmem [shape: bf16[2,256,128], index: 3, kind: output, shape index: {}]  }
   0x1   :  { %s1556_s14 = smov 0  }
   0x2 LB: > { %s32_s15 = sadd.s32 1, %s1526_s13  ;;  %p1179_p0 = scmp.ge.s32.totalorder %s1530_s14, 1  ;;  %s1530_s14 = sphi %s1556_s14, %s13_s14   ;;  %s1526_s13 = sphi %s1554_s13, %s1700_s13   ;;  %s1522_s12 = sphi %s1552_s12, %s1699_s12  }
   0x3   : > { %p34_p1 = scmp.ge.s32.totalorder %s32_s15, 2  ;;  %p181_p2 = scmp.lt.s32.totalorder %s1530_s14, 3 }
   0x5   : > { %s1702_s15 = smov (%p34_p1, %s32_s15), 0  ;;  %p182_p3 = pnand %p1179_p0, %p181_p2 }
   0x6   : > { %v1484_v0 = vld [vmem:[%s1696_s1] sm:$0xff] (!%p182_p3)   ;;  %p222_p4 = scmp.lt.s32.totalorder (!%p182_p3), %s1522_s12, 1  ;;  %v1485_v1 = vld [vmem:[%s1696_s1 + $0x8] sm:$0xff] (!%p182_p3)   ;;  %v1486_v2 = vld [vmem:[%s1696_s1 + $0x10] sm:$0xff] (!%p182_p3)  }
   0x7   : > { %185 = sbr.rel (%p182_p3) target bundleno = 294 (0x126), region = 32  ;;  %1396 = vmatprep.subr.bf16.mxu0 (!%p182_p3), %v1484_v0  ;;  %1444 = vmatprep.subr.bf16.mxu1 (!%p182_p3), %v1484_v0  ;;  %v1487_v3 = vld [vmem:[%s1696_s1 + $0x18] sm:$0xff] (!%p182_p3)   ;;  %v1488_v6 = vld [vmem:[%s1696_s1 + $0x20] sm:$0xff] (!%p182_p3)   ;;  %v1489_v7 = vld [vmem:[%s1696_s1 + $0x28] sm:$0xff] (!%p182_p3)  }
   0x8   : > { %1397 = vmatpush3.bf16.msra.mxu0 (!%p182_p3), %v1484_v0  ;;  %1452 = vmatpush3.bf16.msra.mxu1 (!%p182_p3), %v1484_v0  ;;  %v1490_v8 = vld [vmem:[%s1696_s1 + $0x30] sm:$0xff] (!%p182_p3)   ;;  %v1491_v9 = vld [vmem:[%s1696_s1 + $0x38] sm:$0xff] (!%p182_p3)   ;;  %v1623_v24 = vld [vmem:[%s1697_s2] ss:$0 sm:$0xff] (!%p182_p3) }
   0x9   : > { %1398 = vmatprep.subr.bf16.mxu0 (!%p182_p3), %v1485_v1  ;;  %1445 = vmatprep.subr.bf16.mxu1 (!%p182_p3), %v1485_v1 }
   0xc   : > { %1399 = vmatpush3.bf16.msra.mxu0 (!%p182_p3), %v1485_v1  ;;  %1453 = vmatpush3.bf16.msra.mxu1 (!%p182_p3), %v1485_v1 }
   0xd   : > { %1400 = vmatprep.subr.bf16.mxu0 (!%p182_p3), %v1486_v2  ;;  %1446 = vmatprep.subr.bf16.mxu1 (!%p182_p3), %v1486_v2 }
   0xe   : > { %s1704_s12 = smov (!%p222_p4, %s1522_s12), 1 }
   0xf   : > { %s1243_s22 = sshll.u32 %s1704_s12, 7 }
  0x10   : > { %s1587_s25 = scalar_lea.vmem %s1695_s0, %s1243_s22  ;;  %1401 = vmatpush3.bf16.msra.mxu0 %v1486_v2  ;;  %1454 = vmatpush3.bf16.msra.mxu1 %v1486_v2  ;;  %s1640_s17 = scalar_lea.vmem %s1698_s3, %s1243_s22 }
  0x11   : > { %v1492_v4 = vld [vmem:[%s1587_s25] sm:$0xff]   ;;  %1402 = vmatprep.subr.bf16.mxu0 %v1487_v3  ;;  %1447 = vmatprep.subr.bf16.mxu1 %v1487_v3  ;;  %v1494_v10 = vld [vmem:[%s1587_s25 + $0x8] sm:$0xff]   ;;  %v1496_v12 = vld [vmem:[%s1587_s25 + $0x10] sm:$0xff]  }
  0x12   : > { %v1493_v5 = vld [vmem:[%s1587_s25 + $0x40] sm:$0xff]   ;;  %1412 = vmatprep.mubr.bf16.mxu0 %v1492_v4  ;;  %v1495_v11 = vld [vmem:[%s1587_s25 + $0x48] sm:$0xff]   ;;  %v1497_v13 = vld [vmem:[%s1587_s25 + $0x50] sm:$0xff]  }
  0x13   : > { %1428 = vmatprep.mubr.bf16.mxu1 %v1493_v5  ;;  %v1498_v14 = vld [vmem:[%s1587_s25 + $0x18] sm:$0xff]   ;;  %v1500_v16 = vld [vmem:[%s1587_s25 + $0x20] sm:$0xff]   ;;  %v1502_v18 = vld [vmem:[%s1587_s25 + $0x28] sm:$0xff]  }
  0x14   : > { %1403 = vmatpush3.bf16.msra.mxu0 %v1487_v3  ;;  %1455 = vmatpush3.bf16.msra.mxu1 %v1487_v3  ;;  %v1499_v15 = vld [vmem:[%s1587_s25 + $0x58] sm:$0xff]   ;;  %v1501_v17 = vld [vmem:[%s1587_s25 + $0x60] sm:$0xff]   ;;  %v1503_v19 = vld [vmem:[%s1587_s25 + $0x68] sm:$0xff]  }
  0x15   : > { %1404 = vmatprep.subr.bf16.mxu0 %v1488_v6  ;;  %1448 = vmatprep.subr.bf16.mxu1 %v1488_v6  ;;  %v1504_v20 = vld [vmem:[%s1587_s25 + $0x30] sm:$0xff]   ;;  %v1506_v22 = vld [vmem:[%s1587_s25 + $0x38] sm:$0xff]  }
  0x16   : > { %v1505_v21 = vld [vmem:[%s1587_s25 + $0x70] sm:$0xff]   ;;  %v1507_v23 = vld [vmem:[%s1587_s25 + $0x78] sm:$0xff]  }
  0x18   : > { %1405 = vmatpush3.bf16.msra.mxu0 %v1488_v6  ;;  %1456 = vmatpush3.bf16.msra.mxu1 %v1488_v6 }
  0x19   : > { %1406 = vmatprep.subr.bf16.mxu0 %v1489_v7  ;;  %1449 = vmatprep.subr.bf16.mxu1 %v1489_v7 }
  0x1c   : > { %1407 = vmatpush3.bf16.msra.mxu0 %v1489_v7  ;;  %1457 = vmatpush3.bf16.msra.mxu1 %v1489_v7 }
  0x1d   : > { %1408 = vmatprep.subr.bf16.mxu0 %v1490_v8  ;;  %1450 = vmatprep.subr.bf16.mxu1 %v1490_v8 }
  0x20   : > { %1409 = vmatpush3.bf16.msra.mxu0 %v1490_v8  ;;  %1458 = vmatpush3.bf16.msra.mxu1 %v1490_v8 }
  0x21   : > { %1410 = vmatprep.subr.bf16.mxu0 %v1491_v9  ;;  %1451 = vmatprep.subr.bf16.mxu1 %v1491_v9 }
  0x24   : > { %1411 = vmatpush3.bf16.msra.mxu0 %v1491_v9  ;;  %1459 = vmatpush3.bf16.msra.mxu1 %v1491_v9 }
  0x27   : > { %1413 = vmatmul.mubr.bf16.vlgmr.msra.gmra.mrb[0].mxu0 %v1494_v10  ;;  %1429 = vmatmul.mubr.bf16.vlgmr.msra.gmra.mrb[0].mxu1 %v1495_v11 }
  0x28   : > { %1416 = vmatprep.mubr.bf16.mxu0 %v1496_v12  ;;  %1432 = vmatprep.mubr.bf16.mxu1 %v1497_v13 }
  0x2f   : > { %1417 = vmatmul.mubr.bf16.gmra.mrb[4].mxu0 %v1498_v14  ;;  %1433 = vmatmul.mubr.bf16.gmra.mrb[4].mxu1 %v1499_v15 }
  0x30   : > { %1420 = vmatprep.mubr.bf16.mxu0 %v1500_v16  ;;  %1436 = vmatprep.mubr.bf16.mxu1 %v1501_v17 }
  0x37   : > { %1421 = vmatmul.mubr.bf16.gmra.mrb[8].mxu0 %v1502_v18  ;;  %1437 = vmatmul.mubr.bf16.gmra.mrb[8].mxu1 %v1503_v19 }
  0x38   : > { %1424 = vmatprep.mubr.bf16.mxu0 %v1504_v20  ;;  %1440 = vmatprep.mubr.bf16.mxu1 %v1505_v21 }
  0x3f   : > { %1425 = vmatmul.mubr.bf16.gmra.mrb[12].mxu0 %v1506_v22  ;;  %1441 = vmatmul.mubr.bf16.gmra.mrb[12].mxu1 %v1507_v23 }
  0xfa   : > { %v1414_v25 = vpop.f32.mrb[0].mxu0  ;;  %v1430_v26 = vpop.f32.mrb[0].mxu1 }
  0xfb   : > { %v780_v27 = vadd.f32 %v1414_v25, %v1623_v24  ;;  %v796_v28 = vadd.f32 %v1430_v26, %v1623_v24  ;;  %v545_v29 = vpop.f32.mrb[1].mxu0  ;;  %v609_v30 = vpop.f32.mrb[1].mxu1 }
  0xfc   : > { %v778_v31 = vadd.f32 %v1623_v24, %v545_v29  ;;  %v794_v32 = vadd.f32 %v1623_v24, %v609_v30  ;;  %v1415_v33 = vpop.f32.mrb[2].mxu0  ;;  %v1431_v34 = vpop.f32.mrb[2].mxu1 }
  0xfd   : > { %vm812_vm0 = vcmp.gt.f32.partialorder %v780_v27, 0.0  ;;  %v844_v35 = vmul.f32 0.2, %v780_v27  ;;  %vm828_vm1 = vcmp.gt.f32.partialorder %v796_v28, 0.0  ;;  %v860_v36 = vmul.f32 0.2, %v796_v28 }
  0xfe   : > { %vm810_vm2 = vcmp.gt.f32.partialorder %v778_v31, 0.0  ;;  %v842_v37 = vmul.f32 0.2, %v778_v31  ;;  %vm826_vm3 = vcmp.gt.f32.partialorder %v794_v32, 0.0  ;;  %v858_v38 = vmul.f32 0.2, %v794_v32 }
  0xff   : > { %v781_v39 = vadd.f32 %v1415_v33, %v1623_v24  ;;  %v797_v40 = vadd.f32 %v1431_v34, %v1623_v24  ;;  %v548_v41 = vpop.f32.mrb[3].mxu0  ;;  %v612_v42 = vpop.f32.mrb[3].mxu1  ;;  %v876_v43 = vsel %vm812_vm0, %v780_v27, %v844_v35  ;;  %v892_v44 = vsel %vm828_vm1, %v796_v28, %v860_v36 }
 0x100   : > { %v779_v45 = vadd.f32 %v1623_v24, %v548_v41  ;;  %v795_v46 = vadd.f32 %v1623_v24, %v612_v42  ;;  %v874_v51 = vsel %vm810_vm2, %v778_v31, %v842_v37  ;;  %v890_v52 = vsel %vm826_vm3, %v794_v32, %v858_v38 }
 0x101   : > { %vm813_vm4 = vcmp.gt.f32.partialorder %v781_v39, 0.0  ;;  %v845_v47 = vmul.f32 0.2, %v781_v39  ;;  %vm829_vm5 = vcmp.gt.f32.partialorder %v797_v40, 0.0  ;;  %v861_v48 = vmul.f32 0.2, %v797_v40 }
 0x102   : > { %vm811_vm6 = vcmp.gt.f32.partialorder %v779_v45, 0.0  ;;  %v843_v49 = vmul.f32 0.2, %v779_v45  ;;  %vm827_vm7 = vcmp.gt.f32.partialorder %v795_v46, 0.0  ;;  %v859_v50 = vmul.f32 0.2, %v795_v46 }
 0x103   : > { %v877_v53 = vsel %vm813_vm4, %v781_v39, %v845_v47  ;;  %v893_v54 = vsel %vm829_vm5, %v797_v40, %v861_v48  ;;  %v1418_v55 = vpop.f32.mrb[4].mxu0  ;;  %v1434_v56 = vpop.f32.mrb[4].mxu1 }
 0x104   : > { %v1285_v57 = vpack.c.bf16 %v877_v53, %v876_v43  ;;  %v1325_v58 = vpack.c.bf16 %v893_v54, %v892_v44  ;;  %v875_v59 = vsel %vm811_vm6, %v779_v45, %v843_v49  ;;  %v891_v60 = vsel %vm827_vm7, %v795_v46, %v859_v50  ;;  %v561_v61 = vpop.f32.mrb[5].mxu0  ;;  %v625_v62 = vpop.f32.mrb[5].mxu1 }
 0x105   : > { %v1280_v63 = vpack.c.bf16 %v875_v59, %v874_v51  ;;  %v1320_v0 = vpack.c.bf16 %v891_v60, %v890_v52  ;;  %v784_v1 = vadd.f32 %v1418_v55, %v1623_v24  ;;  %v800_v2 = vadd.f32 %v1434_v56, %v1623_v24  ;;  %v1419_v3 = vpop.f32.mrb[6].mxu0  ;;  %v1435_v4 = vpop.f32.mrb[6].mxu1 }
 0x106   : > { %1357 = vst [vmem:[%s1640_s17 + $0x8] sm:$0xff] %v1285_v57   ;;  %1365 = vst [vmem:[%s1640_s17 + $0x48] sm:$0xff] %v1325_v58   ;;  %v782_v5 = vadd.f32 %v1623_v24, %v561_v61  ;;  %v798_v6 = vadd.f32 %v1623_v24, %v625_v62  ;;  %v785_v7 = vadd.f32 %v1419_v3, %v1623_v24  ;;  %v564_v9 = vpop.f32.mrb[7].mxu0  ;;  %v628_v10 = vpop.f32.mrb[7].mxu1 }
 0x107   : > { %v801_v8 = vadd.f32 %v1435_v4, %v1623_v24  ;;  %1281 = vst [vmem:[%s1640_s17] sm:$0xff] %v1280_v63   ;;  %1364 = vst [vmem:[%s1640_s17 + $0x40] sm:$0xff] %v1320_v0   ;;  %vm816_vm8 = vcmp.gt.f32.partialorder %v784_v1, 0.0  ;;  %v848_v11 = vmul.f32 0.2, %v784_v1  ;;  %vm832_vm9 = vcmp.gt.f32.partialorder %v800_v2, 0.0 }
 0x108   : > { %v864_v12 = vmul.f32 0.2, %v800_v2  ;;  %vm814_vm10 = vcmp.gt.f32.partialorder %v782_v5, 0.0  ;;  %v846_v13 = vmul.f32 0.2, %v782_v5  ;;  %vm830_vm11 = vcmp.gt.f32.partialorder %v798_v6, 0.0 }
 0x109   : > { %v880_v14 = vsel %vm816_vm8, %v784_v1, %v848_v11  ;;  %v862_v15 = vmul.f32 0.2, %v798_v6  ;;  %vm817_vm12 = vcmp.gt.f32.partialorder %v785_v7, 0.0  ;;  %v849_v16 = vmul.f32 0.2, %v785_v7 }
 0x10a   : > { %v896_v17 = vsel %vm832_vm9, %v800_v2, %v864_v12  ;;  %v878_v18 = vsel %vm814_vm10, %v782_v5, %v846_v13  ;;  %vm833_vm13 = vcmp.gt.f32.partialorder %v801_v8, 0.0  ;;  %v865_v19 = vmul.f32 0.2, %v801_v8  ;;  %v1422_v20 = vpop.f32.mrb[8].mxu0  ;;  %v1438_v21 = vpop.f32.mrb[8].mxu1 }
 0x10b   : > { %v881_v22 = vsel %vm817_vm12, %v785_v7, %v849_v16  ;;  %v783_v23 = vadd.f32 %v1623_v24, %v564_v9  ;;  %v799_v25 = vadd.f32 %v1623_v24, %v628_v10  ;;  %v788_v26 = vadd.f32 %v1422_v20, %v1623_v24  ;;  %v577_v27 = vpop.f32.mrb[9].mxu0  ;;  %v641_v28 = vpop.f32.mrb[9].mxu1 }
 0x10c   : > { %v1295_v29 = vpack.c.bf16 %v881_v22, %v880_v14  ;;  %v897_v30 = vsel %vm833_vm13, %v801_v8, %v865_v19  ;;  %v804_v31 = vadd.f32 %v1438_v21, %v1623_v24  ;;  %v786_v32 = vadd.f32 %v1623_v24, %v577_v27  ;;  %v1423_v33 = vpop.f32.mrb[10].mxu0  ;;  %v1439_v34 = vpop.f32.mrb[10].mxu1 }
 0x10d   : > { %v1335_v35 = vpack.c.bf16 %v897_v30, %v896_v17  ;;  %vm815_vm14 = vcmp.gt.f32.partialorder %v783_v23, 0.0  ;;  %v847_v36 = vmul.f32 0.2, %v783_v23  ;;  %vm831_vm15 = vcmp.gt.f32.partialorder %v799_v25, 0.0  ;;  %v580_v37 = vpop.f32.mrb[11].mxu0  ;;  %v644_v38 = vpop.f32.mrb[11].mxu1 }
 0x10e   : > { %1359 = vst [vmem:[%s1640_s17 + $0x18] sm:$0xff] %v1295_v29   ;;  %v863_v39 = vmul.f32 0.2, %v799_v25  ;;  %vm820_vm0 = vcmp.gt.f32.partialorder %v788_v26, 0.0  ;;  %v852_v40 = vmul.f32 0.2, %v788_v26  ;;  %v894_v41 = vsel %vm830_vm11, %v798_v6, %v862_v15 }
 0x10f   : > { %vm836_vm1 = vcmp.gt.f32.partialorder %v804_v31, 0.0  ;;  %1367 = vst [vmem:[%s1640_s17 + $0x58] sm:$0xff] %v1335_v35   ;;  %v879_v42 = vsel %vm815_vm14, %v783_v23, %v847_v36  ;;  %v868_v43 = vmul.f32 0.2, %v804_v31  ;;  %vm818_vm2 = vcmp.gt.f32.partialorder %v786_v32, 0.0 }
 0x110   : > { %v1290_v44 = vpack.c.bf16 %v879_v42, %v878_v18  ;;  %v895_v45 = vsel %vm831_vm15, %v799_v25, %v863_v39  ;;  %v850_v46 = vmul.f32 0.2, %v786_v32  ;;  %v802_v47 = vadd.f32 %v1623_v24, %v641_v28 }
 0x111   : > { %v1330_v48 = vpack.c.bf16 %v895_v45, %v894_v41  ;;  %v884_v49 = vsel %vm820_vm0, %v788_v26, %v852_v40  ;;  %v900_v50 = vsel %vm836_vm1, %v804_v31, %v868_v43  ;;  %v789_v51 = vadd.f32 %v1423_v33, %v1623_v24 }
 0x112   : > { %1358 = vst [vmem:[%s1640_s17 + $0x10] sm:$0xff] %v1290_v44   ;;  %vm834_vm3 = vcmp.gt.f32.partialorder %v802_v47, 0.0  ;;  %v866_v52 = vmul.f32 0.2, %v802_v47  ;;  %v805_v53 = vadd.f32 %v1439_v34, %v1623_v24  ;;  %v787_v54 = vadd.f32 %v1623_v24, %v580_v37  ;;  %v1426_v55 = vpop.f32.mrb[12].mxu0  ;;  %v1442_v56 = vpop.f32.mrb[12].mxu1 }
 0x113   : > { %1366 = vst [vmem:[%s1640_s17 + $0x50] sm:$0xff] %v1330_v48   ;;  %vm821_vm4 = vcmp.gt.f32.partialorder %v789_v51, 0.0  ;;  %v853_v57 = vmul.f32 0.2, %v789_v51  ;;  %v803_v58 = vadd.f32 %v1623_v24, %v644_v38  ;;  %v792_v59 = vadd.f32 %v1426_v55, %v1623_v24  ;;  %v593_v60 = vpop.f32.mrb[13].mxu0  ;;  %v657_v61 = vpop.f32.mrb[13].mxu1 }
 0x114   : > { %v882_v62 = vsel %vm818_vm2, %v786_v32, %v850_v46  ;;  %vm837_vm5 = vcmp.gt.f32.partialorder %v805_v53, 0.0  ;;  %v869_v63 = vmul.f32 0.2, %v805_v53  ;;  %vm819_vm6 = vcmp.gt.f32.partialorder %v787_v54, 0.0  ;;  %v1427_v0 = vpop.f32.mrb[14].mxu0  ;;  %v1443_v1 = vpop.f32.mrb[14].mxu1 }
 0x115   : > { %v885_v2 = vsel %vm821_vm4, %v789_v51, %v853_v57  ;;  %v851_v3 = vmul.f32 0.2, %v787_v54  ;;  %vm835_vm7 = vcmp.gt.f32.partialorder %v803_v58, 0.0  ;;  %v867_v4 = vmul.f32 0.2, %v803_v58  ;;  %v596_v5 = vpop.f32.mrb[15].mxu0 }
 0x116   : > { %v898_v6 = vsel %vm834_vm3, %v802_v47, %v866_v52  ;;  %v1305_v7 = vpack.c.bf16 %v885_v2, %v884_v49  ;;  %v901_v8 = vsel %vm837_vm5, %v805_v53, %v869_v63  ;;  %v856_v9 = vmul.f32 0.2, %v792_v59  ;;  %v660_v10 = vpop.f32.mrb[15].mxu1 }
 0x117   : > { %v1345_v11 = vpack.c.bf16 %v901_v8, %v900_v50  ;;  %v883_v12 = vsel %vm819_vm6, %v787_v54, %v851_v3  ;;  %v899_v13 = vsel %vm835_vm7, %v803_v58, %v867_v4  ;;  %v808_v14 = vadd.f32 %v1442_v56, %v1623_v24 }
 0x118   : > { %1361 = vst [vmem:[%s1640_s17 + $0x28] sm:$0xff] %v1305_v7   ;;  %v1300_v15 = vpack.c.bf16 %v883_v12, %v882_v62  ;;  %v1340_v16 = vpack.c.bf16 %v899_v13, %v898_v6  ;;  %vm824_vm8 = vcmp.gt.f32.partialorder %v792_v59, 0.0  ;;  %v790_v17 = vadd.f32 %v1623_v24, %v593_v60 }
 0x119   : > { %1369 = vst [vmem:[%s1640_s17 + $0x68] sm:$0xff] %v1345_v11   ;;  %vm840_vm9 = vcmp.gt.f32.partialorder %v808_v14, 0.0  ;;  %v872_v18 = vmul.f32 0.2, %v808_v14  ;;  %v806_v19 = vadd.f32 %v1623_v24, %v657_v61  ;;  %v793_v20 = vadd.f32 %v1427_v0, %v1623_v24 }
 0x11a   : > { %1360 = vst [vmem:[%s1640_s17 + $0x20] sm:$0xff] %v1300_v15   ;;  %1368 = vst [vmem:[%s1640_s17 + $0x60] sm:$0xff] %v1340_v16   ;;  %v854_v21 = vmul.f32 0.2, %v790_v17  ;;  %v809_v22 = vadd.f32 %v1443_v1, %v1623_v24  ;;  %v791_v23 = vadd.f32 %v1623_v24, %v596_v5  ;;  %v888_v25 = vsel %vm824_vm8, %v792_v59, %v856_v9 }
 0x11b   : > { %vm822_vm10 = vcmp.gt.f32.partialorder %v790_v17, 0.0  ;;  %vm825_vm11 = vcmp.gt.f32.partialorder %v793_v20, 0.0  ;;  %v904_v26 = vsel %vm840_vm9, %v808_v14, %v872_v18  ;;  %v857_v27 = vmul.f32 0.2, %v793_v20 }
 0x11c   : > { %vm841_vm12 = vcmp.gt.f32.partialorder %v809_v22, 0.0  ;;  %v873_v28 = vmul.f32 0.2, %v809_v22  ;;  %vm838_vm13 = vcmp.gt.f32.partialorder %v806_v19, 0.0  ;;  %vm823_vm14 = vcmp.gt.f32.partialorder %v791_v23, 0.0 }
 0x11d   : > { %v855_v29 = vmul.f32 0.2, %v791_v23  ;;  %v807_v30 = vadd.f32 %v1623_v24, %v660_v10  ;;  %v886_v31 = vsel %vm822_vm10, %v790_v17, %v854_v21  ;;  %v870_v32 = vmul.f32 0.2, %v806_v19 }
 0x11e   : > { %v889_v33 = vsel %vm825_vm11, %v793_v20, %v857_v27  ;;  %v905_v34 = vsel %vm841_vm12, %v809_v22, %v873_v28 }
 0x11f   : > { %v1315_v35 = vpack.c.bf16 %v889_v33, %v888_v25  ;;  %v1355_v36 = vpack.c.bf16 %v905_v34, %v904_v26  ;;  %v887_v37 = vsel %vm823_vm14, %v791_v23, %v855_v29  ;;  %vm839_vm15 = vcmp.gt.f32.partialorder %v807_v30, 0.0 }
 0x120   : > { %v1310_v38 = vpack.c.bf16 %v887_v37, %v886_v31  ;;  %v871_v39 = vmul.f32 0.2, %v807_v30  ;;  %v902_v40 = vsel %vm838_vm13, %v806_v19, %v870_v32 }
 0x121   : > { %1363 = vst [vmem:[%s1640_s17 + $0x38] sm:$0xff] %v1315_v35   ;;  %1371 = vst [vmem:[%s1640_s17 + $0x78] sm:$0xff] %v1355_v36  }
 0x122   : > { %1362 = vst [vmem:[%s1640_s17 + $0x30] sm:$0xff] %v1310_v38   ;;  %v903_v41 = vsel %vm839_vm15, %v807_v30, %v871_v39 }
 0x123   : > { %v1350_v42 = vpack.c.bf16 %v903_v41, %v902_v40 }
 0x125   : > { %1370 = vst [vmem:[%s1640_s17 + $0x70] sm:$0xff] %v1350_v42  }
 0x126 PF: > { %s13_s14 = sadd.s32 1, %s1530_s14   ;;  %s1699_s12 = smov %s1526_s13 }
 0x127   : > { %p10_p5 = scmp.ge.s32.totalorder %s13_s14, 4   ;;  %s1700_s13 = smov %s1702_s15 }
 0x129   :  { %12 = sbr.rel (!%p10_p5) target bundleno = 2 (0x2), region = 73 }

// kernel: _lambda_.9
= control target key start
LH: loop header
LB: loop body
LE: loop exit
PB: predicated region body
PF: predicated region fallthrough
CT: control target
= control target key end

     0   :  { %s1362_s12 = smov 0   ;;  %s1364_s13 = smov 0   ;;  %s1548_s0 = inlined_call_operand.vmem [shape: bf16[2,64,1024], index: 0, kind: input, shape index: {}]   ;;  %s1549_s1 = inlined_call_operand.vmem [shape: bf16[1024,128], index: 1, kind: input, shape index: {}]   ;;  %s1550_s2 = inlined_call_operand.vmem [shape: f32[2,64,128], index: 2, kind: output, shape index: {0}]   ;;  %s1551_s3 = inlined_call_operand.vmem [shape: f32[2,2,128], index: 3, kind: output, shape index: {1}]  }
   0x1   :  { %s1366_s14 = smov 0   ;;  %s1368_s15 = smov 0  }
   0x2   :  { %s1370_s16 = smov 0   ;;  %s1372_s17 = smov 0  }
   0x3   :  { %s1374_s18 = smov 0  }
   0x4 LB: > { %s26_s19 = sadd.s32 1, %s1330_s16  ;;  %s33_s20 = sadd.s32 1, %s1334_s17  ;;  %s1338_s18 = sphi %s1374_s18, %s14_s18   ;;  %s1334_s17 = sphi %s1372_s17, %s1557_s17   ;;  %s1330_s16 = sphi %s1370_s16, %s1556_s16   ;;  %s1326_s15 = sphi %s1368_s15, %s1555_s15   ;;  %s1322_s14 = sphi %s1366_s14, %s1554_s14   ;;  %s1318_s13 = sphi %s1364_s13, %s1553_s13   ;;  %s1314_s12 = sphi %s1362_s12, %s1552_s12  }
   0x5   : > { %p27_p0 = scmp.ge.s32.totalorder %s26_s19, 2  ;;  %p51_p1 = scmp.ne.s32.totalorder %s1318_s13, %s1314_s12 }
   0x6   : > { %p52_p2 = scmp.eq.s32.totalorder %s1338_s18, 0  ;;  %s44_s24 = sadd.s32 1, %s1318_s13 }
   0x7   : > { %s1559_s19 = smov (%p27_p0, %s26_s19), 0  ;;  %s1561_s20 = smov (!%p27_p0, %s33_s20), %s1334_s17 }
   0x8   : > { %p53_p3 = por %p52_p2, %p51_p1  ;;  %p35_p4 = scmp.ge.s32.totalorder %s1561_s20, 2 }
   0x9   : > { %s40_s21 = ssub.s32 %s1330_s16, %s1559_s19  ;;  %p1023_p6 = scmp.ge.s32.totalorder %s1338_s18, 4 }
   0xa   : > { %s1563_s20 = smov (%p35_p4, %s1561_s20), 0 }
   0xb   : > { %s37_s22 = ssub.s32 %s1334_s17, %s1563_s20  ;;  %157 = sbr.rel (%p1023_p6) target bundleno = 33 (0x21), region = 16 }
   0xc   : > { %s41_s23 = sor.u32 %s40_s21, %s37_s22 }
   0xd   : > { %p42_p5 = scmp.eq.s32.totalorder %s41_s23, 0 }
   0xf   : > { %s1413_s25 = scalar_select %p42_p5, %s1318_s13, %s44_s24  }
  0x12   : > { %160 = sbr.rel (!%p53_p3) target bundleno = 33 (0x21), region = 20  ;;  %s162_s26 = sand.u32 (%p53_p3), 1, %s1318_s13  }
  0x13   : > { %s1025_s27 = sshll.u32 (%p53_p3), %s1330_s16, 2  ;;  %s1024_s28 = sshll.u32 (%p53_p3), %s162_s26, 7 }
  0x14   : > { %s1026_s29 = sshll.u32 (%p53_p3), %s1334_s17, 6  ;;  %s164_s8 = scalar_lea.vmem (%p53_p3), [#allocation3], %s1024_s28 }
  0x15   : > { %s170_s30 = sadd.s32 (%p53_p3), %s1026_s29, %s1025_s27 }
  0x16   : > { %s1027_s4 = sshll.u32 (%p53_p3), %s170_s30, 2 }
  0x17   : > { %s1422_s7 = scalar_lea.vmem (%p53_p3), %s1548_s0, %s1027_s4 }
  0x18   : > { %v185_v0 = vld [vmem:[%s1422_s7] sm:$0xff] (%p53_p3)  ;;  %v187_v1 = vld [vmem:[%s1422_s7 + $0x8] sm:$0xff] (%p53_p3) }
  0x19   : > { %v189_v2 = vld [vmem:[%s1422_s7 + $0x20] sm:$0xff]  ;;  %186 = vst [vmem:[%s164_s8] sm:$0xff] %v185_v0  ;;  %188 = vst [vmem:[%s164_s8 + $0x8] sm:$0xff] %v187_v1  ;;  %v191_v3 = vld [vmem:[%s1422_s7 + $0x28] sm:$0xff] }
  0x1a   : > { %190 = vst [vmem:[%s164_s8 + $0x10] sm:$0xff] %v189_v2  ;;  %v193_v4 = vld [vmem:[%s1422_s7 + $0x40] sm:$0xff]  ;;  %v195_v5 = vld [vmem:[%s1422_s7 + $0x48] sm:$0xff]  ;;  %192 = vst [vmem:[%s164_s8 + $0x18] sm:$0xff] %v191_v3 }
  0x1b   : > { %194 = vst [vmem:[%s164_s8 + $0x20] sm:$0xff] %v193_v4  ;;  %196 = vst [vmem:[%s164_s8 + $0x28] sm:$0xff] %v195_v5  ;;  %v197_v6 = vld [vmem:[%s1422_s7 + $0x60] sm:$0xff]  ;;  %v199_v7 = vld [vmem:[%s1422_s7 + $0x68] sm:$0xff] }
  0x1c   : > { %v201_v8 = vld [vmem:[%s1422_s7 + $0x80] sm:$0xff]  ;;  %198 = vst [vmem:[%s164_s8 + $0x30] sm:$0xff] %v197_v6  ;;  %200 = vst [vmem:[%s164_s8 + $0x38] sm:$0xff] %v199_v7  ;;  %v203_v9 = vld [vmem:[%s1422_s7 + $0x88] sm:$0xff] }
  0x1d   : > { %202 = vst [vmem:[%s164_s8 + $0x40] sm:$0xff] %v201_v8  ;;  %v205_v10 = vld [vmem:[%s1422_s7 + $0xa0] sm:$0xff]  ;;  %v207_v11 = vld [vmem:[%s1422_s7 + $0xa8] sm:$0xff]  ;;  %204 = vst [vmem:[%s164_s8 + $0x48] sm:$0xff] %v203_v9 }
  0x1e   : > { %206 = vst [vmem:[%s164_s8 + $0x50] sm:$0xff] %v205_v10  ;;  %208 = vst [vmem:[%s164_s8 + $0x58] sm:$0xff] %v207_v11  ;;  %v209_v12 = vld [vmem:[%s1422_s7 + $0xc0] sm:$0xff]  ;;  %v211_v13 = vld [vmem:[%s1422_s7 + $0xc8] sm:$0xff] }
  0x1f   : > { %v213_v14 = vld [vmem:[%s1422_s7 + $0xe0] sm:$0xff]  ;;  %210 = vst [vmem:[%s164_s8 + $0x60] sm:$0xff] %v209_v12  ;;  %212 = vst [vmem:[%s164_s8 + $0x68] sm:$0xff] %v211_v13  ;;  %v215_v15 = vld [vmem:[%s1422_s7 + $0xe8] sm:$0xff] }
  0x20   : > { %214 = vst [vmem:[%s164_s8 + $0x70] sm:$0xff] %v213_v14  ;;  %216 = vst [vmem:[%s164_s8 + $0x78] sm:$0xff] %v215_v15 }
  0x21 PF: > { %p1028_p7 = scmp.ge.s32.totalorder %s1338_s18, 1  ;;  %p230_p8 = scmp.lt.s32.totalorder %s1338_s18, 5 }
  0x23   : > { %p231_p9 = pnand %p1028_p7, %p230_p8 }
  0x24   : > { %s237_s9 = sand.u32 (!%p231_p9), 1, %s1314_s12   ;;  %s1030_s10 = sshll.u32 (!%p231_p9), %s1322_s14, 6 }
  0x25   : > { %234 = sbr.rel (%p231_p9) target bundleno = 369 (0x171), region = 47  ;;  %s1029_s11 = sshll.u32 (!%p231_p9), %s237_s9, 7 }
  0x26   : > { %p276_p10 = scmp.lt.s32.totalorder (!%p231_p9), %s1030_s10, 127  ;;  %p282_p11 = scmp.lt.s32.totalorder (!%p231_p9), %s1326_s15, 1 }
  0x27   : > { %p296_p12 = scmp.eq.s32.totalorder (!%p231_p9), %s1322_s14, 0  ;;  %s1462_s6 = scalar_lea.vmem (!%p231_p9), [#allocation3], %s1029_s11 }
  0x28   : > { %p1035_p13 = scmp.ne.s32.totalorder (!%p231_p9), %s1322_s14, 0 }
  0x2c   : > { %s1565_s10 = smov (!%p276_p10, %s1030_s10), 127  ;;  %s1567_s15 = smov (!%p282_p11, %s1326_s15), 1 }
  0x2d   : > { %s1031_s21 = sshll.u32 %s1565_s10, 2  ;;  %s1088_s26 = sshll.u32 %s1567_s15, 6  ;;  %v1340_v16 = vmov (!%p1035_p13), 0.0  }
  0x2e   : > { %s1450_s24 = scalar_lea.vmem %s1549_s1, %s1031_s21  ;;  %s1455_s29 = scalar_lea.vmem %s1550_s2, %s1088_s26  ;;  %300 = vst [vmem:[#allocation2] sm:$0xff] (!%p1035_p13), %v1340_v16  ;;  %301 = vst [vmem:[#allocation2 + $0x8] sm:$0xff] (!%p1035_p13), %v1340_v16 }
  0x2f   : > { %s1034_s12 = sshll.u32 %s1567_s15, 1  ;;  %299 = sbr.rel (%p1035_p13) target bundleno = 54 (0x36), region = 55  ;;  %302 = vst [vmem:[#allocation2 + $0x10] sm:$0xff] (!%p1035_p13), %v1340_v16  ;;  %303 = vst [vmem:[#allocation2 + $0x18] sm:$0xff] (!%p1035_p13), %v1340_v16 }
  0x30   : > { %s1460_s5 = scalar_lea.vmem %s1551_s3, %s1034_s12  ;;  %304 = vst [vmem:[#allocation2 + $0x20] sm:$0xff] (!%p1035_p13), %v1340_v16  ;;  %305 = vst [vmem:[#allocation2 + $0x28] sm:$0xff] (!%p1035_p13), %v1340_v16 }
  0x31   : > { %306 = vst [vmem:[#allocation2 + $0x30] sm:$0xff] (!%p1035_p13), %v1340_v16  ;;  %307 = vst [vmem:[#allocation2 + $0x38] sm:$0xff] (!%p1035_p13), %v1340_v16 }
  0x36 PF: > { %312 = sbr.rel (!%p296_p12) target bundleno = 61 (0x3d), region = 59  ;;  %v1341_v17 = vmov (%p296_p12), 0.0  }
  0x37   : > { %313 = vst [vmem:[%s1460_s5] sm:$0x3] (%p296_p12), %v1341_v17 }
  0x3d PF: > { %v1228_v18 = vld [vmem:[%s1450_s24 + $0x40] sm:$0xff]   ;;  %v1232_v22 = vld [vmem:[%s1450_s24 + $0x48] sm:$0xff]   ;;  %v1236_v26 = vld [vmem:[%s1450_s24 + $0x50] sm:$0xff]   ;;  %p1085_p0 = scmp.ne.s32.totalorder %s1322_s14, 1 }
  0x3e   : > { %v1229_v19 = vld [vmem:[%s1450_s24 + $0xc0] sm:$0xff]   ;;  %1090 = vmatprep.subr.bf16.mxu0 %v1228_v18  ;;  %v1233_v23 = vld [vmem:[%s1450_s24 + $0xc8] sm:$0xff]   ;;  %v1237_v27 = vld [vmem:[%s1450_s24 + $0xd0] sm:$0xff]   ;;  %vm874_vm0 = vcmask (!%p1085_p0), 1040384  }
  0x3f   : > { %v1230_v20 = vld [vmem:[%s1450_s24] sm:$0xff]   ;;  %1130 = vmatprep.subr.bf16.mxu1 %v1229_v19  ;;  %v1234_v24 = vld [vmem:[%s1450_s24 + $0x8] sm:$0xff]   ;;  %v1238_v28 = vld [vmem:[%s1450_s24 + $0x10] sm:$0xff]  }
  0x40   : > { %v1231_v21 = vld [vmem:[%s1450_s24 + $0x80] sm:$0xff]   ;;  %1091 = vmatpush3.bf16.msra.mxu0 %v1230_v20  ;;  %v1235_v25 = vld [vmem:[%s1450_s24 + $0x88] sm:$0xff]   ;;  %v1239_v29 = vld [vmem:[%s1450_s24 + $0x90] sm:$0xff]  }
  0x41   : > { %1131 = vmatpush3.bf16.msra.mxu1 %v1231_v21  ;;  %1092 = vmatprep.subr.bf16.mxu0 %v1232_v22  ;;  %v1240_v30 = vld [vmem:[%s1450_s24 + $0x58] sm:$0xff]   ;;  %v1244_v34 = vld [vmem:[%s1450_s24 + $0x60] sm:$0xff]   ;;  %v1248_v38 = vld [vmem:[%s1450_s24 + $0x68] sm:$0xff]  }
  0x42   : > { %1132 = vmatprep.subr.bf16.mxu1 %v1233_v23  ;;  %v1241_v31 = vld [vmem:[%s1450_s24 + $0xd8] sm:$0xff]   ;;  %v1245_v35 = vld [vmem:[%s1450_s24 + $0xe0] sm:$0xff]   ;;  %v1249_v39 = vld [vmem:[%s1450_s24 + $0xe8] sm:$0xff]  }
  0x43   : > { %v1242_v32 = vld [vmem:[%s1450_s24 + $0x18] sm:$0xff]   ;;  %v1246_v36 = vld [vmem:[%s1450_s24 + $0x20] sm:$0xff]   ;;  %v1250_v40 = vld [vmem:[%s1450_s24 + $0x28] sm:$0xff]  }
  0x44   : > { %1093 = vmatpush3.bf16.msra.mxu0 %v1234_v24  ;;  %v1243_v33 = vld [vmem:[%s1450_s24 + $0x98] sm:$0xff]   ;;  %v1247_v37 = vld [vmem:[%s1450_s24 + $0xa0] sm:$0xff]   ;;  %v1251_v41 = vld [vmem:[%s1450_s24 + $0xa8] sm:$0xff]  }
  0x45   : > { %1133 = vmatpush3.bf16.msra.mxu1 %v1235_v25  ;;  %1094 = vmatprep.subr.bf16.mxu0 %v1236_v26  ;;  %v1252_v42 = vld [vmem:[%s1450_s24 + $0x70] sm:$0xff]   ;;  %v1256_v46 = vld [vmem:[%s1450_s24 + $0x78] sm:$0xff]   ;;  %v314_v11 = vld [vmem:[#allocation2] sm:$0xff] }
  0x46   : > { %1134 = vmatprep.subr.bf16.mxu1 %v1237_v27  ;;  %v1253_v43 = vld [vmem:[%s1450_s24 + $0xf0] sm:$0xff]   ;;  %v1257_v47 = vld [vmem:[%s1450_s24 + $0xf8] sm:$0xff]   ;;  %v315_v16 = vld [vmem:[#allocation2 + $0x8] sm:$0xff] }
  0x47   : > { %v1254_v44 = vld [vmem:[%s1450_s24 + $0x30] sm:$0xff]   ;;  %v1258_v48 = vld [vmem:[%s1450_s24 + $0x38] sm:$0xff]  }
  0x48   : > { %1095 = vmatpush3.bf16.msra.mxu0 %v1238_v28  ;;  %v1255_v45 = vld [vmem:[%s1450_s24 + $0xb0] sm:$0xff]   ;;  %v1259_v49 = vld [vmem:[%s1450_s24 + $0xb8] sm:$0xff]  }
  0x49   : > { %1135 = vmatpush3.bf16.msra.mxu1 %v1239_v29  ;;  %1096 = vmatprep.subr.bf16.mxu0 %v1240_v30  ;;  %v1260_v50 = vld [vmem:[%s1462_s6] ss:$16 sps:$4 sm:$0xff]   ;;  %v1262_v51 = vld [vmem:[%s1462_s6 + $0x4] ss:$16 sps:$4 sm:$0xff]   ;;  %v1263_v52 = vld [vmem:[%s1462_s6 + $0x8] ss:$16 sps:$4 sm:$0xff]  }
  0x4a   : > { %1136 = vmatprep.subr.bf16.mxu1 %v1241_v31  ;;  %v1265_v53 = vld [vmem:[%s1462_s6 + $0xc] ss:$16 sps:$4 sm:$0xff]   ;;  %706 = vmatprep.mubr.bf16.mxu0 %v1262_v51  ;;  %v1266_v54 = vld [vmem:[%s1462_s6 + $0x24] ss:$16 sps:$4 sm:$0xff]   ;;  %v1270_v56 = vld [vmem:[%s1462_s6 + $0x20] ss:$16 sps:$4 sm:$0xff]  }
  0x4b   : > { %771 = vmatprep.mubr.bf16.mxu1 %v1265_v53  ;;  %v1268_v55 = vld [vmem:[%s1462_s6 + $0x2c] ss:$16 sps:$4 sm:$0xff]   ;;  %v1271_v57 = vld [vmem:[%s1462_s6 + $0x28] ss:$16 sps:$4 sm:$0xff]   ;;  %v1272_v58 = vld [vmem:[%s1462_s6 + $0x44] ss:$16 sps:$4 sm:$0xff]  }
  0x4c   : > { %1097 = vmatpush3.bf16.msra.mxu0 %v1242_v32  ;;  %v1274_v59 = vld [vmem:[%s1462_s6 + $0x4c] ss:$16 sps:$4 sm:$0xff]   ;;  %v1276_v60 = vld [vmem:[%s1462_s6 + $0x40] ss:$16 sps:$4 sm:$0xff]   ;;  %v1277_v61 = vld [vmem:[%s1462_s6 + $0x48] ss:$16 sps:$4 sm:$0xff]  }
  0x4d   : > { %1137 = vmatpush3.bf16.msra.mxu1 %v1243_v33  ;;  %1098 = vmatprep.subr.bf16.mxu0 %v1244_v34  ;;  %v1278_v62 = vld [vmem:[%s1462_s6 + $0x64] ss:$16 sps:$4 sm:$0xff]   ;;  %v1280_v63 = vld [vmem:[%s1462_s6 + $0x6c] ss:$16 sps:$4 sm:$0xff]   ;;  %v1282_v0 = vld [vmem:[%s1462_s6 + $0x60] ss:$16 sps:$4 sm:$0xff]  }
  0x4e   : > { %1138 = vmatprep.subr.bf16.mxu1 %v1245_v35  ;;  %v1283_v1 = vld [vmem:[%s1462_s6 + $0x68] ss:$16 sps:$4 sm:$0xff]   ;;  %v316_v29 = vld [vmem:[#allocation2 + $0x10] sm:$0xff] }
  0x4f   : > { %v317_v34 = vld [vmem:[#allocation2 + $0x18] sm:$0xff] }
  0x50   : > { %1099 = vmatpush3.bf16.msra.mxu0 %v1246_v36 }
  0x51   : > { %1139 = vmatpush3.bf16.msra.mxu1 %v1247_v37  ;;  %1100 = vmatprep.subr.bf16.mxu0 %v1248_v38 }
  0x52   : > { %1140 = vmatprep.subr.bf16.mxu1 %v1249_v39 }
  0x54   : > { %1101 = vmatpush3.bf16.msra.mxu0 %v1250_v40 }
  0x55   : > { %1141 = vmatpush3.bf16.msra.mxu1 %v1251_v41  ;;  %1102 = vmatprep.subr.bf16.mxu0 %v1252_v42 }
  0x56   : > { %1142 = vmatprep.subr.bf16.mxu1 %v1253_v43 }
  0x58   : > { %1103 = vmatpush3.bf16.msra.mxu0 %v1254_v44 }
  0x59   : > { %1143 = vmatpush3.bf16.msra.mxu1 %v1255_v45  ;;  %1104 = vmatprep.subr.bf16.mxu0 %v1256_v46 }
  0x5a   : > { %1144 = vmatprep.subr.bf16.mxu1 %v1257_v47  ;;  %v318_v47 = vld [vmem:[#allocation2 + $0x20] sm:$0xff] }
  0x5c   : > { %1105 = vmatpush3.bf16.msra.mxu0 %v1258_v48 }
  0x5d   : > { %1145 = vmatpush3.bf16.msra.mxu1 %v1259_v49 }
  0x5f   : > { %707 = vmatmul.mubr.bf16.vlgmr.msra.gmra.mrb[0].mxu0 %v1260_v50 }
  0x60   : > { %772 = vmatmul.mubr.bf16.vlgmr.msra.gmra.mrb[0].mxu1 %v1263_v52  ;;  %714 = vmatprep.mubr.bf16.mxu0 %v1266_v54  ;;  %v319_v52 = vld [vmem:[#allocation2 + $0x28] sm:$0xff] }
  0x61   : > { %779 = vmatprep.mubr.bf16.mxu1 %v1268_v55 }
  0x67   : > { %715 = vmatmul.mubr.bf16.gmra.mrb[4].mxu0 %v1270_v56 }
  0x68   : > { %780 = vmatmul.mubr.bf16.gmra.mrb[4].mxu1 %v1271_v57  ;;  %722 = vmatprep.mubr.bf16.mxu0 %v1272_v58 }
  0x69   : > { %787 = vmatprep.mubr.bf16.mxu1 %v1274_v59 }
  0x6f   : > { %723 = vmatmul.mubr.bf16.gmra.mrb[8].mxu0 %v1276_v60 }
  0x70   : > { %788 = vmatmul.mubr.bf16.gmra.mrb[8].mxu1 %v1277_v61  ;;  %730 = vmatprep.mubr.bf16.mxu0 %v1278_v62 }
  0x71   : > { %795 = vmatprep.mubr.bf16.mxu1 %v1280_v63 }
  0x77   : > { %731 = vmatmul.mubr.bf16.gmra.mrb[12].mxu0 %v1282_v0 }
  0x78   : > { %796 = vmatmul.mubr.bf16.gmra.mrb[12].mxu1 %v1283_v1  ;;  %v320_v1 = vld [vmem:[#allocation2 + $0x30] sm:$0xff] }
 0x132   : > { %v1106_v2 = vpop.f32.mrb[0].mxu0 }
 0x133   : > { %v1146_v3 = vpop.f32.mrb[0].mxu1  ;;  %v1107_v4 = vpop.f32.mrb[1].mxu0 }
 0x134   : > { %v1108_v5 = vadd.f32 %v1107_v4, %v1106_v2  ;;  %v1147_v6 = vpop.f32.mrb[1].mxu1  ;;  %v1109_v7 = vpop.f32.mrb[2].mxu0 }
 0x135   : > { %v1148_v8 = vadd.f32 %v1147_v6, %v1146_v3  ;;  %v1149_v9 = vpop.f32.mrb[2].mxu1  ;;  %v1110_v10 = vpop.f32.mrb[3].mxu0  ;;  %v321_v6 = vld [vmem:[#allocation2 + $0x38] sm:$0xff] }
 0x136   : > { %v1111_v12 = vadd.f32 %v1110_v10, %v1109_v7  ;;  %v1150_v13 = vpop.f32.mrb[3].mxu1 }
 0x137   : > { %v774_v14 = vadd.f32 %v1148_v8, %v1108_v5  ;;  %v1151_v15 = vadd.f32 %v1150_v13, %v1149_v9 }
 0x139   : > { %v804_v17 = vadd.f32 %v774_v14, %v314_v11  ;;  %v777_v18 = vadd.f32 %v1151_v15, %v1111_v12 }
 0x13a   : > { %v1112_v19 = vpop.f32.mrb[4].mxu0 }
 0x13b   : > { %812 = vst [vmem:[#allocation2] sm:$0xff] %v804_v17  ;;  %v805_v20 = vadd.f32 %v777_v18, %v315_v16  ;;  %v1152_v21 = vpop.f32.mrb[4].mxu1  ;;  %v1113_v22 = vpop.f32.mrb[5].mxu0 }
 0x13c   : > { %v1114_v23 = vadd.f32 %v1113_v22, %v1112_v19  ;;  %v1153_v24 = vpop.f32.mrb[5].mxu1  ;;  %v1115_v25 = vpop.f32.mrb[6].mxu0 }
 0x13d   : > { %813 = vst [vmem:[#allocation2 + $0x8] sm:$0xff] %v805_v20  ;;  %v1154_v26 = vadd.f32 %v1153_v24, %v1152_v21  ;;  %v1155_v27 = vpop.f32.mrb[6].mxu1  ;;  %v1116_v28 = vpop.f32.mrb[7].mxu0 }
 0x13e   : > { %v1117_v30 = vadd.f32 %v1116_v28, %v1115_v25  ;;  %v1156_v31 = vpop.f32.mrb[7].mxu1 }
 0x13f   : > { %v782_v32 = vadd.f32 %v1154_v26, %v1114_v23  ;;  %v1157_v33 = vadd.f32 %v1156_v31, %v1155_v27 }
 0x141   : > { %v806_v35 = vadd.f32 %v782_v32, %v316_v29  ;;  %v785_v36 = vadd.f32 %v1157_v33, %v1117_v30 }
 0x142   : > { %v1118_v37 = vpop.f32.mrb[8].mxu0  ;;  %v824_v10 = vld [vmem:[#allocation2] sm:$0xff] (!%p1085_p0) }
 0x143   : > { %814 = vst [vmem:[#allocation2 + $0x10] sm:$0xff] %v806_v35  ;;  %v807_v38 = vadd.f32 %v785_v36, %v317_v34  ;;  %v1158_v39 = vpop.f32.mrb[8].mxu1  ;;  %v1119_v40 = vpop.f32.mrb[9].mxu0  ;;  %832 = vst [vmem:[%s1455_s29] sm:$0xff] (!%p1085_p0), %v824_v10  ;;  %v853_v13 = vmul.f32 (!%p1085_p0), %v824_v10, %v824_v10 }
 0x144   : > { %v1120_v41 = vadd.f32 %v1119_v40, %v1118_v37  ;;  %v1159_v42 = vpop.f32.mrb[9].mxu1  ;;  %v1121_v43 = vpop.f32.mrb[10].mxu0  ;;  %v825_v11 = vld [vmem:[#allocation2 + $0x8] sm:$0xff] (!%p1085_p0) }
 0x145   : > { %815 = vst [vmem:[#allocation2 + $0x18] sm:$0xff] %v807_v38  ;;  %v1160_v44 = vadd.f32 %v1159_v42, %v1158_v39  ;;  %v1161_v45 = vpop.f32.mrb[10].mxu1  ;;  %v1122_v46 = vpop.f32.mrb[11].mxu0  ;;  %833 = vst [vmem:[%s1455_s29 + $0x8] sm:$0xff] (!%p1085_p0), %v825_v11  ;;  %v840_v14 = vadd.f32 (!%p1085_p0), %v825_v11, %v824_v10  ;;  %v854_v15 = vmul.f32 (!%p1085_p0), %v825_v11, %v825_v11 }
 0x146   : > { %v1123_v48 = vadd.f32 %v1122_v46, %v1121_v43  ;;  %v1162_v49 = vpop.f32.mrb[11].mxu1 }
 0x147   : > { %v790_v50 = vadd.f32 %v1160_v44, %v1120_v41  ;;  %v1163_v51 = vadd.f32 %v1162_v49, %v1161_v45  ;;  %v861_v22 = vadd.f32 (!%p1085_p0), %v854_v15, %v853_v13 }
 0x149   : > { %v808_v53 = vadd.f32 %v790_v50, %v318_v47  ;;  %v793_v54 = vadd.f32 %v1163_v51, %v1123_v48 }
 0x14a   : > { %v1124_v55 = vpop.f32.mrb[12].mxu0  ;;  %v826_v12 = vld [vmem:[#allocation2 + $0x10] sm:$0xff] (!%p1085_p0) }
 0x14b   : > { %816 = vst [vmem:[#allocation2 + $0x20] sm:$0xff] %v808_v53  ;;  %v809_v56 = vadd.f32 %v793_v54, %v319_v52  ;;  %v1164_v57 = vpop.f32.mrb[12].mxu1  ;;  %v1125_v58 = vpop.f32.mrb[13].mxu0  ;;  %834 = vst [vmem:[%s1455_s29 + $0x10] sm:$0xff] (!%p1085_p0), %v826_v12  ;;  %v855_v16 = vmul.f32 (!%p1085_p0), %v826_v12, %v826_v12  ;;  %v841_v23 = vadd.f32 (!%p1085_p0), %v840_v14, %v826_v12  ;;  %v876_v52 = vld [vmem:[%s1460_s5] sm:$0x3] (!%p1085_p0) }
 0x14c   : > { %v1126_v59 = vadd.f32 %v1125_v58, %v1124_v55  ;;  %v1165_v60 = vpop.f32.mrb[13].mxu1  ;;  %v1127_v61 = vpop.f32.mrb[14].mxu0  ;;  %v827_v17 = vld [vmem:[#allocation2 + $0x18] sm:$0xff] (!%p1085_p0) }
 0x14d   : > { %817 = vst [vmem:[#allocation2 + $0x28] sm:$0xff] %v809_v56  ;;  %v1166_v62 = vadd.f32 %v1165_v60, %v1164_v57  ;;  %v1167_v63 = vpop.f32.mrb[14].mxu1  ;;  %v1128_v0 = vpop.f32.mrb[15].mxu0  ;;  %835 = vst [vmem:[%s1455_s29 + $0x18] sm:$0xff] (!%p1085_p0), %v827_v17  ;;  %v856_v24 = vmul.f32 (!%p1085_p0), %v827_v17, %v827_v17  ;;  %v862_v25 = vadd.f32 (!%p1085_p0), %v861_v22, %v855_v16 }
 0x14e   : > { %v1129_v2 = vadd.f32 %v1128_v0, %v1127_v61  ;;  %v1168_v3 = vpop.f32.mrb[15].mxu1  ;;  %v842_v26 = vadd.f32 (!%p1085_p0), %v841_v23, %v827_v17 }
 0x14f   : > { %v798_v4 = vadd.f32 %v1166_v62, %v1126_v59  ;;  %v1169_v5 = vadd.f32 %v1168_v3, %v1167_v63  ;;  %823 = sbr.rel (%p1085_p0) target bundleno = 369 (0x171), region = 63  ;;  %v863_v28 = vadd.f32 (!%p1085_p0), %v862_v25, %v856_v24 }
 0x151   : > { %v810_v7 = vadd.f32 %v798_v4, %v320_v1  ;;  %v801_v8 = vadd.f32 %v1169_v5, %v1129_v2 }
 0x152   : > { %v828_v18 = vld [vmem:[#allocation2 + $0x20] sm:$0xff] (!%p1085_p0) }
 0x153   : > { %818 = vst [vmem:[#allocation2 + $0x30] sm:$0xff] %v810_v7  ;;  %v811_v9 = vadd.f32 %v801_v8, %v321_v6  ;;  %836 = vst [vmem:[%s1455_s29 + $0x20] sm:$0xff] (!%p1085_p0), %v828_v18  ;;  %v857_v27 = vmul.f32 (!%p1085_p0), %v828_v18, %v828_v18  ;;  %v843_v29 = vadd.f32 (!%p1085_p0), %v842_v26, %v828_v18 }
 0x154   : > { %v829_v19 = vld [vmem:[#allocation2 + $0x28] sm:$0xff] (!%p1085_p0) }
 0x155   : > { %819 = vst [vmem:[#allocation2 + $0x38] sm:$0xff] %v811_v9  ;;  %837 = vst [vmem:[%s1455_s29 + $0x28] sm:$0xff] (!%p1085_p0), %v829_v19  ;;  %v858_v30 = vmul.f32 (!%p1085_p0), %v829_v19, %v829_v19  ;;  %v864_v31 = vadd.f32 (!%p1085_p0), %v863_v28, %v857_v27  ;;  %v844_v32 = vadd.f32 (!%p1085_p0), %v843_v29, %v829_v19 }
 0x157   : > { %v865_v34 = vadd.f32 %v864_v31, %v858_v30 }
 0x15a   : > { %v830_v20 = vld [vmem:[#allocation2 + $0x30] sm:$0xff] }
 0x15b   : > { %838 = vst [vmem:[%s1455_s29 + $0x30] sm:$0xff] %v830_v20  ;;  %v859_v33 = vmul.f32 %v830_v20, %v830_v20  ;;  %v845_v35 = vadd.f32 %v844_v32, %v830_v20 }
 0x15c   : > { %v831_v21 = vld [vmem:[#allocation2 + $0x38] sm:$0xff] }
 0x15d   : > { %839 = vst [vmem:[%s1455_s29 + $0x38] sm:$0xff] %v831_v21  ;;  %v860_v36 = vmul.f32 %v831_v21, %v831_v21  ;;  %v866_v37 = vadd.f32 %v865_v34, %v859_v33  ;;  %v846_v38 = vadd.f32 %v845_v35, %v831_v21 }
 0x15f   : > { %v847_v39 = vrot.slane %v846_v38, 4  ;;  %v867_v40 = vadd.f32 %v866_v37, %v860_v36 }
 0x161   : > { %v848_v41 = vadd.f32 %v847_v39, %v846_v38  ;;  %v868_v42 = vrot.slane %v867_v40, 4 }
 0x163   : > { %v849_v43 = vrot.slane %v848_v41, 2  ;;  %v869_v44 = vadd.f32 %v868_v42, %v867_v40 }
 0x165   : > { %v850_v45 = vadd.f32 %v849_v43, %v848_v41  ;;  %v870_v46 = vrot.slane %v869_v44, 2 }
 0x167   : > { %v851_v47 = vrot.slane %v850_v45, 1  ;;  %v871_v48 = vadd.f32 %v870_v46, %v869_v44 }
 0x169   : > { %v852_v49 = vadd.f32 %v851_v47, %v850_v45  ;;  %v872_v50 = vrot.slane %v871_v48, 1 }
 0x16b   : > { %v873_v51 = vadd.f32 %v872_v50, %v871_v48 }
 0x16d   : > { %v875_v53 = vsel %vm874_vm0, %v852_v49, %v873_v51 }
 0x16e   : > { %v877_v54 = vadd.f32 %v876_v52, %v875_v53 }
 0x170   : > { %878 = vst [vmem:[%s1460_s5] sm:$0x3] %v877_v54 }
 0x171 PF: > { %s14_s18 = sadd.s32 1, %s1338_s18   ;;  %s1552_s12 = smov %s1318_s13 }
 0x172   : > { %p11_p1 = scmp.ge.s32.totalorder %s14_s18, 6   ;;  %s1553_s13 = smov %s1413_s25 }
 0x173   : > { %s1554_s14 = smov %s1330_s16  ;;  %s1555_s15 = smov %s1334_s17 }
 0x174   : > { %s1556_s16 = smov %s1559_s19  ;;  %s1557_s17 = smov %s1563_s20 }
 0x175   :  { %13 = sbr.rel (!%p11_p1) target bundleno = 4 (0x4), region = 113 }

// kernel: _lambda_.10
= control target key start
LH: loop header
LB: loop body
LE: loop exit
PB: predicated region body
PF: predicated region fallthrough
CT: control target
= control target key end

     0   :  { %s523_s9 = smov 0   ;;  %s525_s10 = smov 0   ;;  %s564_s0 = inlined_call_operand.vmem [shape: f32[2,64,128], index: 0, kind: input, shape index: {}]   ;;  %s565_s1 = inlined_call_operand.vmem [shape: f32[2,2,128], index: 1, kind: input, shape index: {}]   ;;  %s566_s2 = inlined_call_operand.vmem [shape: bf16[2,64,128], index: 2, kind: output, shape index: {}]  }
   0x1   :  { %s527_s11 = smov 0  }
   0x2 LB: > { %s24_s12 = sadd.s32 1, %s502_s10  ;;  %p409_p0 = scmp.ge.s32.totalorder %s506_s11, 1  ;;  %s506_s11 = sphi %s527_s11, %s12_s11   ;;  %s502_s10 = sphi %s525_s10, %s568_s10   ;;  %s498_s9 = sphi %s523_s9, %s567_s9  }
   0x3   : > { %p26_p1 = scmp.ge.s32.totalorder %s24_s12, 2  ;;  %p142_p2 = scmp.lt.s32.totalorder %s506_s11, 3 }
   0x5   : > { %s570_s12 = smov (%p26_p1, %s24_s12), 0  ;;  %p143_p3 = pnand %p409_p0, %p142_p2 }
   0x6   : > { %p177_p4 = scmp.lt.s32.totalorder (!%p143_p3), %s498_s9, 1  ;;  %v216_v4 = vlaneseq (!%p143_p3) }
   0x7   : > { %146 = sbr.rel (%p143_p3) target bundleno = 56 (0x38), region = 28 }
   0x8   : > { %v217_v7 = vshrl.u32 (!%p143_p3), %v216_v4, 7 }
   0xa   : > { %v218_v9 = vsub.s32 (!%p143_p3), 0, %v217_v7  ;;  %v232_v16 = vsub.s32 (!%p143_p3), 1, %v217_v7 }
   0xe   : > { %s572_s9 = smov (!%p177_p4, %s498_s9), 1 }
   0xf   : > { %s412_s13 = sshll.u32 %s572_s9, 1  ;;  %s425_s17 = sshll.u32 %s572_s9, 6 }
  0x10   : > { %s189_s16 = scalar_lea.vmem %s565_s1, %s412_s13  ;;  %s184_s20 = scalar_lea.vmem %s564_s0, %s425_s17 }
  0x11   : > { %v208_v0 = vld [vmem:[%s189_s16] sm:$0x3]  ;;  %v201_v11 = vld [vmem:[%s184_s20 + $0x8] sm:$0xff]  ;;  %v202_v13 = vld [vmem:[%s184_s20 + $0x10] sm:$0xff]  ;;  %s426_s21 = sshll.u32 %s572_s9, 5 }
  0x12   : > { %v209_v1 = vmul.f32 0.015625, %v208_v0  ;;  %v200_v10 = vld [vmem:[%s184_s20] sm:$0xff]  ;;  %v203_v14 = vld [vmem:[%s184_s20 + $0x18] sm:$0xff]  ;;  %v205_v17 = vld [vmem:[%s184_s20 + $0x28] sm:$0xff]  ;;  %s198_s24 = scalar_lea.vmem %s566_s2, %s426_s21 }
  0x13   : > { %v204_v15 = vld [vmem:[%s184_s20 + $0x20] sm:$0xff]  ;;  %v206_v18 = vld [vmem:[%s184_s20 + $0x30] sm:$0xff]  ;;  %v207_v19 = vld [vmem:[%s184_s20 + $0x38] sm:$0xff] }
  0x14   : > { %v210_v2 = vmul.f32 %v209_v1, %v209_v1  ;;  %v219_v12 = vrot.slane %v209_v1, %v218_v9 }
  0x16   : > { %v212_v3 = vrot.slane %v210_v2, 7  ;;  %v220_v20 = vsub.f32 %v200_v10, %v219_v12  ;;  %v221_v21 = vsub.f32 %v201_v11, %v219_v12  ;;  %v222_v22 = vsub.f32 %v202_v13, %v219_v12 }
  0x17   : > { %v223_v23 = vsub.f32 %v203_v14, %v219_v12  ;;  %v224_v25 = vsub.f32 %v204_v15, %v219_v12  ;;  %v225_v26 = vsub.f32 %v205_v17, %v219_v12  ;;  %v226_v27 = vsub.f32 %v206_v18, %v219_v12 }
  0x18   : > { %v214_v5 = vsub.f32 %v209_v1, %v212_v3  ;;  %v227_v28 = vsub.f32 %v207_v19, %v219_v12 }
  0x1a   : > { %v215_v6 = vmax.f32 %v214_v5, 0.0 }
  0x1c   : > { %v228_v8 = vadd.f32 1e-05, %v215_v6 }
  0x1e   : > { %482 = vrsqrt.f32 %v228_v8 }
  0x28   : > { %v483_v24 = vpop.eup %482 }
  0x29   : > { %v233_v29 = vrot.slane %v483_v24, %v232_v16 }
  0x2b   : > { %v234_v30 = vmul.f32 %v233_v29, %v220_v20  ;;  %v235_v31 = vmul.f32 %v233_v29, %v221_v21  ;;  %v236_v32 = vmul.f32 %v233_v29, %v222_v22  ;;  %v237_v33 = vmul.f32 %v233_v29, %v223_v23 }
  0x2c   : > { %v238_v34 = vmul.f32 %v233_v29, %v224_v25  ;;  %v239_v35 = vmul.f32 %v233_v29, %v225_v26  ;;  %v240_v36 = vmul.f32 %v233_v29, %v226_v27  ;;  %v241_v37 = vmul.f32 %v233_v29, %v227_v28 }
  0x2d   : > { %vm242_vm0 = vcmp.gt.f32.partialorder %v234_v30, 0.0  ;;  %vm243_vm1 = vcmp.gt.f32.partialorder %v235_v31, 0.0  ;;  %v250_v38 = vmul.f32 0.2, %v234_v30  ;;  %v251_v39 = vmul.f32 0.2, %v235_v31 }
  0x2e   : > { %vm244_vm2 = vcmp.gt.f32.partialorder %v236_v32, 0.0  ;;  %vm245_vm3 = vcmp.gt.f32.partialorder %v237_v33, 0.0  ;;  %v252_v40 = vmul.f32 0.2, %v236_v32  ;;  %v253_v41 = vmul.f32 0.2, %v237_v33 }
  0x2f   : > { %v258_v42 = vsel %vm242_vm0, %v234_v30, %v250_v38  ;;  %v259_v43 = vsel %vm243_vm1, %v235_v31, %v251_v39  ;;  %vm246_vm4 = vcmp.gt.f32.partialorder %v238_v34, 0.0  ;;  %vm247_vm5 = vcmp.gt.f32.partialorder %v239_v35, 0.0 }
  0x30   : > { %v438_v44 = vpack.c.bf16 %v259_v43, %v258_v42  ;;  %v260_v45 = vsel %vm244_vm2, %v236_v32, %v252_v40  ;;  %v261_v46 = vsel %vm245_vm3, %v237_v33, %v253_v41  ;;  %v254_v47 = vmul.f32 0.2, %v238_v34 }
  0x31   : > { %v443_v48 = vpack.c.bf16 %v261_v46, %v260_v45  ;;  %v255_v49 = vmul.f32 0.2, %v239_v35  ;;  %vm248_vm6 = vcmp.gt.f32.partialorder %v240_v36, 0.0  ;;  %vm249_vm7 = vcmp.gt.f32.partialorder %v241_v37, 0.0 }
  0x32   : > { %439 = vst [vmem:[%s198_s24] sm:$0xff] %v438_v44   ;;  %v262_v50 = vsel %vm246_vm4, %v238_v34, %v254_v47  ;;  %v256_v51 = vmul.f32 0.2, %v240_v36  ;;  %v257_v52 = vmul.f32 0.2, %v241_v37 }
  0x33   : > { %455 = vst [vmem:[%s198_s24 + $0x8] sm:$0xff] %v443_v48   ;;  %v263_v53 = vsel %vm247_vm5, %v239_v35, %v255_v49 }
  0x34   : > { %v448_v54 = vpack.c.bf16 %v263_v53, %v262_v50  ;;  %v264_v55 = vsel %vm248_vm6, %v240_v36, %v256_v51  ;;  %v265_v56 = vsel %vm249_vm7, %v241_v37, %v257_v52 }
  0x35   : > { %v453_v57 = vpack.c.bf16 %v265_v56, %v264_v55 }
  0x36   : > { %456 = vst [vmem:[%s198_s24 + $0x10] sm:$0xff] %v448_v54  }
  0x37   : > { %457 = vst [vmem:[%s198_s24 + $0x18] sm:$0xff] %v453_v57  }
  0x38 PF: > { %s12_s11 = sadd.s32 1, %s506_s11   ;;  %s567_s9 = smov %s502_s10 }
  0x39   : > { %p9_p5 = scmp.ge.s32.totalorder %s12_s11, 4   ;;  %s568_s10 = smov %s570_s12 }
  0x3b   :  { %11 = sbr.rel (!%p9_p5) target bundleno = 2 (0x2), region = 61 }

// kernel: _lambda_.12
= control target key start
LH: loop header
LB: loop body
LE: loop exit
PB: predicated region body
PF: predicated region fallthrough
CT: control target
= control target key end

     0   :  { %s487_s9 = smov 0   ;;  %s489_s10 = smov 0   ;;  %s528_s0 = inlined_call_operand.vmem [shape: f32[2,16,256], index: 0, kind: input, shape index: {}]   ;;  %s529_s1 = inlined_call_operand.vmem [shape: f32[2,2,256], index: 1, kind: input, shape index: {}]   ;;  %s530_s2 = inlined_call_operand.vmem [shape: bf16[2,16,256], index: 2, kind: output, shape index: {}]  }
   0x1   :  { %s491_s11 = smov 0  }
   0x2 LB: > { %s24_s12 = sadd.s32 1, %s466_s10  ;;  %p406_p0 = scmp.ge.s32.totalorder %s470_s11, 1  ;;  %s470_s11 = sphi %s491_s11, %s12_s11   ;;  %s466_s10 = sphi %s489_s10, %s532_s10   ;;  %s462_s9 = sphi %s487_s9, %s531_s9  }
   0x3   : > { %p26_p1 = scmp.ge.s32.totalorder %s24_s12, 2  ;;  %p144_p2 = scmp.lt.s32.totalorder %s470_s11, 3 }
   0x5   : > { %s534_s12 = smov (%p26_p1, %s24_s12), 0  ;;  %p145_p3 = pnand %p406_p0, %p144_p2 }
   0x6   : > { %p182_p4 = scmp.lt.s32.totalorder (!%p145_p3), %s462_s9, 1  ;;  %v221_v3 = vlaneseq (!%p145_p3) }
   0x7   : > { %148 = sbr.rel (%p145_p3) target bundleno = 54 (0x36), region = 28 }
   0x8   : > { %v222_v6 = vshrl.u32 (!%p145_p3), %v221_v3, 7 }
   0xa   : > { %v223_v8 = vsub.s32 (!%p145_p3), 0, %v222_v6  ;;  %v227_v9 = vsub.s32 (!%p145_p3), 2, %v222_v6  ;;  %v248_v17 = vsub.s32 (!%p145_p3), 1, %v222_v6  ;;  %v252_v18 = vsub.s32 (!%p145_p3), 3, %v222_v6 }
   0xe   : > { %s536_s9 = smov (!%p182_p4, %s462_s9), 1 }
   0xf   : > { %s418_s13 = sshll.u32 %s536_s9, 2  ;;  %s417_s17 = sshll.u32 %s536_s9, 5 }
  0x10   : > { %s196_s16 = scalar_lea.vmem %s529_s1, %s418_s13  ;;  %s190_s20 = scalar_lea.vmem %s528_s0, %s417_s17 }
  0x11   : > { %v212_v0 = vld [vmem:[%s196_s16] sm:$0xf]  ;;  %v209_v16 = vld [vmem:[%s190_s20 + $0x8] sm:$0xff]  ;;  %v210_v19 = vld [vmem:[%s190_s20 + $0x10] sm:$0xff]  ;;  %s419_s21 = sshll.u32 %s536_s9, 4 }
  0x12   : > { %v213_v1 = vmul.f32 0.0625, %v212_v0  ;;  %v208_v15 = vld [vmem:[%s190_s20] sm:$0xff]  ;;  %v211_v20 = vld [vmem:[%s190_s20 + $0x18] sm:$0xff]  ;;  %s206_s24 = scalar_lea.vmem %s530_s2, %s419_s21 }
  0x14   : > { %v214_v2 = vmul.f32 %v213_v1, %v213_v1  ;;  %v224_v11 = vrot.slane %v213_v1, %v223_v8  ;;  %v228_v12 = vrot.slane %v213_v1, %v227_v9 }
  0x16   : > { %v216_v4 = vrot.slane %v214_v2, 7  ;;  %v234_v13 = vrot.slane %v224_v11, %v223_v8  ;;  %v238_v14 = vrot.slane %v228_v12, %v223_v8 }
  0x18   : > { %v218_v5 = vsub.f32 %v213_v1, %v216_v4  ;;  %v239_v22 = vsub.f32 %v208_v15, %v234_v13  ;;  %v240_v23 = vsub.f32 %v209_v16, %v238_v14  ;;  %v241_v26 = vsub.f32 %v210_v19, %v234_v13 }
  0x19   : > { %v242_v27 = vsub.f32 %v211_v20, %v238_v14 }
  0x1a   : > { %v219_v7 = vmax.f32 %v218_v5, 0.0 }
  0x1c   : > { %v243_v10 = vadd.f32 1e-05, %v219_v7 }
  0x1e   : > { %446 = vrsqrt.f32 %v243_v10 }
  0x28   : > { %v447_v21 = vpop.eup %446 }
  0x29   : > { %v249_v24 = vrot.slane %v447_v21, %v248_v17  ;;  %v253_v25 = vrot.slane %v447_v21, %v252_v18 }
  0x2b   : > { %v259_v28 = vrot.slane %v249_v24, %v248_v17  ;;  %v263_v29 = vrot.slane %v253_v25, %v248_v17 }
  0x2d   : > { %v264_v30 = vmul.f32 %v259_v28, %v239_v22  ;;  %v265_v31 = vmul.f32 %v263_v29, %v240_v23  ;;  %v266_v32 = vmul.f32 %v259_v28, %v241_v26  ;;  %v267_v33 = vmul.f32 %v263_v29, %v242_v27 }
  0x2f   : > { %vm268_vm0 = vcmp.gt.f32.partialorder %v264_v30, 0.0  ;;  %vm269_vm1 = vcmp.gt.f32.partialorder %v265_v31, 0.0  ;;  %v272_v34 = vmul.f32 0.2, %v264_v30  ;;  %v273_v35 = vmul.f32 0.2, %v265_v31 }
  0x30   : > { %vm270_vm2 = vcmp.gt.f32.partialorder %v266_v32, 0.0  ;;  %vm271_vm3 = vcmp.gt.f32.partialorder %v267_v33, 0.0  ;;  %v274_v36 = vmul.f32 0.2, %v266_v32  ;;  %v275_v37 = vmul.f32 0.2, %v267_v33 }
  0x31   : > { %v276_v38 = vsel %vm268_vm0, %v264_v30, %v272_v34  ;;  %v277_v39 = vsel %vm269_vm1, %v265_v31, %v273_v35 }
  0x32   : > { %v420_v40 = vpack.c.bf16 %v277_v39, %v276_v38  ;;  %v278_v41 = vsel %vm270_vm2, %v266_v32, %v274_v36  ;;  %v279_v42 = vsel %vm271_vm3, %v267_v33, %v275_v37 }
  0x33   : > { %v421_v43 = vpack.c.bf16 %v279_v42, %v278_v41 }
  0x34   : > { %292 = vst [vmem:[%s206_s24] sm:$0xff] %v420_v40 }
  0x35   : > { %293 = vst [vmem:[%s206_s24 + $0x8] sm:$0xff] %v421_v43 }
  0x36 PF: > { %s12_s11 = sadd.s32 1, %s470_s11   ;;  %s531_s9 = smov %s466_s10 }
  0x37   : > { %p9_p5 = scmp.ge.s32.totalorder %s12_s11, 4   ;;  %s532_s10 = smov %s534_s12 }
  0x39   :  { %11 = sbr.rel (!%p9_p5) target bundleno = 2 (0x2), region = 61 }

// kernel: _lambda_.11
= control target key start
LH: loop header
LB: loop body
LE: loop exit
PB: predicated region body
PF: predicated region fallthrough
CT: control target
= control target key end

     0   :  { %s1346_s12 = smov 0   ;;  %s1348_s13 = smov 0   ;;  %s1530_s0 = inlined_call_operand.vmem [shape: bf16[2,16,2048], index: 0, kind: input, shape index: {}]   ;;  %s1531_s1 = inlined_call_operand.vmem [shape: bf16[2048,256], index: 1, kind: input, shape index: {}]   ;;  %s1532_s2 = inlined_call_operand.vmem [shape: f32[2,16,256], index: 2, kind: output, shape index: {0}]   ;;  %s1533_s3 = inlined_call_operand.vmem [shape: f32[2,2,256], index: 3, kind: output, shape index: {1}]  }
   0x1   :  { %s1350_s14 = smov 0   ;;  %s1352_s15 = smov 0  }
   0x2   :  { %s1354_s16 = smov 0   ;;  %s1356_s17 = smov 0  }
   0x3   :  { %s1358_s18 = smov 0  }
   0x4 LB: > { %s26_s19 = sadd.s32 1, %s1313_s16  ;;  %s33_s20 = sadd.s32 1, %s1317_s17  ;;  %s1321_s18 = sphi %s1358_s18, %s14_s18   ;;  %s1317_s17 = sphi %s1356_s17, %s1539_s17   ;;  %s1313_s16 = sphi %s1354_s16, %s1538_s16   ;;  %s1309_s15 = sphi %s1352_s15, %s1537_s15   ;;  %s1305_s14 = sphi %s1350_s14, %s1536_s14   ;;  %s1301_s13 = sphi %s1348_s13, %s1535_s13   ;;  %s1297_s12 = sphi %s1346_s12, %s1534_s12  }
   0x5   : > { %p27_p0 = scmp.ge.s32.totalorder %s26_s19, 4  ;;  %p51_p1 = scmp.ne.s32.totalorder %s1301_s13, %s1297_s12 }
   0x6   : > { %p52_p2 = scmp.eq.s32.totalorder %s1321_s18, 0  ;;  %s44_s24 = sadd.s32 1, %s1301_s13 }
   0x7   : > { %s1541_s19 = smov (%p27_p0, %s26_s19), 0  ;;  %s1543_s20 = smov (!%p27_p0, %s33_s20), %s1317_s17 }
   0x8   : > { %p53_p3 = por %p52_p2, %p51_p1  ;;  %p35_p4 = scmp.ge.s32.totalorder %s1543_s20, 2 }
   0x9   : > { %s40_s21 = ssub.s32 %s1313_s16, %s1541_s19  ;;  %p1011_p6 = scmp.ge.s32.totalorder %s1321_s18, 8 }
   0xa   : > { %s1545_s20 = smov (%p35_p4, %s1543_s20), 0 }
   0xb   : > { %s37_s22 = ssub.s32 %s1317_s17, %s1545_s20  ;;  %157 = sbr.rel (%p1011_p6) target bundleno = 27 (0x1b), region = 16 }
   0xc   : > { %s41_s23 = sor.u32 %s40_s21, %s37_s22 }
   0xd   : > { %p42_p5 = scmp.eq.s32.totalorder %s41_s23, 0 }
   0xf   : > { %s1397_s25 = scalar_select %p42_p5, %s1301_s13, %s44_s24  }
  0x12   : > { %160 = sbr.rel (!%p53_p3) target bundleno = 27 (0x1b), region = 20  ;;  %s162_s26 = sand.u32 (%p53_p3), 1, %s1301_s13  }
  0x13   : > { %s1013_s27 = sshll.u32 (%p53_p3), %s1313_s16, 2  ;;  %s1012_s28 = sshll.u32 (%p53_p3), %s162_s26, 5 }
  0x14   : > { %s1014_s29 = sshll.u32 (%p53_p3), %s1317_s17, 5  ;;  %s164_s8 = scalar_lea.vmem (%p53_p3), [#allocation3], %s1012_s28 }
  0x15   : > { %s170_s30 = sadd.s32 (%p53_p3), %s1014_s29, %s1013_s27 }
  0x16   : > { %s1015_s4 = sshll.u32 (%p53_p3), %s170_s30, 2 }
  0x17   : > { %s172_s7 = scalar_lea.vmem (%p53_p3), %s1530_s0, %s1015_s4 }
  0x18   : > { %v185_v0 = vld [vmem:[%s172_s7] sm:$0xff] (%p53_p3)  ;;  %v187_v1 = vld [vmem:[%s172_s7 + $0x8] sm:$0xff] (%p53_p3) }
  0x19   : > { %v189_v2 = vld [vmem:[%s172_s7 + $0x40] sm:$0xff]  ;;  %186 = vst [vmem:[%s164_s8] sm:$0xff] %v185_v0  ;;  %188 = vst [vmem:[%s164_s8 + $0x8] sm:$0xff] %v187_v1  ;;  %v191_v3 = vld [vmem:[%s172_s7 + $0x48] sm:$0xff] }
  0x1a   : > { %190 = vst [vmem:[%s164_s8 + $0x10] sm:$0xff] %v189_v2  ;;  %192 = vst [vmem:[%s164_s8 + $0x18] sm:$0xff] %v191_v3 }
  0x1b PF: > { %p1016_p7 = scmp.ge.s32.totalorder %s1321_s18, 1  ;;  %p207_p8 = scmp.lt.s32.totalorder %s1321_s18, 9 }
  0x1d   : > { %p208_p9 = pnand %p1016_p7, %p207_p8 }
  0x1e   : > { %s214_s9 = sand.u32 (!%p208_p9), 1, %s1297_s12   ;;  %s1018_s10 = sshll.u32 (!%p208_p9), %s1305_s14, 6 }
  0x1f   : > { %211 = sbr.rel (%p208_p9) target bundleno = 372 (0x174), region = 47  ;;  %s1017_s11 = sshll.u32 (!%p208_p9), %s214_s9, 5 }
  0x20   : > { %p256_p10 = scmp.lt.s32.totalorder (!%p208_p9), %s1018_s10, 255  ;;  %p263_p11 = scmp.lt.s32.totalorder (!%p208_p9), %s1309_s15, 1 }
  0x21   : > { %p278_p12 = scmp.eq.s32.totalorder (!%p208_p9), %s1305_s14, 0  ;;  %s1428_s6 = scalar_lea.vmem (!%p208_p9), [#allocation3], %s1017_s11 }
  0x22   : > { %p1025_p13 = scmp.ne.s32.totalorder (!%p208_p9), %s1305_s14, 0 }
  0x26   : > { %s1547_s10 = smov (!%p256_p10, %s1018_s10), 255  ;;  %s1549_s15 = smov (!%p263_p11, %s1309_s15), 1 }
  0x27   : > { %s1098_s21 = sshll.u32 %s1547_s10, 3  ;;  %s1099_s26 = sshll.u32 %s1549_s15, 5  ;;  %v1323_v4 = vmov (!%p1025_p13), 0.0  }
  0x28   : > { %s1416_s24 = scalar_lea.vmem %s1531_s1, %s1098_s21  ;;  %s1421_s29 = scalar_lea.vmem %s1532_s2, %s1099_s26  ;;  %282 = vst [vmem:[#allocation2] sm:$0xff] (!%p1025_p13), %v1323_v4  ;;  %283 = vst [vmem:[#allocation2 + $0x8] sm:$0xff] (!%p1025_p13), %v1323_v4 }
  0x29   : > { %s1100_s12 = sshll.u32 %s1549_s15, 2  ;;  %281 = sbr.rel (%p1025_p13) target bundleno = 48 (0x30), region = 55  ;;  %284 = vst [vmem:[#allocation2 + $0x10] sm:$0xff] (!%p1025_p13), %v1323_v4  ;;  %285 = vst [vmem:[#allocation2 + $0x18] sm:$0xff] (!%p1025_p13), %v1323_v4 }
  0x2a   : > { %s1426_s5 = scalar_lea.vmem %s1533_s3, %s1100_s12 }
  0x30 PF: > { %290 = sbr.rel (!%p278_p12) target bundleno = 55 (0x37), region = 59  ;;  %v1324_v5 = vmov (%p278_p12), 0.0  }
  0x31   : > { %291 = vst [vmem:[%s1426_s5] sm:$0xf] (%p278_p12), %v1324_v5 }
  0x37 PF: > { %v1165_v6 = vld [vmem:[%s1416_s24 + $0x4] ss:$8 sps:$4 sm:$0xff]   ;;  %v1169_v8 = vld [vmem:[%s1416_s24] ss:$8 sps:$4 sm:$0xff]   ;;  %v1171_v10 = vld [vmem:[%s1416_s24 + $0x14] ss:$8 sps:$4 sm:$0xff]  }
  0x38   : > { %v1167_v7 = vld [vmem:[%s1416_s24 + $0x104] ss:$8 sps:$4 sm:$0xff]   ;;  %704 = vmatprep.subr.bf16.mxu1 %v1165_v6  ;;  %v1170_v9 = vld [vmem:[%s1416_s24 + $0x100] ss:$8 sps:$4 sm:$0xff]   ;;  %v1173_v11 = vld [vmem:[%s1416_s24 + $0x114] ss:$8 sps:$4 sm:$0xff]  }
  0x39   : > { %747 = vmatprep.subr.bf16.mxu0 %v1167_v7  ;;  %705 = vmatpush1.bf16.msra.mxu1 %v1169_v8  ;;  %v1175_v12 = vld [vmem:[%s1416_s24 + $0x10] ss:$8 sps:$4 sm:$0xff]   ;;  %v1177_v14 = vld [vmem:[%s1416_s24 + $0x24] ss:$8 sps:$4 sm:$0xff]   ;;  %v1181_v16 = vld [vmem:[%s1416_s24 + $0x20] ss:$8 sps:$4 sm:$0xff]  }
  0x3a   : > { %748 = vmatpush1.bf16.msra.mxu0 %v1170_v9  ;;  %706 = vmatprep.subr.bf16.mxu1 %v1171_v10  ;;  %v1176_v13 = vld [vmem:[%s1416_s24 + $0x110] ss:$8 sps:$4 sm:$0xff]   ;;  %v1179_v15 = vld [vmem:[%s1416_s24 + $0x124] ss:$8 sps:$4 sm:$0xff]   ;;  %v1182_v17 = vld [vmem:[%s1416_s24 + $0x120] ss:$8 sps:$4 sm:$0xff]  }
  0x3b   : > { %749 = vmatprep.subr.bf16.mxu0 %v1173_v11  ;;  %v1183_v18 = vld [vmem:[%s1416_s24 + $0x34] ss:$8 sps:$4 sm:$0xff]   ;;  %v1187_v20 = vld [vmem:[%s1416_s24 + $0x30] ss:$8 sps:$4 sm:$0xff]   ;;  %v1189_v22 = vld [vmem:[%s1416_s24 + $0x44] ss:$8 sps:$4 sm:$0xff]  }
  0x3c   : > { %v1185_v19 = vld [vmem:[%s1416_s24 + $0x134] ss:$8 sps:$4 sm:$0xff]   ;;  %v1188_v21 = vld [vmem:[%s1416_s24 + $0x130] ss:$8 sps:$4 sm:$0xff]   ;;  %v1191_v23 = vld [vmem:[%s1416_s24 + $0x144] ss:$8 sps:$4 sm:$0xff]  }
  0x3d   : > { %707 = vmatpush1.bf16.msra.mxu1 %v1175_v12  ;;  %v1193_v24 = vld [vmem:[%s1416_s24 + $0x40] ss:$8 sps:$4 sm:$0xff]   ;;  %v1195_v26 = vld [vmem:[%s1416_s24 + $0x54] ss:$8 sps:$4 sm:$0xff]   ;;  %v1199_v28 = vld [vmem:[%s1416_s24 + $0x50] ss:$8 sps:$4 sm:$0xff]  }
  0x3e   : > { %750 = vmatpush1.bf16.msra.mxu0 %v1176_v13  ;;  %708 = vmatprep.subr.bf16.mxu1 %v1177_v14  ;;  %v1194_v25 = vld [vmem:[%s1416_s24 + $0x140] ss:$8 sps:$4 sm:$0xff]   ;;  %v1197_v27 = vld [vmem:[%s1416_s24 + $0x154] ss:$8 sps:$4 sm:$0xff]   ;;  %v1200_v29 = vld [vmem:[%s1416_s24 + $0x150] ss:$8 sps:$4 sm:$0xff]  }
  0x3f   : > { %751 = vmatprep.subr.bf16.mxu0 %v1179_v15  ;;  %v1201_v30 = vld [vmem:[%s1416_s24 + $0x64] ss:$8 sps:$4 sm:$0xff]   ;;  %v1205_v32 = vld [vmem:[%s1416_s24 + $0x60] ss:$8 sps:$4 sm:$0xff]   ;;  %v1207_v34 = vld [vmem:[%s1416_s24 + $0x74] ss:$8 sps:$4 sm:$0xff]  }
  0x40   : > { %v1203_v31 = vld [vmem:[%s1416_s24 + $0x164] ss:$8 sps:$4 sm:$0xff]   ;;  %v1206_v33 = vld [vmem:[%s1416_s24 + $0x160] ss:$8 sps:$4 sm:$0xff]   ;;  %v1209_v35 = vld [vmem:[%s1416_s24 + $0x174] ss:$8 sps:$4 sm:$0xff]  }
  0x41   : > { %709 = vmatpush1.bf16.msra.mxu1 %v1181_v16  ;;  %v1211_v36 = vld [vmem:[%s1416_s24 + $0x70] ss:$8 sps:$4 sm:$0xff]   ;;  %v1213_v38 = vld [vmem:[%s1416_s24 + $0x84] ss:$8 sps:$4 sm:$0xff]   ;;  %v1217_v40 = vld [vmem:[%s1416_s24 + $0x80] ss:$8 sps:$4 sm:$0xff]  }
  0x42   : > { %752 = vmatpush1.bf16.msra.mxu0 %v1182_v17  ;;  %710 = vmatprep.subr.bf16.mxu1 %v1183_v18  ;;  %v1212_v37 = vld [vmem:[%s1416_s24 + $0x170] ss:$8 sps:$4 sm:$0xff]   ;;  %v1215_v39 = vld [vmem:[%s1416_s24 + $0x184] ss:$8 sps:$4 sm:$0xff]   ;;  %v1218_v41 = vld [vmem:[%s1416_s24 + $0x180] ss:$8 sps:$4 sm:$0xff]  }
  0x43   : > { %753 = vmatprep.subr.bf16.mxu0 %v1185_v19  ;;  %v1219_v42 = vld [vmem:[%s1416_s24 + $0x94] ss:$8 sps:$4 sm:$0xff]   ;;  %v1223_v44 = vld [vmem:[%s1416_s24 + $0x90] ss:$8 sps:$4 sm:$0xff]   ;;  %v1225_v46 = vld [vmem:[%s1416_s24 + $0xa4] ss:$8 sps:$4 sm:$0xff]  }
  0x44   : > { %v1221_v43 = vld [vmem:[%s1416_s24 + $0x194] ss:$8 sps:$4 sm:$0xff]   ;;  %v1224_v45 = vld [vmem:[%s1416_s24 + $0x190] ss:$8 sps:$4 sm:$0xff]   ;;  %v1227_v47 = vld [vmem:[%s1416_s24 + $0x1a4] ss:$8 sps:$4 sm:$0xff]  }
  0x45   : > { %711 = vmatpush1.bf16.msra.mxu1 %v1187_v20  ;;  %v1229_v48 = vld [vmem:[%s1416_s24 + $0xa0] ss:$8 sps:$4 sm:$0xff]   ;;  %v1231_v50 = vld [vmem:[%s1416_s24 + $0xb4] ss:$8 sps:$4 sm:$0xff]   ;;  %v1235_v52 = vld [vmem:[%s1416_s24 + $0xb0] ss:$8 sps:$4 sm:$0xff]  }
  0x46   : > { %754 = vmatpush1.bf16.msra.mxu0 %v1188_v21  ;;  %712 = vmatprep.subr.bf16.mxu1 %v1189_v22  ;;  %v1230_v49 = vld [vmem:[%s1416_s24 + $0x1a0] ss:$8 sps:$4 sm:$0xff]   ;;  %v1233_v51 = vld [vmem:[%s1416_s24 + $0x1b4] ss:$8 sps:$4 sm:$0xff]   ;;  %v1236_v54 = vld [vmem:[%s1416_s24 + $0x1b0] ss:$8 sps:$4 sm:$0xff]  }
  0x47   : > { %755 = vmatprep.subr.bf16.mxu0 %v1191_v23  ;;  %v1263_v53 = vld [vmem:[%s1428_s6 + $0x4] ss:$16 sps:$4 sm:$0xff]   ;;  %v1266_v57 = vld [vmem:[%s1428_s6 + $0xc] ss:$16 sps:$4 sm:$0xff]   ;;  %v1241_v58 = vld [vmem:[%s1416_s24 + $0xc0] ss:$8 sps:$4 sm:$0xff]  }
  0x48   : > { %v1237_v55 = vld [vmem:[%s1416_s24 + $0xc4] ss:$8 sps:$4 sm:$0xff]   ;;  %736 = vmatprep.mubr.bf16.mxu1 %v1263_v53  ;;  %779 = vmatprep.mubr.bf16.mxu0 %v1266_v57  ;;  %v1242_v59 = vld [vmem:[%s1416_s24 + $0x1c0] ss:$8 sps:$4 sm:$0xff]   ;;  %v1243_v60 = vld [vmem:[%s1416_s24 + $0xd4] ss:$8 sps:$4 sm:$0xff]  }
  0x49   : > { %713 = vmatpush1.bf16.msra.mxu1 %v1193_v24  ;;  %v1239_v56 = vld [vmem:[%s1416_s24 + $0x1c4] ss:$8 sps:$4 sm:$0xff]   ;;  %v1245_v61 = vld [vmem:[%s1416_s24 + $0x1d4] ss:$8 sps:$4 sm:$0xff]   ;;  %v1247_v62 = vld [vmem:[%s1416_s24 + $0xd0] ss:$8 sps:$4 sm:$0xff]  }
  0x4a   : > { %756 = vmatpush1.bf16.msra.mxu0 %v1194_v25  ;;  %714 = vmatprep.subr.bf16.mxu1 %v1195_v26  ;;  %v1248_v63 = vld [vmem:[%s1416_s24 + $0x1d0] ss:$8 sps:$4 sm:$0xff]   ;;  %v1249_v0 = vld [vmem:[%s1416_s24 + $0xe4] ss:$8 sps:$4 sm:$0xff]   ;;  %v1253_v2 = vld [vmem:[%s1416_s24 + $0xe0] ss:$8 sps:$4 sm:$0xff]  }
  0x4b   : > { %757 = vmatprep.subr.bf16.mxu0 %v1197_v27  ;;  %v1251_v1 = vld [vmem:[%s1416_s24 + $0x1e4] ss:$8 sps:$4 sm:$0xff]   ;;  %v1254_v3 = vld [vmem:[%s1416_s24 + $0x1e0] ss:$8 sps:$4 sm:$0xff]   ;;  %v1255_v4 = vld [vmem:[%s1416_s24 + $0xf4] ss:$8 sps:$4 sm:$0xff]  }
  0x4c   : > { %v1257_v5 = vld [vmem:[%s1416_s24 + $0x1f4] ss:$8 sps:$4 sm:$0xff]   ;;  %v1259_v6 = vld [vmem:[%s1416_s24 + $0xf0] ss:$8 sps:$4 sm:$0xff]   ;;  %v292_v11 = vld [vmem:[#allocation2] sm:$0xff]  ;;  %p1095_p0 = scmp.ne.s32.totalorder %s1305_s14, 3 }
  0x4d   : > { %715 = vmatpush1.bf16.msra.mxu1 %v1199_v28  ;;  %v1260_v7 = vld [vmem:[%s1416_s24 + $0x1f0] ss:$8 sps:$4 sm:$0xff]   ;;  %v293_v15 = vld [vmem:[#allocation2 + $0x8] sm:$0xff]  ;;  %vm842_vm0 = vcmask (!%p1095_p0), 1040384  }
  0x4e   : > { %758 = vmatpush1.bf16.msra.mxu0 %v1200_v29  ;;  %716 = vmatprep.subr.bf16.mxu1 %v1201_v30  ;;  %v1261_v8 = vld [vmem:[%s1428_s6] ss:$16 sps:$4 sm:$0xff]   ;;  %v1264_v9 = vld [vmem:[%s1428_s6 + $0x8] ss:$16 sps:$4 sm:$0xff]  }
  0x4f   : > { %759 = vmatprep.subr.bf16.mxu0 %v1203_v31  ;;  %v294_v19 = vld [vmem:[#allocation2 + $0x10] sm:$0xff]  ;;  %v295_v24 = vld [vmem:[#allocation2 + $0x18] sm:$0xff] }
  0x51   : > { %717 = vmatpush1.bf16.msra.mxu1 %v1205_v32 }
  0x52   : > { %760 = vmatpush1.bf16.msra.mxu0 %v1206_v33  ;;  %718 = vmatprep.subr.bf16.mxu1 %v1207_v34 }
  0x53   : > { %761 = vmatprep.subr.bf16.mxu0 %v1209_v35 }
  0x55   : > { %719 = vmatpush1.bf16.msra.mxu1 %v1211_v36 }
  0x56   : > { %762 = vmatpush1.bf16.msra.mxu0 %v1212_v37  ;;  %720 = vmatprep.subr.bf16.mxu1 %v1213_v38 }
  0x57   : > { %763 = vmatprep.subr.bf16.mxu0 %v1215_v39 }
  0x59   : > { %721 = vmatpush1.bf16.msra.mxu1 %v1217_v40 }
  0x5a   : > { %764 = vmatpush1.bf16.msra.mxu0 %v1218_v41  ;;  %722 = vmatprep.subr.bf16.mxu1 %v1219_v42 }
  0x5b   : > { %765 = vmatprep.subr.bf16.mxu0 %v1221_v43 }
  0x5d   : > { %723 = vmatpush1.bf16.msra.mxu1 %v1223_v44 }
  0x5e   : > { %766 = vmatpush1.bf16.msra.mxu0 %v1224_v45  ;;  %724 = vmatprep.subr.bf16.mxu1 %v1225_v46 }
  0x5f   : > { %767 = vmatprep.subr.bf16.mxu0 %v1227_v47 }
  0x61   : > { %725 = vmatpush1.bf16.msra.mxu1 %v1229_v48 }
  0x62   : > { %768 = vmatpush1.bf16.msra.mxu0 %v1230_v49  ;;  %726 = vmatprep.subr.bf16.mxu1 %v1231_v50 }
  0x63   : > { %769 = vmatprep.subr.bf16.mxu0 %v1233_v51 }
  0x65   : > { %727 = vmatpush1.bf16.msra.mxu1 %v1235_v52 }
  0x66   : > { %770 = vmatpush1.bf16.msra.mxu0 %v1236_v54  ;;  %728 = vmatprep.subr.bf16.mxu1 %v1237_v55  ;;  %v1325_v54 = vmov (!%p1095_p0), 1983009808  }
  0x67   : > { %771 = vmatprep.subr.bf16.mxu0 %v1239_v56  ;;  %v850_v55 = vunpack.c.l.s4 (!%p1095_p0), %v1325_v54  ;;  %v852_v56 = vlaneseq (!%p1095_p0) }
  0x69   : > { %729 = vmatpush1.bf16.msra.mxu1 %v1241_v58 }
  0x6a   : > { %772 = vmatpush1.bf16.msra.mxu0 %v1242_v59  ;;  %730 = vmatprep.subr.bf16.mxu1 %v1243_v60 }
  0x6b   : > { %773 = vmatprep.subr.bf16.mxu0 %v1245_v61 }
  0x6d   : > { %731 = vmatpush1.bf16.msra.mxu1 %v1247_v62 }
  0x6e   : > { %774 = vmatpush1.bf16.msra.mxu0 %v1248_v63  ;;  %732 = vmatprep.subr.bf16.mxu1 %v1249_v0 }
  0x6f   : > { %775 = vmatprep.subr.bf16.mxu0 %v1251_v1  ;;  %v851_v1 = vunpack.c.0.s8 (!%p1095_p0), %v850_v55 }
  0x71   : > { %733 = vmatpush1.bf16.msra.mxu1 %v1253_v2  ;;  %v853_v2 = vshrl.u32 (!%p1095_p0), %v852_v56, 7 }
  0x72   : > { %776 = vmatpush1.bf16.msra.mxu0 %v1254_v3  ;;  %734 = vmatprep.subr.bf16.mxu1 %v1255_v4 }
  0x73   : > { %777 = vmatprep.subr.bf16.mxu0 %v1257_v5 }
  0x75   : > { %735 = vmatpush1.bf16.msra.mxu1 %v1259_v6 }
  0x76   : > { %778 = vmatpush1.bf16.msra.mxu0 %v1260_v7 }
  0x78   : > { %737 = vmatmul.mubr.bf16.vlgmr.msra.gmra.mrb[0].mxu1 %v1261_v8  ;;  %v854_v8 = vsub.s32 (!%p1095_p0), %v851_v1, %v853_v2 }
  0x79   : > { %780 = vmatmul.mubr.bf16.vlgmr.msra.gmra.mrb[0].mxu0 %v1264_v9 }
 0x14b   : > { %v738_v10 = vpop.f32.mrb[0].mxu1 }
 0x14c   : > { %v781_v12 = vpop.f32.mrb[0].mxu0  ;;  %v740_v14 = vpop.f32.mrb[1].mxu1 }
 0x14d   : > { %v782_v13 = vadd.f32 %v781_v12, %v738_v10  ;;  %v783_v16 = vpop.f32.mrb[1].mxu0  ;;  %v742_v18 = vpop.f32.mrb[2].mxu1 }
 0x14e   : > { %v784_v17 = vadd.f32 %v783_v16, %v740_v14  ;;  %v785_v20 = vpop.f32.mrb[2].mxu0  ;;  %v744_v23 = vpop.f32.mrb[3].mxu1  ;;  %801 = sbr.rel (%p1095_p0) target bundleno = 372 (0x174), region = 63 }
 0x14f   : > { %v790_v21 = vadd.f32 %v782_v13, %v292_v11  ;;  %v786_v22 = vadd.f32 %v785_v20, %v742_v18  ;;  %v787_v25 = vpop.f32.mrb[3].mxu0  ;;  %v845_v11 = vld [vmem:[%s1426_s5] sm:$0xf] (!%p1095_p0) }
 0x150   : > { %v791_v26 = vadd.f32 %v784_v17, %v293_v15  ;;  %v788_v27 = vadd.f32 %v787_v25, %v744_v23 }
 0x151   : > { %794 = vst [vmem:[#allocation2] sm:$0xff] %v790_v21  ;;  %v792_v28 = vadd.f32 %v786_v22, %v294_v19 }
 0x152   : > { %795 = vst [vmem:[#allocation2 + $0x8] sm:$0xff] %v791_v26  ;;  %v793_v29 = vadd.f32 %v788_v27, %v295_v24 }
 0x153   : > { %796 = vst [vmem:[#allocation2 + $0x10] sm:$0xff] %v792_v28 }
 0x154   : > { %797 = vst [vmem:[#allocation2 + $0x18] sm:$0xff] %v793_v29 }
 0x158   : > { %v802_v30 = vld [vmem:[#allocation2] sm:$0xff] }
 0x159   : > { %v803_v31 = vld [vmem:[#allocation2 + $0x8] sm:$0xff]  ;;  %806 = vst [vmem:[%s1421_s29] sm:$0xff] %v802_v30  ;;  %v824_v33 = vmul.f32 %v802_v30, %v802_v30 }
 0x15a   : > { %v804_v32 = vld [vmem:[#allocation2 + $0x10] sm:$0xff]  ;;  %807 = vst [vmem:[%s1421_s29 + $0x8] sm:$0xff] %v803_v31  ;;  %v825_v34 = vmul.f32 %v803_v31, %v803_v31 }
 0x15b   : > { %808 = vst [vmem:[%s1421_s29 + $0x10] sm:$0xff] %v804_v32  ;;  %v810_v35 = vadd.f32 %v804_v32, %v802_v30  ;;  %v826_v36 = vmul.f32 %v804_v32, %v804_v32  ;;  %v805_v37 = vld [vmem:[#allocation2 + $0x18] sm:$0xff] }
 0x15c   : > { %809 = vst [vmem:[%s1421_s29 + $0x18] sm:$0xff] %v805_v37  ;;  %v817_v38 = vadd.f32 %v805_v37, %v803_v31  ;;  %v827_v39 = vmul.f32 %v805_v37, %v805_v37 }
 0x15d   : > { %v811_v40 = vrot.slane %v810_v35, 4  ;;  %v828_v41 = vadd.f32 %v826_v36, %v824_v33 }
 0x15e   : > { %v818_v42 = vrot.slane %v817_v38, 4  ;;  %v835_v43 = vadd.f32 %v827_v39, %v825_v34 }
 0x15f   : > { %v812_v44 = vadd.f32 %v811_v40, %v810_v35  ;;  %v829_v45 = vrot.slane %v828_v41, 4 }
 0x160   : > { %v819_v46 = vadd.f32 %v818_v42, %v817_v38  ;;  %v836_v47 = vrot.slane %v835_v43, 4 }
 0x161   : > { %v813_v48 = vrot.slane %v812_v44, 2  ;;  %v830_v49 = vadd.f32 %v829_v45, %v828_v41 }
 0x162   : > { %v820_v50 = vrot.slane %v819_v46, 2  ;;  %v837_v51 = vadd.f32 %v836_v47, %v835_v43 }
 0x163   : > { %v814_v52 = vadd.f32 %v813_v48, %v812_v44  ;;  %v831_v53 = vrot.slane %v830_v49, 2 }
 0x164   : > { %v821_v57 = vadd.f32 %v820_v50, %v819_v46  ;;  %v838_v58 = vrot.slane %v837_v51, 2 }
 0x165   : > { %v815_v59 = vrot.slane %v814_v52, 1  ;;  %v832_v60 = vadd.f32 %v831_v53, %v830_v49 }
 0x166   : > { %v822_v61 = vrot.slane %v821_v57, 1  ;;  %v839_v62 = vadd.f32 %v838_v58, %v837_v51 }
 0x167   : > { %v816_v63 = vadd.f32 %v815_v59, %v814_v52  ;;  %v833_v0 = vrot.slane %v832_v60, 1 }
 0x168   : > { %v823_v3 = vadd.f32 %v822_v61, %v821_v57  ;;  %v840_v4 = vrot.slane %v839_v62, 1 }
 0x169   : > { %v834_v5 = vadd.f32 %v833_v0, %v832_v60 }
 0x16a   : > { %v841_v6 = vadd.f32 %v840_v4, %v839_v62 }
 0x16b   : > { %v843_v7 = vsel %vm842_vm0, %v816_v63, %v834_v5 }
 0x16c   : > { %v844_v9 = vsel %vm842_vm0, %v823_v3, %v841_v6 }
 0x16d   : > { %v848_v10 = vcombine.low %v843_v7, %v844_v9 }
 0x16f   : > { %v855_v12 = vrot.slane %v848_v10, %v854_v8 }
 0x171   : > { %v857_v13 = vadd.f32 %v855_v12, %v845_v11 }
 0x173   : > { %858 = vst [vmem:[%s1426_s5] sm:$0xf] %v857_v13 }
 0x174 PF: > { %s14_s18 = sadd.s32 1, %s1321_s18   ;;  %s1534_s12 = smov %s1301_s13 }
 0x175   : > { %p11_p1 = scmp.ge.s32.totalorder %s14_s18, 10   ;;  %s1535_s13 = smov %s1397_s25 }
 0x176   : > { %s1536_s14 = smov %s1313_s16  ;;  %s1537_s15 = smov %s1317_s17 }
 0x177   : > { %s1538_s16 = smov %s1541_s19  ;;  %s1539_s17 = smov %s1545_s20 }
 0x178   :  { %13 = sbr.rel (!%p11_p1) target bundleno = 4 (0x4), region = 113 }

// kernel: _lambda_.14
= control target key start
LH: loop header
LB: loop body
LE: loop exit
PB: predicated region body
PF: predicated region fallthrough
CT: control target
= control target key end

     0   :  { %s565_s9 = smov 0   ;;  %s567_s10 = smov 0   ;;  %s606_s0 = inlined_call_operand.vmem [shape: f32[2,16,512], index: 0, kind: input, shape index: {}]   ;;  %s607_s1 = inlined_call_operand.vmem [shape: f32[2,2,512], index: 1, kind: input, shape index: {}]   ;;  %s608_s2 = inlined_call_operand.vmem [shape: bf16[2,16,512], index: 2, kind: output, shape index: {}]  }
   0x1   :  { %s569_s11 = smov 0  }
   0x2 LB: > { %s24_s12 = sadd.s32 1, %s544_s10  ;;  %p480_p0 = scmp.ge.s32.totalorder %s548_s11, 1  ;;  %s548_s11 = sphi %s569_s11, %s12_s11   ;;  %s544_s10 = sphi %s567_s10, %s610_s10   ;;  %s540_s9 = sphi %s565_s9, %s609_s9  }
   0x3   : > { %p26_p1 = scmp.ge.s32.totalorder %s24_s12, 2  ;;  %p144_p2 = scmp.lt.s32.totalorder %s548_s11, 3 }
   0x5   : > { %s612_s12 = smov (%p26_p1, %s24_s12), 0  ;;  %p145_p3 = pnand %p480_p0, %p144_p2 }
   0x6   : > { %p182_p4 = scmp.lt.s32.totalorder (!%p145_p3), %s540_s9, 1  ;;  %v225_v2 = vlaneseq (!%p145_p3) }
   0x7   : > { %148 = sbr.rel (%p145_p3) target bundleno = 58 (0x3a), region = 28 }
   0x8   : > { %v226_v5 = vshrl.u32 (!%p145_p3), %v225_v2, 7 }
   0xa   : > { %v227_v8 = vsub.s32 (!%p145_p3), 0, %v226_v5  ;;  %v231_v9 = vsub.s32 (!%p145_p3), 2, %v226_v5  ;;  %v235_v11 = vsub.s32 (!%p145_p3), 4, %v226_v5  ;;  %v239_v12 = vsub.s32 (!%p145_p3), 6, %v226_v5 }
   0xb   : > { %v274_v17 = vsub.s32 (!%p145_p3), 1, %v226_v5  ;;  %v278_v24 = vsub.s32 (!%p145_p3), 3, %v226_v5  ;;  %v282_v27 = vsub.s32 (!%p145_p3), 5, %v226_v5  ;;  %v286_v28 = vsub.s32 (!%p145_p3), 7, %v226_v5 }
   0xe   : > { %s614_s9 = smov (!%p182_p4, %s540_s9), 1 }
   0xf   : > { %s494_s13 = sshll.u32 %s614_s9, 3  ;;  %s493_s17 = sshll.u32 %s614_s9, 6 }
  0x10   : > { %s196_s16 = scalar_lea.vmem %s607_s1, %s494_s13  ;;  %s190_s20 = scalar_lea.vmem %s606_s0, %s493_s17 }
  0x11   : > { %v216_v0 = vld [vmem:[%s196_s16] sm:$0xff]  ;;  %v209_v23 = vld [vmem:[%s190_s20 + $0x8] sm:$0xff]  ;;  %v210_v25 = vld [vmem:[%s190_s20 + $0x10] sm:$0xff]  ;;  %s495_s21 = sshll.u32 %s614_s9, 5 }
  0x12   : > { %v217_v1 = vmul.f32 0.11111111, %v216_v0  ;;  %v208_v18 = vld [vmem:[%s190_s20] sm:$0xff]  ;;  %v211_v26 = vld [vmem:[%s190_s20 + $0x18] sm:$0xff]  ;;  %v213_v30 = vld [vmem:[%s190_s20 + $0x28] sm:$0xff]  ;;  %s206_s24 = scalar_lea.vmem %s608_s2, %s495_s21 }
  0x13   : > { %v212_v29 = vld [vmem:[%s190_s20 + $0x20] sm:$0xff]  ;;  %v214_v31 = vld [vmem:[%s190_s20 + $0x30] sm:$0xff]  ;;  %v215_v32 = vld [vmem:[%s190_s20 + $0x38] sm:$0xff] }
  0x14   : > { %v218_v3 = vmul.f32 %v217_v1, %v217_v1  ;;  %v228_v13 = vrot.slane %v217_v1, %v227_v8  ;;  %v232_v14 = vrot.slane %v217_v1, %v231_v9  ;;  %v236_v15 = vrot.slane %v217_v1, %v235_v11 }
  0x15   : > { %v240_v16 = vrot.slane %v217_v1, %v239_v12 }
  0x16   : > { %v220_v4 = vrot.slane %v218_v3, 7  ;;  %v248_v19 = vrot.slane %v228_v13, %v227_v8  ;;  %v252_v20 = vrot.slane %v232_v14, %v227_v8  ;;  %v256_v21 = vrot.slane %v236_v15, %v227_v8 }
  0x17   : > { %v260_v22 = vrot.slane %v240_v16, %v227_v8 }
  0x18   : > { %v222_v6 = vsub.f32 %v217_v1, %v220_v4  ;;  %v261_v34 = vsub.f32 %v208_v18, %v248_v19  ;;  %v262_v35 = vsub.f32 %v209_v23, %v252_v20  ;;  %v263_v36 = vsub.f32 %v210_v25, %v256_v21 }
  0x19   : > { %v264_v37 = vsub.f32 %v211_v26, %v260_v22  ;;  %v265_v42 = vsub.f32 %v212_v29, %v248_v19  ;;  %v266_v43 = vsub.f32 %v213_v30, %v252_v20  ;;  %v267_v44 = vsub.f32 %v214_v31, %v256_v21 }
  0x1a   : > { %v223_v7 = vmax.f32 %v222_v6, 0.0  ;;  %v268_v45 = vsub.f32 %v215_v32, %v260_v22 }
  0x1c   : > { %v269_v10 = vadd.f32 1e-05, %v223_v7 }
  0x1e   : > { %524 = vrsqrt.f32 %v269_v10 }
  0x28   : > { %v525_v33 = vpop.eup %524 }
  0x29   : > { %v275_v38 = vrot.slane %v525_v33, %v274_v17  ;;  %v279_v39 = vrot.slane %v525_v33, %v278_v24  ;;  %v283_v40 = vrot.slane %v525_v33, %v282_v27  ;;  %v287_v41 = vrot.slane %v525_v33, %v286_v28 }
  0x2b   : > { %v295_v46 = vrot.slane %v275_v38, %v274_v17  ;;  %v299_v47 = vrot.slane %v279_v39, %v274_v17  ;;  %v303_v48 = vrot.slane %v283_v40, %v274_v17  ;;  %v307_v49 = vrot.slane %v287_v41, %v274_v17 }
  0x2d   : > { %v308_v50 = vmul.f32 %v295_v46, %v261_v34  ;;  %v309_v51 = vmul.f32 %v299_v47, %v262_v35  ;;  %v310_v52 = vmul.f32 %v303_v48, %v263_v36  ;;  %v311_v53 = vmul.f32 %v307_v49, %v264_v37 }
  0x2e   : > { %v312_v54 = vmul.f32 %v295_v46, %v265_v42  ;;  %v313_v55 = vmul.f32 %v299_v47, %v266_v43  ;;  %v314_v56 = vmul.f32 %v303_v48, %v267_v44  ;;  %v315_v57 = vmul.f32 %v307_v49, %v268_v45 }
  0x2f   : > { %vm316_vm0 = vcmp.gt.f32.partialorder %v308_v50, 0.0  ;;  %vm317_vm1 = vcmp.gt.f32.partialorder %v309_v51, 0.0  ;;  %v324_v58 = vmul.f32 0.2, %v308_v50  ;;  %v325_v59 = vmul.f32 0.2, %v309_v51 }
  0x30   : > { %vm318_vm2 = vcmp.gt.f32.partialorder %v310_v52, 0.0  ;;  %vm319_vm3 = vcmp.gt.f32.partialorder %v311_v53, 0.0  ;;  %v326_v60 = vmul.f32 0.2, %v310_v52  ;;  %v327_v61 = vmul.f32 0.2, %v311_v53 }
  0x31   : > { %v332_v62 = vsel %vm316_vm0, %v308_v50, %v324_v58  ;;  %v333_v63 = vsel %vm317_vm1, %v309_v51, %v325_v59  ;;  %vm320_vm4 = vcmp.gt.f32.partialorder %v312_v54, 0.0  ;;  %vm321_vm5 = vcmp.gt.f32.partialorder %v313_v55, 0.0 }
  0x32   : > { %v496_v0 = vpack.c.bf16 %v333_v63, %v332_v62  ;;  %v334_v1 = vsel %vm318_vm2, %v310_v52, %v326_v60  ;;  %v335_v2 = vsel %vm319_vm3, %v311_v53, %v327_v61  ;;  %v328_v3 = vmul.f32 0.2, %v312_v54 }
  0x33   : > { %v497_v4 = vpack.c.bf16 %v335_v2, %v334_v1  ;;  %v329_v5 = vmul.f32 0.2, %v313_v55  ;;  %vm322_vm6 = vcmp.gt.f32.partialorder %v314_v56, 0.0  ;;  %vm323_vm7 = vcmp.gt.f32.partialorder %v315_v57, 0.0 }
  0x34   : > { %364 = vst [vmem:[%s206_s24] sm:$0xff] %v496_v0  ;;  %v336_v6 = vsel %vm320_vm4, %v312_v54, %v328_v3  ;;  %v330_v7 = vmul.f32 0.2, %v314_v56  ;;  %v331_v8 = vmul.f32 0.2, %v315_v57 }
  0x35   : > { %365 = vst [vmem:[%s206_s24 + $0x8] sm:$0xff] %v497_v4  ;;  %v337_v9 = vsel %vm321_vm5, %v313_v55, %v329_v5 }
  0x36   : > { %v498_v10 = vpack.c.bf16 %v337_v9, %v336_v6  ;;  %v338_v11 = vsel %vm322_vm6, %v314_v56, %v330_v7  ;;  %v339_v12 = vsel %vm323_vm7, %v315_v57, %v331_v8 }
  0x37   : > { %v499_v13 = vpack.c.bf16 %v339_v12, %v338_v11 }
  0x38   : > { %366 = vst [vmem:[%s206_s24 + $0x10] sm:$0xff] %v498_v10 }
  0x39   : > { %367 = vst [vmem:[%s206_s24 + $0x18] sm:$0xff] %v499_v13 }
  0x3a PF: > { %s12_s11 = sadd.s32 1, %s548_s11   ;;  %s609_s9 = smov %s544_s10 }
  0x3b   : > { %p9_p5 = scmp.ge.s32.totalorder %s12_s11, 4   ;;  %s610_s10 = smov %s612_s12 }
  0x3d   :  { %11 = sbr.rel (!%p9_p5) target bundleno = 2 (0x2), region = 61 }

// kernel: _lambda_.13
= control target key start
LH: loop header
LB: loop body
LE: loop exit
PB: predicated region body
PF: predicated region fallthrough
CT: control target
= control target key end

     0   :  { %s2049_s12 = smov 0   ;;  %s2051_s13 = smov 0   ;;  %s2309_s0 = inlined_call_operand.vmem [shape: bf16[2,16,4096], index: 0, kind: input, shape index: {}]   ;;  %s2310_s1 = inlined_call_operand.vmem [shape: bf16[4096,512], index: 1, kind: input, shape index: {}]   ;;  %s2311_s2 = inlined_call_operand.vmem [shape: f32[2,16,512], index: 2, kind: output, shape index: {0}]   ;;  %s2312_s3 = inlined_call_operand.vmem [shape: f32[2,2,512], index: 3, kind: output, shape index: {1}]  }
   0x1   :  { %s2053_s14 = smov 0   ;;  %s2055_s15 = smov 0  }
   0x2   :  { %s2057_s16 = smov 0   ;;  %s2059_s17 = smov 0  }
   0x3   :  { %s2061_s18 = smov 0  }
   0x4 LB: > { %s26_s19 = sadd.s32 1, %s2016_s16  ;;  %s33_s20 = sadd.s32 1, %s2020_s17  ;;  %s2024_s18 = sphi %s2061_s18, %s14_s18   ;;  %s2020_s17 = sphi %s2059_s17, %s2318_s17   ;;  %s2016_s16 = sphi %s2057_s16, %s2317_s16   ;;  %s2012_s15 = sphi %s2055_s15, %s2316_s15   ;;  %s2008_s14 = sphi %s2053_s14, %s2315_s14   ;;  %s2004_s13 = sphi %s2051_s13, %s2314_s13   ;;  %s2000_s12 = sphi %s2049_s12, %s2313_s12  }
   0x5   : > { %p27_p0 = scmp.ge.s32.totalorder %s26_s19, 8  ;;  %p51_p1 = scmp.ne.s32.totalorder %s2004_s13, %s2000_s12 }
   0x6   : > { %p52_p2 = scmp.eq.s32.totalorder %s2024_s18, 0  ;;  %s44_s24 = sadd.s32 1, %s2004_s13 }
   0x7   : > { %s2320_s19 = smov (%p27_p0, %s26_s19), 0  ;;  %s2322_s20 = smov (!%p27_p0, %s33_s20), %s2020_s17 }
   0x8   : > { %p53_p3 = por %p52_p2, %p51_p1  ;;  %p35_p4 = scmp.ge.s32.totalorder %s2322_s20, 2 }
   0x9   : > { %s40_s21 = ssub.s32 %s2016_s16, %s2320_s19  ;;  %p1550_p6 = scmp.ge.s32.totalorder %s2024_s18, 16 }
   0xa   : > { %s2324_s20 = smov (%p35_p4, %s2322_s20), 0 }
   0xb   : > { %s37_s22 = ssub.s32 %s2020_s17, %s2324_s20  ;;  %157 = sbr.rel (%p1550_p6) target bundleno = 27 (0x1b), region = 16 }
   0xc   : > { %s41_s23 = sor.u32 %s40_s21, %s37_s22 }
   0xd   : > { %p42_p5 = scmp.eq.s32.totalorder %s41_s23, 0 }
   0xf   : > { %s2100_s25 = scalar_select %p42_p5, %s2004_s13, %s44_s24  }
  0x12   : > { %160 = sbr.rel (!%p53_p3) target bundleno = 27 (0x1b), region = 20  ;;  %s162_s26 = sand.u32 (%p53_p3), 1, %s2004_s13  }
  0x13   : > { %s1552_s27 = sshll.u32 (%p53_p3), %s2016_s16, 2  ;;  %s1551_s28 = sshll.u32 (%p53_p3), %s162_s26, 5 }
  0x14   : > { %s1553_s29 = sshll.u32 (%p53_p3), %s2020_s17, 6  ;;  %s164_s8 = scalar_lea.vmem (%p53_p3), [#allocation3], %s1551_s28 }
  0x15   : > { %s170_s30 = sadd.s32 (%p53_p3), %s1553_s29, %s1552_s27 }
  0x16   : > { %s1554_s4 = sshll.u32 (%p53_p3), %s170_s30, 2 }
  0x17   : > { %s172_s7 = scalar_lea.vmem (%p53_p3), %s2309_s0, %s1554_s4 }
  0x18   : > { %v185_v0 = vld [vmem:[%s172_s7] sm:$0xff] (%p53_p3)  ;;  %v187_v1 = vld [vmem:[%s172_s7 + $0x8] sm:$0xff] (%p53_p3) }
  0x19   : > { %v189_v2 = vld [vmem:[%s172_s7 + $0x80] sm:$0xff]  ;;  %186 = vst [vmem:[%s164_s8] sm:$0xff] %v185_v0  ;;  %188 = vst [vmem:[%s164_s8 + $0x8] sm:$0xff] %v187_v1  ;;  %v191_v3 = vld [vmem:[%s172_s7 + $0x88] sm:$0xff] }
  0x1a   : > { %190 = vst [vmem:[%s164_s8 + $0x10] sm:$0xff] %v189_v2  ;;  %192 = vst [vmem:[%s164_s8 + $0x18] sm:$0xff] %v191_v3 }
  0x1b PF: > { %p1555_p7 = scmp.ge.s32.totalorder %s2024_s18, 1  ;;  %p207_p8 = scmp.lt.s32.totalorder %s2024_s18, 17 }
  0x1d   : > { %p208_p9 = pnand %p1555_p7, %p207_p8 }
  0x1e   : > { %s214_s9 = sand.u32 (!%p208_p9), 1, %s2000_s12   ;;  %s1557_s10 = sshll.u32 (!%p208_p9), %s2008_s14, 6 }
  0x1f   : > { %211 = sbr.rel (%p208_p9) target bundleno = 436 (0x1b4), region = 47  ;;  %s1556_s11 = sshll.u32 (!%p208_p9), %s214_s9, 5 }
  0x20   : > { %p256_p10 = scmp.lt.s32.totalorder (!%p208_p9), %s1557_s10, 511  ;;  %p263_p11 = scmp.lt.s32.totalorder (!%p208_p9), %s2012_s15, 1 }
  0x21   : > { %p278_p12 = scmp.eq.s32.totalorder (!%p208_p9), %s2008_s14, 0  ;;  %s2131_s6 = scalar_lea.vmem (!%p208_p9), [#allocation3], %s1556_s11 }
  0x22   : > { %p1564_p13 = scmp.ne.s32.totalorder (!%p208_p9), %s2008_s14, 0 }
  0x26   : > { %s2326_s10 = smov (!%p256_p10, %s1557_s10), 511  ;;  %s2328_s15 = smov (!%p263_p11, %s2012_s15), 1 }
  0x27   : > { %s1701_s21 = sshll.u32 %s2326_s10, 4  ;;  %s1702_s26 = sshll.u32 %s2328_s15, 6  ;;  %v2026_v4 = vmov (!%p1564_p13), 0.0  }
  0x28   : > { %s2119_s24 = scalar_lea.vmem %s2310_s1, %s1701_s21  ;;  %s2124_s29 = scalar_lea.vmem %s2311_s2, %s1702_s26  ;;  %282 = vst [vmem:[#allocation2] sm:$0xff] (!%p1564_p13), %v2026_v4  ;;  %283 = vst [vmem:[#allocation2 + $0x8] sm:$0xff] (!%p1564_p13), %v2026_v4 }
  0x29   : > { %s1703_s12 = sshll.u32 %s2328_s15, 3  ;;  %281 = sbr.rel (%p1564_p13) target bundleno = 48 (0x30), region = 55  ;;  %284 = vst [vmem:[#allocation2 + $0x10] sm:$0xff] (!%p1564_p13), %v2026_v4  ;;  %285 = vst [vmem:[#allocation2 + $0x18] sm:$0xff] (!%p1564_p13), %v2026_v4 }
  0x2a   : > { %s2129_s5 = scalar_lea.vmem %s2312_s3, %s1703_s12  ;;  %286 = vst [vmem:[#allocation2 + $0x20] sm:$0xff] (!%p1564_p13), %v2026_v4  ;;  %287 = vst [vmem:[#allocation2 + $0x28] sm:$0xff] (!%p1564_p13), %v2026_v4 }
  0x2b   : > { %288 = vst [vmem:[#allocation2 + $0x30] sm:$0xff] (!%p1564_p13), %v2026_v4  ;;  %289 = vst [vmem:[#allocation2 + $0x38] sm:$0xff] (!%p1564_p13), %v2026_v4 }
  0x30 PF: > { %294 = sbr.rel (!%p278_p12) target bundleno = 55 (0x37), region = 59  ;;  %v2027_v5 = vmov (%p278_p12), 0.0  }
  0x31   : > { %295 = vst [vmem:[%s2129_s5] sm:$0xff] (%p278_p12), %v2027_v5 }
  0x37 PF: > { %v1772_v6 = vld [vmem:[%s2119_s24 + $0x4] ss:$16 sps:$4 sm:$0xff]   ;;  %v1774_v7 = vld [vmem:[%s2119_s24 + $0xc] ss:$16 sps:$4 sm:$0xff]   ;;  %v1776_v8 = vld [vmem:[%s2119_s24] ss:$16 sps:$4 sm:$0xff]  }
  0x38   : > { %1096 = vmatprep.subr.bf16.mxu0 %v1772_v6  ;;  %v1777_v9 = vld [vmem:[%s2119_s24 + $0x8] ss:$16 sps:$4 sm:$0xff]   ;;  %1182 = vmatprep.subr.bf16.mxu1 %v1774_v7  ;;  %v1778_v10 = vld [vmem:[%s2119_s24 + $0x24] ss:$16 sps:$4 sm:$0xff]   ;;  %v1780_v11 = vld [vmem:[%s2119_s24 + $0x2c] ss:$16 sps:$4 sm:$0xff]  }
  0x39   : > { %1097 = vmatpush1.bf16.msra.mxu0 %v1776_v8  ;;  %1183 = vmatpush1.bf16.msra.mxu1 %v1777_v9  ;;  %v1782_v12 = vld [vmem:[%s2119_s24 + $0x20] ss:$16 sps:$4 sm:$0xff]   ;;  %v1783_v13 = vld [vmem:[%s2119_s24 + $0x28] ss:$16 sps:$4 sm:$0xff]   ;;  %v1784_v14 = vld [vmem:[%s2119_s24 + $0x44] ss:$16 sps:$4 sm:$0xff]  }
  0x3a   : > { %1098 = vmatprep.subr.bf16.mxu0 %v1778_v10  ;;  %1184 = vmatprep.subr.bf16.mxu1 %v1780_v11  ;;  %v1786_v15 = vld [vmem:[%s2119_s24 + $0x4c] ss:$16 sps:$4 sm:$0xff]   ;;  %v1788_v16 = vld [vmem:[%s2119_s24 + $0x40] ss:$16 sps:$4 sm:$0xff]   ;;  %v1789_v17 = vld [vmem:[%s2119_s24 + $0x48] ss:$16 sps:$4 sm:$0xff]  }
  0x3b   : > { %v1790_v18 = vld [vmem:[%s2119_s24 + $0x64] ss:$16 sps:$4 sm:$0xff]   ;;  %v1792_v19 = vld [vmem:[%s2119_s24 + $0x6c] ss:$16 sps:$4 sm:$0xff]   ;;  %v1794_v20 = vld [vmem:[%s2119_s24 + $0x60] ss:$16 sps:$4 sm:$0xff]  }
  0x3c   : > { %v1795_v21 = vld [vmem:[%s2119_s24 + $0x68] ss:$16 sps:$4 sm:$0xff]   ;;  %v1796_v22 = vld [vmem:[%s2119_s24 + $0x84] ss:$16 sps:$4 sm:$0xff]   ;;  %v1798_v23 = vld [vmem:[%s2119_s24 + $0x8c] ss:$16 sps:$4 sm:$0xff]  }
  0x3d   : > { %1099 = vmatpush1.bf16.msra.mxu0 %v1782_v12  ;;  %1185 = vmatpush1.bf16.msra.mxu1 %v1783_v13  ;;  %v1800_v24 = vld [vmem:[%s2119_s24 + $0x80] ss:$16 sps:$4 sm:$0xff]   ;;  %v1801_v25 = vld [vmem:[%s2119_s24 + $0x88] ss:$16 sps:$4 sm:$0xff]   ;;  %v1802_v26 = vld [vmem:[%s2119_s24 + $0xa4] ss:$16 sps:$4 sm:$0xff]  }
  0x3e   : > { %1100 = vmatprep.subr.bf16.mxu0 %v1784_v14  ;;  %1186 = vmatprep.subr.bf16.mxu1 %v1786_v15  ;;  %v1804_v27 = vld [vmem:[%s2119_s24 + $0xac] ss:$16 sps:$4 sm:$0xff]   ;;  %v1806_v28 = vld [vmem:[%s2119_s24 + $0xa0] ss:$16 sps:$4 sm:$0xff]   ;;  %v1807_v29 = vld [vmem:[%s2119_s24 + $0xa8] ss:$16 sps:$4 sm:$0xff]  }
  0x3f   : > { %v1808_v30 = vld [vmem:[%s2119_s24 + $0xc4] ss:$16 sps:$4 sm:$0xff]   ;;  %v1810_v31 = vld [vmem:[%s2119_s24 + $0xcc] ss:$16 sps:$4 sm:$0xff]   ;;  %v1812_v32 = vld [vmem:[%s2119_s24 + $0xc0] ss:$16 sps:$4 sm:$0xff]  }
  0x40   : > { %v1813_v33 = vld [vmem:[%s2119_s24 + $0xc8] ss:$16 sps:$4 sm:$0xff]   ;;  %v1814_v34 = vld [vmem:[%s2119_s24 + $0xe4] ss:$16 sps:$4 sm:$0xff]   ;;  %v1816_v35 = vld [vmem:[%s2119_s24 + $0xec] ss:$16 sps:$4 sm:$0xff]  }
  0x41   : > { %1101 = vmatpush1.bf16.msra.mxu0 %v1788_v16  ;;  %1187 = vmatpush1.bf16.msra.mxu1 %v1789_v17  ;;  %v1818_v36 = vld [vmem:[%s2119_s24 + $0xe0] ss:$16 sps:$4 sm:$0xff]   ;;  %v1819_v37 = vld [vmem:[%s2119_s24 + $0xe8] ss:$16 sps:$4 sm:$0xff]   ;;  %v1820_v38 = vld [vmem:[%s2119_s24 + $0x104] ss:$16 sps:$4 sm:$0xff]  }
  0x42   : > { %1102 = vmatprep.subr.bf16.mxu0 %v1790_v18  ;;  %1188 = vmatprep.subr.bf16.mxu1 %v1792_v19  ;;  %v1822_v39 = vld [vmem:[%s2119_s24 + $0x10c] ss:$16 sps:$4 sm:$0xff]   ;;  %v1824_v40 = vld [vmem:[%s2119_s24 + $0x100] ss:$16 sps:$4 sm:$0xff]   ;;  %v1825_v41 = vld [vmem:[%s2119_s24 + $0x108] ss:$16 sps:$4 sm:$0xff]  }
  0x43   : > { %v1826_v42 = vld [vmem:[%s2119_s24 + $0x124] ss:$16 sps:$4 sm:$0xff]   ;;  %v1828_v43 = vld [vmem:[%s2119_s24 + $0x12c] ss:$16 sps:$4 sm:$0xff]   ;;  %v1830_v44 = vld [vmem:[%s2119_s24 + $0x120] ss:$16 sps:$4 sm:$0xff]  }
  0x44   : > { %v1831_v45 = vld [vmem:[%s2119_s24 + $0x128] ss:$16 sps:$4 sm:$0xff]   ;;  %v1832_v46 = vld [vmem:[%s2119_s24 + $0x144] ss:$16 sps:$4 sm:$0xff]   ;;  %v1834_v47 = vld [vmem:[%s2119_s24 + $0x14c] ss:$16 sps:$4 sm:$0xff]  }
  0x45   : > { %1103 = vmatpush1.bf16.msra.mxu0 %v1794_v20  ;;  %1189 = vmatpush1.bf16.msra.mxu1 %v1795_v21  ;;  %v1836_v48 = vld [vmem:[%s2119_s24 + $0x140] ss:$16 sps:$4 sm:$0xff]   ;;  %v1837_v49 = vld [vmem:[%s2119_s24 + $0x148] ss:$16 sps:$4 sm:$0xff]   ;;  %v1838_v50 = vld [vmem:[%s2119_s24 + $0x164] ss:$16 sps:$4 sm:$0xff]  }
  0x46   : > { %1104 = vmatprep.subr.bf16.mxu0 %v1796_v22  ;;  %1190 = vmatprep.subr.bf16.mxu1 %v1798_v23  ;;  %v1840_v51 = vld [vmem:[%s2119_s24 + $0x16c] ss:$16 sps:$4 sm:$0xff]   ;;  %v1842_v52 = vld [vmem:[%s2119_s24 + $0x160] ss:$16 sps:$4 sm:$0xff]   ;;  %v1843_v53 = vld [vmem:[%s2119_s24 + $0x168] ss:$16 sps:$4 sm:$0xff]  }
  0x47   : > { %v1870_v54 = vld [vmem:[%s2131_s6 + $0x4] ss:$16 sps:$4 sm:$0xff]   ;;  %v1846_v56 = vld [vmem:[%s2119_s24 + $0x18c] ss:$16 sps:$4 sm:$0xff]   ;;  %v1848_v57 = vld [vmem:[%s2119_s24 + $0x180] ss:$16 sps:$4 sm:$0xff]  }
  0x48   : > { %v1844_v55 = vld [vmem:[%s2119_s24 + $0x184] ss:$16 sps:$4 sm:$0xff]   ;;  %1128 = vmatprep.mubr.bf16.mxu0 %v1870_v54  ;;  %1214 = vmatprep.mubr.bf16.mxu1 %v1870_v54  ;;  %v1849_v58 = vld [vmem:[%s2119_s24 + $0x188] ss:$16 sps:$4 sm:$0xff]   ;;  %v1852_v60 = vld [vmem:[%s2119_s24 + $0x1ac] ss:$16 sps:$4 sm:$0xff]  }
  0x49   : > { %1105 = vmatpush1.bf16.msra.mxu0 %v1800_v24  ;;  %1191 = vmatpush1.bf16.msra.mxu1 %v1801_v25  ;;  %v1850_v59 = vld [vmem:[%s2119_s24 + $0x1a4] ss:$16 sps:$4 sm:$0xff]   ;;  %v1854_v61 = vld [vmem:[%s2119_s24 + $0x1a0] ss:$16 sps:$4 sm:$0xff]   ;;  %v1855_v62 = vld [vmem:[%s2119_s24 + $0x1a8] ss:$16 sps:$4 sm:$0xff]  }
  0x4a   : > { %1106 = vmatprep.subr.bf16.mxu0 %v1802_v26  ;;  %1192 = vmatprep.subr.bf16.mxu1 %v1804_v27  ;;  %v1856_v63 = vld [vmem:[%s2119_s24 + $0x1c4] ss:$16 sps:$4 sm:$0xff]   ;;  %v1858_v0 = vld [vmem:[%s2119_s24 + $0x1cc] ss:$16 sps:$4 sm:$0xff]   ;;  %v1860_v1 = vld [vmem:[%s2119_s24 + $0x1c0] ss:$16 sps:$4 sm:$0xff]  }
  0x4b   : > { %v1861_v2 = vld [vmem:[%s2119_s24 + $0x1c8] ss:$16 sps:$4 sm:$0xff]   ;;  %v1862_v3 = vld [vmem:[%s2119_s24 + $0x1e4] ss:$16 sps:$4 sm:$0xff]   ;;  %v1864_v4 = vld [vmem:[%s2119_s24 + $0x1ec] ss:$16 sps:$4 sm:$0xff]  }
  0x4c   : > { %v1866_v5 = vld [vmem:[%s2119_s24 + $0x1e0] ss:$16 sps:$4 sm:$0xff]   ;;  %v1867_v6 = vld [vmem:[%s2119_s24 + $0x1e8] ss:$16 sps:$4 sm:$0xff]   ;;  %v1873_v7 = vld [vmem:[%s2119_s24 + $0x204] ss:$16 sps:$4 sm:$0xff]  }
  0x4d   : > { %1107 = vmatpush1.bf16.msra.mxu0 %v1806_v28  ;;  %1193 = vmatpush1.bf16.msra.mxu1 %v1807_v29  ;;  %v1876_v8 = vld [vmem:[%s2119_s24 + $0x20c] ss:$16 sps:$4 sm:$0xff]   ;;  %v1868_v9 = vld [vmem:[%s2131_s6] ss:$16 sps:$4 sm:$0xff]   ;;  %v1874_v11 = vld [vmem:[%s2119_s24 + $0x208] ss:$16 sps:$4 sm:$0xff]  }
  0x4e   : > { %1108 = vmatprep.subr.bf16.mxu0 %v1808_v30  ;;  %1194 = vmatprep.subr.bf16.mxu1 %v1810_v31  ;;  %v1871_v10 = vld [vmem:[%s2119_s24 + $0x200] ss:$16 sps:$4 sm:$0xff]   ;;  %v1879_v12 = vld [vmem:[%s2119_s24 + $0x224] ss:$16 sps:$4 sm:$0xff]   ;;  %v1882_v13 = vld [vmem:[%s2119_s24 + $0x22c] ss:$16 sps:$4 sm:$0xff]  }
  0x4f   : > { %v1877_v14 = vld [vmem:[%s2119_s24 + $0x220] ss:$16 sps:$4 sm:$0xff]   ;;  %v1880_v15 = vld [vmem:[%s2119_s24 + $0x228] ss:$16 sps:$4 sm:$0xff]   ;;  %v1885_v16 = vld [vmem:[%s2119_s24 + $0x244] ss:$16 sps:$4 sm:$0xff]  }
  0x50   : > { %v1888_v17 = vld [vmem:[%s2119_s24 + $0x24c] ss:$16 sps:$4 sm:$0xff]   ;;  %v1883_v18 = vld [vmem:[%s2119_s24 + $0x240] ss:$16 sps:$4 sm:$0xff]   ;;  %v1886_v19 = vld [vmem:[%s2119_s24 + $0x248] ss:$16 sps:$4 sm:$0xff]  }
  0x51   : > { %1109 = vmatpush1.bf16.msra.mxu0 %v1812_v32  ;;  %1195 = vmatpush1.bf16.msra.mxu1 %v1813_v33  ;;  %v1891_v20 = vld [vmem:[%s2119_s24 + $0x264] ss:$16 sps:$4 sm:$0xff]   ;;  %v1894_v21 = vld [vmem:[%s2119_s24 + $0x26c] ss:$16 sps:$4 sm:$0xff]   ;;  %v1889_v22 = vld [vmem:[%s2119_s24 + $0x260] ss:$16 sps:$4 sm:$0xff]  }
  0x52   : > { %1110 = vmatprep.subr.bf16.mxu0 %v1814_v34  ;;  %1196 = vmatprep.subr.bf16.mxu1 %v1816_v35  ;;  %v1892_v23 = vld [vmem:[%s2119_s24 + $0x268] ss:$16 sps:$4 sm:$0xff]   ;;  %v1897_v24 = vld [vmem:[%s2119_s24 + $0x284] ss:$16 sps:$4 sm:$0xff]   ;;  %v1900_v25 = vld [vmem:[%s2119_s24 + $0x28c] ss:$16 sps:$4 sm:$0xff]  }
  0x53   : > { %v1895_v26 = vld [vmem:[%s2119_s24 + $0x280] ss:$16 sps:$4 sm:$0xff]   ;;  %v1898_v27 = vld [vmem:[%s2119_s24 + $0x288] ss:$16 sps:$4 sm:$0xff]   ;;  %v1903_v28 = vld [vmem:[%s2119_s24 + $0x2a4] ss:$16 sps:$4 sm:$0xff]  }
  0x54   : > { %v1906_v29 = vld [vmem:[%s2119_s24 + $0x2ac] ss:$16 sps:$4 sm:$0xff]   ;;  %v1901_v30 = vld [vmem:[%s2119_s24 + $0x2a0] ss:$16 sps:$4 sm:$0xff]   ;;  %v1904_v31 = vld [vmem:[%s2119_s24 + $0x2a8] ss:$16 sps:$4 sm:$0xff]  }
  0x55   : > { %1111 = vmatpush1.bf16.msra.mxu0 %v1818_v36  ;;  %1197 = vmatpush1.bf16.msra.mxu1 %v1819_v37  ;;  %v1909_v32 = vld [vmem:[%s2119_s24 + $0x2c4] ss:$16 sps:$4 sm:$0xff]   ;;  %v1912_v33 = vld [vmem:[%s2119_s24 + $0x2cc] ss:$16 sps:$4 sm:$0xff]   ;;  %v1907_v35 = vld [vmem:[%s2119_s24 + $0x2c0] ss:$16 sps:$4 sm:$0xff]  }
  0x56   : > { %1112 = vmatprep.subr.bf16.mxu0 %v1820_v38  ;;  %1198 = vmatprep.subr.bf16.mxu1 %v1822_v39  ;;  %v1969_v34 = vld [vmem:[%s2131_s6 + $0xc] ss:$16 sps:$4 sm:$0xff]   ;;  %v1910_v36 = vld [vmem:[%s2119_s24 + $0x2c8] ss:$16 sps:$4 sm:$0xff]   ;;  %v1915_v37 = vld [vmem:[%s2119_s24 + $0x2e4] ss:$16 sps:$4 sm:$0xff]  }
  0x57   : > { %v1918_v38 = vld [vmem:[%s2119_s24 + $0x2ec] ss:$16 sps:$4 sm:$0xff]   ;;  %v1913_v39 = vld [vmem:[%s2119_s24 + $0x2e0] ss:$16 sps:$4 sm:$0xff]   ;;  %p1698_p0 = scmp.ne.s32.totalorder %s2008_s14, 7 }
  0x58   : > { %v1942_v54 = vld [vmem:[%s2119_s24 + $0x36c] ss:$16 sps:$4 sm:$0xff]   ;;  %vm1368_vm0 = vcmask (!%p1698_p0), 1040384  }
  0x59   : > { %1113 = vmatpush1.bf16.msra.mxu0 %v1824_v40  ;;  %1199 = vmatpush1.bf16.msra.mxu1 %v1825_v41  ;;  %v1916_v40 = vld [vmem:[%s2119_s24 + $0x2e8] ss:$16 sps:$4 sm:$0xff]   ;;  %v1921_v41 = vld [vmem:[%s2119_s24 + $0x304] ss:$16 sps:$4 sm:$0xff]  }
  0x5a   : > { %1114 = vmatprep.subr.bf16.mxu0 %v1826_v42  ;;  %1200 = vmatprep.subr.bf16.mxu1 %v1828_v43  ;;  %v1924_v42 = vld [vmem:[%s2119_s24 + $0x30c] ss:$16 sps:$4 sm:$0xff]   ;;  %v1919_v43 = vld [vmem:[%s2119_s24 + $0x300] ss:$16 sps:$4 sm:$0xff]  }
  0x5d   : > { %1115 = vmatpush1.bf16.msra.mxu0 %v1830_v44  ;;  %1201 = vmatpush1.bf16.msra.mxu1 %v1831_v45  ;;  %v1922_v44 = vld [vmem:[%s2119_s24 + $0x308] ss:$16 sps:$4 sm:$0xff]   ;;  %v1927_v45 = vld [vmem:[%s2119_s24 + $0x324] ss:$16 sps:$4 sm:$0xff]  }
  0x5e   : > { %1116 = vmatprep.subr.bf16.mxu0 %v1832_v46  ;;  %1202 = vmatprep.subr.bf16.mxu1 %v1834_v47  ;;  %v1930_v46 = vld [vmem:[%s2119_s24 + $0x32c] ss:$16 sps:$4 sm:$0xff]   ;;  %v1925_v47 = vld [vmem:[%s2119_s24 + $0x320] ss:$16 sps:$4 sm:$0xff]  }
  0x61   : > { %1117 = vmatpush1.bf16.msra.mxu0 %v1836_v48  ;;  %1203 = vmatpush1.bf16.msra.mxu1 %v1837_v49  ;;  %v1928_v48 = vld [vmem:[%s2119_s24 + $0x328] ss:$16 sps:$4 sm:$0xff]   ;;  %v1933_v49 = vld [vmem:[%s2119_s24 + $0x344] ss:$16 sps:$4 sm:$0xff]  }
  0x62   : > { %1118 = vmatprep.subr.bf16.mxu0 %v1838_v50  ;;  %1204 = vmatprep.subr.bf16.mxu1 %v1840_v51  ;;  %v1936_v50 = vld [vmem:[%s2119_s24 + $0x34c] ss:$16 sps:$4 sm:$0xff]   ;;  %v1931_v51 = vld [vmem:[%s2119_s24 + $0x340] ss:$16 sps:$4 sm:$0xff]  }
  0x65   : > { %1119 = vmatpush1.bf16.msra.mxu0 %v1842_v52  ;;  %1205 = vmatpush1.bf16.msra.mxu1 %v1843_v53  ;;  %v1934_v52 = vld [vmem:[%s2119_s24 + $0x348] ss:$16 sps:$4 sm:$0xff]   ;;  %v1939_v53 = vld [vmem:[%s2119_s24 + $0x364] ss:$16 sps:$4 sm:$0xff]  }
  0x66   : > { %1120 = vmatprep.subr.bf16.mxu0 %v1844_v55  ;;  %1206 = vmatprep.subr.bf16.mxu1 %v1846_v56  ;;  %v1937_v55 = vld [vmem:[%s2119_s24 + $0x360] ss:$16 sps:$4 sm:$0xff]   ;;  %v1940_v56 = vld [vmem:[%s2119_s24 + $0x368] ss:$16 sps:$4 sm:$0xff]  }
  0x69   : > { %1121 = vmatpush1.bf16.msra.mxu0 %v1848_v57  ;;  %1207 = vmatpush1.bf16.msra.mxu1 %v1849_v58  ;;  %v1945_v57 = vld [vmem:[%s2119_s24 + $0x384] ss:$16 sps:$4 sm:$0xff]   ;;  %v1948_v58 = vld [vmem:[%s2119_s24 + $0x38c] ss:$16 sps:$4 sm:$0xff]  }
  0x6a   : > { %1122 = vmatprep.subr.bf16.mxu0 %v1850_v59  ;;  %1208 = vmatprep.subr.bf16.mxu1 %v1852_v60  ;;  %v1943_v59 = vld [vmem:[%s2119_s24 + $0x380] ss:$16 sps:$4 sm:$0xff]   ;;  %v1946_v60 = vld [vmem:[%s2119_s24 + $0x388] ss:$16 sps:$4 sm:$0xff]  }
  0x6d   : > { %1123 = vmatpush1.bf16.msra.mxu0 %v1854_v61  ;;  %1209 = vmatpush1.bf16.msra.mxu1 %v1855_v62  ;;  %v1951_v61 = vld [vmem:[%s2119_s24 + $0x3a4] ss:$16 sps:$4 sm:$0xff]   ;;  %v1954_v62 = vld [vmem:[%s2119_s24 + $0x3ac] ss:$16 sps:$4 sm:$0xff]  }
  0x6e   : > { %1124 = vmatprep.subr.bf16.mxu0 %v1856_v63  ;;  %1210 = vmatprep.subr.bf16.mxu1 %v1858_v0  ;;  %v1949_v63 = vld [vmem:[%s2119_s24 + $0x3a0] ss:$16 sps:$4 sm:$0xff]   ;;  %v1952_v0 = vld [vmem:[%s2119_s24 + $0x3a8] ss:$16 sps:$4 sm:$0xff]  }
  0x71   : > { %1125 = vmatpush1.bf16.msra.mxu0 %v1860_v1  ;;  %1211 = vmatpush1.bf16.msra.mxu1 %v1861_v2  ;;  %v1957_v1 = vld [vmem:[%s2119_s24 + $0x3c4] ss:$16 sps:$4 sm:$0xff]   ;;  %v1960_v2 = vld [vmem:[%s2119_s24 + $0x3cc] ss:$16 sps:$4 sm:$0xff]  }
  0x72   : > { %1126 = vmatprep.subr.bf16.mxu0 %v1862_v3  ;;  %1212 = vmatprep.subr.bf16.mxu1 %v1864_v4  ;;  %v1955_v3 = vld [vmem:[%s2119_s24 + $0x3c0] ss:$16 sps:$4 sm:$0xff]   ;;  %v1958_v4 = vld [vmem:[%s2119_s24 + $0x3c8] ss:$16 sps:$4 sm:$0xff]  }
  0x75   : > { %1127 = vmatpush1.bf16.msra.mxu0 %v1866_v5  ;;  %1213 = vmatpush1.bf16.msra.mxu1 %v1867_v6  ;;  %v1963_v5 = vld [vmem:[%s2119_s24 + $0x3e4] ss:$16 sps:$4 sm:$0xff]   ;;  %v1966_v6 = vld [vmem:[%s2119_s24 + $0x3ec] ss:$16 sps:$4 sm:$0xff]  }
  0x76   : > { %1139 = vmatprep.subr.bf16.mxu0 %v1873_v7  ;;  %1225 = vmatprep.subr.bf16.mxu1 %v1876_v8  ;;  %v1961_v7 = vld [vmem:[%s2119_s24 + $0x3e0] ss:$16 sps:$4 sm:$0xff]   ;;  %v1964_v8 = vld [vmem:[%s2119_s24 + $0x3e8] ss:$16 sps:$4 sm:$0xff]  }
  0x78   : > { %1129 = vmatmul.mubr.bf16.vlgmr.msra.gmra.mrb[0].mxu0 %v1868_v9  ;;  %1215 = vmatmul.mubr.bf16.vlgmr.msra.gmra.mrb[0].mxu1 %v1868_v9  ;;  %v1967_v9 = vld [vmem:[%s2131_s6 + $0x8] ss:$16 sps:$4 sm:$0xff]  }
  0x79   : > { %1140 = vmatpush1.bf16.msra.mxu0 %v1871_v10  ;;  %1226 = vmatpush1.bf16.msra.mxu1 %v1874_v11  ;;  %v296_v10 = vld [vmem:[#allocation2] sm:$0xff]  ;;  %v298_v11 = vld [vmem:[#allocation2 + $0x10] sm:$0xff] }
  0x7a   : > { %1141 = vmatprep.subr.bf16.mxu0 %v1879_v12  ;;  %1227 = vmatprep.subr.bf16.mxu1 %v1882_v13  ;;  %v297_v12 = vld [vmem:[#allocation2 + $0x8] sm:$0xff]  ;;  %v299_v13 = vld [vmem:[#allocation2 + $0x18] sm:$0xff] }
  0x7b   : > { %1171 = vmatprep.mubr.bf16.mxu0 %v1969_v34  ;;  %1257 = vmatprep.mubr.bf16.mxu1 %v1969_v34 }
  0x7d   : > { %1142 = vmatpush1.bf16.msra.mxu0 %v1877_v14  ;;  %1228 = vmatpush1.bf16.msra.mxu1 %v1880_v15 }
  0x7e   : > { %1143 = vmatprep.subr.bf16.mxu0 %v1885_v16  ;;  %1229 = vmatprep.subr.bf16.mxu1 %v1888_v17  ;;  %v300_v16 = vld [vmem:[#allocation2 + $0x20] sm:$0xff]  ;;  %v302_v17 = vld [vmem:[#allocation2 + $0x30] sm:$0xff] }
  0x81   : > { %1144 = vmatpush1.bf16.msra.mxu0 %v1883_v18  ;;  %1230 = vmatpush1.bf16.msra.mxu1 %v1886_v19 }
  0x82   : > { %1145 = vmatprep.subr.bf16.mxu0 %v1891_v20  ;;  %1231 = vmatprep.subr.bf16.mxu1 %v1894_v21 }
  0x85   : > { %1146 = vmatpush1.bf16.msra.mxu0 %v1889_v22  ;;  %1232 = vmatpush1.bf16.msra.mxu1 %v1892_v23  ;;  %v301_v22 = vld [vmem:[#allocation2 + $0x28] sm:$0xff]  ;;  %v303_v23 = vld [vmem:[#allocation2 + $0x38] sm:$0xff] }
  0x86   : > { %1147 = vmatprep.subr.bf16.mxu0 %v1897_v24  ;;  %1233 = vmatprep.subr.bf16.mxu1 %v1900_v25 }
  0x89   : > { %1148 = vmatpush1.bf16.msra.mxu0 %v1895_v26  ;;  %1234 = vmatpush1.bf16.msra.mxu1 %v1898_v27 }
  0x8a   : > { %1149 = vmatprep.subr.bf16.mxu0 %v1903_v28  ;;  %1235 = vmatprep.subr.bf16.mxu1 %v1906_v29 }
  0x8d   : > { %1150 = vmatpush1.bf16.msra.mxu0 %v1901_v30  ;;  %1236 = vmatpush1.bf16.msra.mxu1 %v1904_v31 }
  0x8e   : > { %1151 = vmatprep.subr.bf16.mxu0 %v1909_v32  ;;  %1237 = vmatprep.subr.bf16.mxu1 %v1912_v33 }
  0x91   : > { %1152 = vmatpush1.bf16.msra.mxu0 %v1907_v35  ;;  %1238 = vmatpush1.bf16.msra.mxu1 %v1910_v36 }
  0x92   : > { %1153 = vmatprep.subr.bf16.mxu0 %v1915_v37  ;;  %1239 = vmatprep.subr.bf16.mxu1 %v1918_v38  ;;  %v1383_v37 = vlaneseq (!%p1698_p0) }
  0x95   : > { %1154 = vmatpush1.bf16.msra.mxu0 %v1913_v39  ;;  %1240 = vmatpush1.bf16.msra.mxu1 %v1916_v40 }
  0x96   : > { %1155 = vmatprep.subr.bf16.mxu0 %v1921_v41  ;;  %1241 = vmatprep.subr.bf16.mxu1 %v1924_v42 }
  0x99   : > { %1156 = vmatpush1.bf16.msra.mxu0 %v1919_v43  ;;  %1242 = vmatpush1.bf16.msra.mxu1 %v1922_v44  ;;  %v2028_v44 = vmov (!%p1698_p0), 1983009808  }
  0x9a   : > { %1157 = vmatprep.subr.bf16.mxu0 %v1927_v45  ;;  %1243 = vmatprep.subr.bf16.mxu1 %v1930_v46  ;;  %v2273_v45 = vunpack.c.l.s4 (!%p1698_p0), %v2028_v44  ;;  %v1384_v44 = vshrl.u32 (!%p1698_p0), %v1383_v37, 7 }
  0x9d   : > { %1158 = vmatpush1.bf16.msra.mxu0 %v1925_v47  ;;  %1244 = vmatpush1.bf16.msra.mxu1 %v1928_v48 }
  0x9e   : > { %1159 = vmatprep.subr.bf16.mxu0 %v1933_v49  ;;  %1245 = vmatprep.subr.bf16.mxu1 %v1936_v50 }
  0xa1   : > { %1160 = vmatpush1.bf16.msra.mxu0 %v1931_v51  ;;  %1246 = vmatpush1.bf16.msra.mxu1 %v1934_v52 }
  0xa2   : > { %1161 = vmatprep.subr.bf16.mxu0 %v1939_v53  ;;  %1247 = vmatprep.subr.bf16.mxu1 %v1942_v54 }
  0xa5   : > { %1162 = vmatpush1.bf16.msra.mxu0 %v1937_v55  ;;  %1248 = vmatpush1.bf16.msra.mxu1 %v1940_v56 }
  0xa6   : > { %1163 = vmatprep.subr.bf16.mxu0 %v1945_v57  ;;  %1249 = vmatprep.subr.bf16.mxu1 %v1948_v58 }
  0xa9   : > { %1164 = vmatpush1.bf16.msra.mxu0 %v1943_v59  ;;  %1250 = vmatpush1.bf16.msra.mxu1 %v1946_v60 }
  0xaa   : > { %1165 = vmatprep.subr.bf16.mxu0 %v1951_v61  ;;  %1251 = vmatprep.subr.bf16.mxu1 %v1954_v62 }
  0xad   : > { %1166 = vmatpush1.bf16.msra.mxu0 %v1949_v63  ;;  %1252 = vmatpush1.bf16.msra.mxu1 %v1952_v0 }
  0xae   : > { %1167 = vmatprep.subr.bf16.mxu0 %v1957_v1  ;;  %1253 = vmatprep.subr.bf16.mxu1 %v1960_v2 }
  0xb1   : > { %1168 = vmatpush1.bf16.msra.mxu0 %v1955_v3  ;;  %1254 = vmatpush1.bf16.msra.mxu1 %v1958_v4 }
  0xb2   : > { %1169 = vmatprep.subr.bf16.mxu0 %v1963_v5  ;;  %1255 = vmatprep.subr.bf16.mxu1 %v1966_v6 }
  0xb5   : > { %1170 = vmatpush1.bf16.msra.mxu0 %v1961_v7  ;;  %1256 = vmatpush1.bf16.msra.mxu1 %v1964_v8 }
  0xb8   : > { %1172 = vmatmul.mubr.bf16.vlgmr.msra.gmra.mrb[0].mxu0 %v1967_v9  ;;  %1258 = vmatmul.mubr.bf16.vlgmr.msra.gmra.mrb[0].mxu1 %v1967_v9 }
 0x18b   : > { %v1173_v14 = vpop.f32.mrb[0].mxu0  ;;  %v1259_v15 = vpop.f32.mrb[0].mxu1  ;;  %1287 = sbr.rel (%p1698_p0) target bundleno = 436 (0x1b4), region = 63 }
 0x18c   : > { %v1268_v18 = vadd.f32 %v1173_v14, %v296_v10  ;;  %v1270_v19 = vadd.f32 %v1259_v15, %v298_v11  ;;  %v1175_v20 = vpop.f32.mrb[1].mxu0  ;;  %v1261_v21 = vpop.f32.mrb[1].mxu1 }
 0x18d   : > { %v1269_v24 = vadd.f32 %v1175_v20, %v297_v12  ;;  %v1271_v25 = vadd.f32 %v1261_v21, %v299_v13  ;;  %v1177_v26 = vpop.f32.mrb[2].mxu0  ;;  %v1263_v27 = vpop.f32.mrb[2].mxu1 }
 0x18e   : > { %1276 = vst [vmem:[#allocation2] sm:$0xff] %v1268_v18  ;;  %1278 = vst [vmem:[#allocation2 + $0x10] sm:$0xff] %v1270_v19  ;;  %v1272_v28 = vadd.f32 %v1177_v26, %v300_v16  ;;  %v1274_v29 = vadd.f32 %v1263_v27, %v302_v17  ;;  %v1179_v30 = vpop.f32.mrb[3].mxu0  ;;  %v1265_v31 = vpop.f32.mrb[3].mxu1 }
 0x18f   : > { %1277 = vst [vmem:[#allocation2 + $0x8] sm:$0xff] %v1269_v24  ;;  %1279 = vst [vmem:[#allocation2 + $0x18] sm:$0xff] %v1271_v25  ;;  %v1273_v32 = vadd.f32 %v1179_v30, %v301_v22  ;;  %v1275_v33 = vadd.f32 %v1265_v31, %v303_v23 }
 0x190   : > { %1280 = vst [vmem:[#allocation2 + $0x20] sm:$0xff] %v1272_v28  ;;  %1282 = vst [vmem:[#allocation2 + $0x30] sm:$0xff] %v1274_v29 }
 0x191   : > { %1281 = vst [vmem:[#allocation2 + $0x28] sm:$0xff] %v1273_v32  ;;  %1283 = vst [vmem:[#allocation2 + $0x38] sm:$0xff] %v1275_v33 }
 0x195   : > { %v1288_v34 = vld [vmem:[#allocation2] sm:$0xff]  ;;  %v1290_v36 = vld [vmem:[#allocation2 + $0x10] sm:$0xff] }
 0x196   : > { %v1289_v35 = vld [vmem:[#allocation2 + $0x8] sm:$0xff]  ;;  %1296 = vst [vmem:[%s2124_s29] sm:$0xff] %v1288_v34  ;;  %v1332_v38 = vmul.f32 %v1288_v34, %v1288_v34  ;;  %1298 = vst [vmem:[%s2124_s29 + $0x10] sm:$0xff] %v1290_v36  ;;  %v1334_v40 = vmul.f32 %v1290_v36, %v1290_v36  ;;  %v1291_v41 = vld [vmem:[#allocation2 + $0x18] sm:$0xff] }
 0x197   : > { %1297 = vst [vmem:[%s2124_s29 + $0x8] sm:$0xff] %v1289_v35  ;;  %v1333_v39 = vmul.f32 %v1289_v35, %v1289_v35  ;;  %v1292_v42 = vld [vmem:[#allocation2 + $0x20] sm:$0xff]  ;;  %1299 = vst [vmem:[%s2124_s29 + $0x18] sm:$0xff] %v1291_v41  ;;  %v1335_v46 = vmul.f32 %v1291_v41, %v1291_v41  ;;  %v1294_v50 = vld [vmem:[#allocation2 + $0x30] sm:$0xff] }
 0x198   : > { %v1293_v43 = vld [vmem:[#allocation2 + $0x28] sm:$0xff]  ;;  %1300 = vst [vmem:[%s2124_s29 + $0x20] sm:$0xff] %v1292_v42  ;;  %v1304_v47 = vadd.f32 %v1292_v42, %v1288_v34  ;;  %v1336_v48 = vmul.f32 %v1292_v42, %v1292_v42  ;;  %v1295_v51 = vld [vmem:[#allocation2 + $0x38] sm:$0xff]  ;;  %1302 = vst [vmem:[%s2124_s29 + $0x30] sm:$0xff] %v1294_v50  ;;  %v1318_v53 = vadd.f32 %v1294_v50, %v1290_v36 }
 0x199   : > { %1301 = vst [vmem:[%s2124_s29 + $0x28] sm:$0xff] %v1293_v43  ;;  %v1311_v49 = vadd.f32 %v1293_v43, %v1289_v35  ;;  %v1337_v52 = vmul.f32 %v1293_v43, %v1293_v43  ;;  %v1338_v54 = vmul.f32 %v1294_v50, %v1294_v50  ;;  %1303 = vst [vmem:[%s2124_s29 + $0x38] sm:$0xff] %v1295_v51  ;;  %v1382_v43 = vunpack.c.0.s8 %v2273_v45  ;;  %v1373_v45 = vld [vmem:[%s2129_s5] sm:$0xff] }
 0x19a   : > { %v1325_v55 = vadd.f32 %v1295_v51, %v1291_v41  ;;  %v1305_v56 = vrot.slane %v1304_v47, 4  ;;  %v1340_v57 = vadd.f32 %v1336_v48, %v1332_v38  ;;  %v1339_v59 = vmul.f32 %v1295_v51, %v1295_v51 }
 0x19b   : > { %v1312_v58 = vrot.slane %v1311_v49, 4  ;;  %v1347_v60 = vadd.f32 %v1337_v52, %v1333_v39  ;;  %v1319_v61 = vrot.slane %v1318_v53, 4  ;;  %v1354_v62 = vadd.f32 %v1338_v54, %v1334_v40 }
 0x19c   : > { %v1326_v63 = vrot.slane %v1325_v55, 4  ;;  %v1306_v0 = vadd.f32 %v1305_v56, %v1304_v47  ;;  %v1341_v1 = vrot.slane %v1340_v57, 4  ;;  %v1361_v3 = vadd.f32 %v1339_v59, %v1335_v46 }
 0x19d   : > { %v1313_v2 = vadd.f32 %v1312_v58, %v1311_v49  ;;  %v1348_v4 = vrot.slane %v1347_v60, 4  ;;  %v1320_v5 = vadd.f32 %v1319_v61, %v1318_v53  ;;  %v1355_v6 = vrot.slane %v1354_v62, 4 }
 0x19e   : > { %v1327_v7 = vadd.f32 %v1326_v63, %v1325_v55  ;;  %v1307_v8 = vrot.slane %v1306_v0, 2  ;;  %v1342_v9 = vadd.f32 %v1341_v1, %v1340_v57  ;;  %v1362_v11 = vrot.slane %v1361_v3, 4 }
 0x19f   : > { %v1314_v10 = vrot.slane %v1313_v2, 2  ;;  %v1349_v12 = vadd.f32 %v1348_v4, %v1347_v60  ;;  %v1321_v13 = vrot.slane %v1320_v5, 2  ;;  %v1356_v14 = vadd.f32 %v1355_v6, %v1354_v62 }
 0x1a0   : > { %v1328_v15 = vrot.slane %v1327_v7, 2  ;;  %v1308_v16 = vadd.f32 %v1307_v8, %v1306_v0  ;;  %v1343_v17 = vrot.slane %v1342_v9, 2  ;;  %v1363_v19 = vadd.f32 %v1362_v11, %v1361_v3 }
 0x1a1   : > { %v1315_v18 = vadd.f32 %v1314_v10, %v1313_v2  ;;  %v1350_v20 = vrot.slane %v1349_v12, 2  ;;  %v1322_v21 = vadd.f32 %v1321_v13, %v1320_v5  ;;  %v1357_v22 = vrot.slane %v1356_v14, 2 }
 0x1a2   : > { %v1329_v23 = vadd.f32 %v1328_v15, %v1327_v7  ;;  %v1309_v24 = vrot.slane %v1308_v16, 1  ;;  %v1344_v25 = vadd.f32 %v1343_v17, %v1342_v9  ;;  %v1364_v27 = vrot.slane %v1363_v19, 2 }
 0x1a3   : > { %v1316_v26 = vrot.slane %v1315_v18, 1  ;;  %v1351_v28 = vadd.f32 %v1350_v20, %v1349_v12  ;;  %v1323_v29 = vrot.slane %v1322_v21, 1  ;;  %v1358_v30 = vadd.f32 %v1357_v22, %v1356_v14 }
 0x1a4   : > { %v1330_v31 = vrot.slane %v1329_v23, 1  ;;  %v1310_v32 = vadd.f32 %v1309_v24, %v1308_v16  ;;  %v1345_v33 = vrot.slane %v1344_v25, 1  ;;  %v1365_v35 = vadd.f32 %v1364_v27, %v1363_v19 }
 0x1a5   : > { %v1317_v34 = vadd.f32 %v1316_v26, %v1315_v18  ;;  %v1352_v36 = vrot.slane %v1351_v28, 1  ;;  %v1324_v38 = vadd.f32 %v1323_v29, %v1322_v21  ;;  %v1359_v39 = vrot.slane %v1358_v30, 1 }
 0x1a6   : > { %v1331_v40 = vadd.f32 %v1330_v31, %v1329_v23  ;;  %v1346_v41 = vadd.f32 %v1345_v33, %v1344_v25  ;;  %v1366_v42 = vrot.slane %v1365_v35, 1  ;;  %v1385_v50 = vsub.s32 %v1382_v43, %v1384_v44 }
 0x1a7   : > { %v1353_v46 = vadd.f32 %v1352_v36, %v1351_v28  ;;  %v1360_v47 = vadd.f32 %v1359_v39, %v1358_v30 }
 0x1a8   : > { %v1367_v48 = vadd.f32 %v1366_v42, %v1365_v35  ;;  %v1369_v49 = vsel %vm1368_vm0, %v1310_v32, %v1346_v41 }
 0x1a9   : > { %v1370_v51 = vsel %vm1368_vm0, %v1317_v34, %v1353_v46  ;;  %v1371_v52 = vsel %vm1368_vm0, %v1324_v38, %v1360_v47 }
 0x1aa   : > { %v1372_v53 = vsel %vm1368_vm0, %v1331_v40, %v1367_v48  ;;  %v1378_v54 = vcombine.low %v1369_v49, %v1370_v51 }
 0x1ab   : > { %v1379_v55 = vcombine.low %v1371_v52, %v1372_v53 }
 0x1ac   : > { %v1386_v56 = vrot.slane %v1378_v54, %v1385_v50 }
 0x1ad   : > { %v1393_v57 = vrot.slane %v1379_v55, %v1385_v50 }
 0x1af   : > { %v1394_v58 = vcombine.low %v1386_v56, %v1393_v57 }
 0x1b1   : > { %v1396_v37 = vadd.f32 %v1394_v58, %v1373_v45 }
 0x1b3   : > { %1397 = vst [vmem:[%s2129_s5] sm:$0xff] %v1396_v37 }
 0x1b4 PF: > { %s14_s18 = sadd.s32 1, %s2024_s18   ;;  %s2313_s12 = smov %s2004_s13 }
 0x1b5   : > { %p11_p1 = scmp.ge.s32.totalorder %s14_s18, 18   ;;  %s2314_s13 = smov %s2100_s25 }
 0x1b6   : > { %s2315_s14 = smov %s2016_s16  ;;  %s2316_s15 = smov %s2020_s17 }
 0x1b7   : > { %s2317_s16 = smov %s2320_s19  ;;  %s2318_s17 = smov %s2324_s20 }
 0x1b8   :  { %13 = sbr.rel (!%p11_p1) target bundleno = 4 (0x4), region = 113 }

// kernel: _lambda_.15
= control target key start
LH: loop header
LB: loop body
LE: loop exit
PB: predicated region body
PF: predicated region fallthrough
CT: control target
= control target key end

     0   :  { %s958_s12 = smov 0   ;;  %s960_s13 = smov 0   ;;  %s1062_s0 = inlined_call_operand.vmem [shape: bf16[2,8,8192], index: 0, kind: input, shape index: {}]   ;;  %s1063_s1 = inlined_call_operand.vmem [shape: bf16[8192,128], index: 1, kind: input, shape index: {}]   ;;  %s1064_s2 = inlined_call_operand.vmem [shape: f32[1,128], index: 2, kind: input, shape index: {}]   ;;  %s1065_s3 = inlined_call_operand.vmem [shape: f32[2,8,128], index: 3, kind: output, shape index: {}]  }
   0x1   :  { %s962_s14 = smov 0   ;;  %s964_s15 = smov 0  }
   0x2   :  { %s966_s16 = smov 0  }
   0x3 LB: > { %s25_s17 = sadd.s32 1, %s927_s14  ;;  %s32_s18 = sadd.s32 1, %s931_s15  ;;  %s935_s16 = sphi %s966_s16, %s13_s16   ;;  %s931_s15 = sphi %s964_s15, %s1069_s15   ;;  %s927_s14 = sphi %s962_s14, %s1068_s14   ;;  %s923_s13 = sphi %s960_s13, %s1067_s13   ;;  %s919_s12 = sphi %s958_s12, %s1066_s12  }
   0x4   : > { %p26_p0 = scmp.ge.s32.totalorder %s25_s17, 16  ;;  %p728_p1 = scmp.ge.s32.totalorder %s935_s16, 1 }
   0x5   : > { %p182_p2 = scmp.lt.s32.totalorder %s935_s16, 33 }
   0x6   : > { %s1071_s17 = smov (%p26_p0, %s25_s17), 0  ;;  %s1073_s18 = smov (!%p26_p0, %s32_s18), %s931_s15 }
   0x7   : > { %p183_p3 = pnand %p728_p1, %p182_p2  ;;  %p34_p4 = scmp.ge.s32.totalorder %s1073_s18, 2 }
   0x8   : > { %s729_s19 = sshll.u32 (!%p183_p3), %s919_s12, 2  ;;  %p222_p5 = scmp.lt.s32.totalorder (!%p183_p3), %s923_s13, 1 }
   0x9   : > { %s1075_s18 = smov (%p34_p4, %s1073_s18), 0  ;;  %186 = sbr.rel (%p183_p3) target bundleno = 293 (0x125), region = 32 }
   0xa   : > { %p226_p6 = scmp.lt.s32.totalorder (!%p183_p3), %s729_s19, 63  ;;  %s732_s20 = sshll.u32 (!%p183_p3), %s919_s12, 6 }
   0xb   : > { %p236_p7 = scmp.lt.s32.totalorder (!%p183_p3), %s732_s20, 1023  ;;  %p735_p8 = scmp.ne.s32.totalorder (!%p183_p3), %s919_s12, 0 }
  0x10   : > { %s1077_s13 = smov (!%p222_p5, %s923_s13), 1  ;;  %s1079_s19 = smov (!%p226_p6, %s729_s19), 63 }
  0x11   : > { %s730_s21 = sshll.u32 %s1077_s13, 6  ;;  %s734_s23 = sshll.u32 %s1077_s13, 3  ;;  %v937_v0 = vmov (!%p735_p8), 0.0  }
  0x12   : > { %s231_s22 = sadd.s32 %s730_s21, %s1079_s19  ;;  %s995_s27 = scalar_lea.vmem %s1065_s3, %s734_s23  ;;  %253 = vst [vmem:[#allocation2] sm:$0xff] (!%p735_p8), %v937_v0 }
  0x13   : > { %s731_s24 = sshll.u32 %s231_s22, 2  ;;  %s1081_s20 = smov (!%p236_p7, %s732_s20), 1023 }
  0x14   : > { %s1000_s30 = scalar_lea.vmem %s1062_s0, %s731_s24  ;;  %s733_s4 = sshll.u32 %s1081_s20, 2 }
  0x15   : > { %s1005_s7 = scalar_lea.vmem %s1063_s1, %s733_s4  ;;  %252 = sbr.rel (%p735_p8) target bundleno = 28 (0x1c), region = 36 }
  0x1c PF: > { %v861_v1 = vld [vmem:[%s1005_s7 + $0x40] sm:$0xff]   ;;  %v865_v5 = vld [vmem:[%s1005_s7 + $0x48] sm:$0xff]   ;;  %v869_v9 = vld [vmem:[%s1005_s7 + $0x50] sm:$0xff]   ;;  %p772_p9 = scmp.ne.s32.totalorder %s919_s12, 15 }
  0x1d   : > { %v862_v2 = vld [vmem:[%s1005_s7 + $0xc0] sm:$0xff]   ;;  %776 = vmatprep.subr.bf16.mxu0 %v861_v1  ;;  %v866_v6 = vld [vmem:[%s1005_s7 + $0xc8] sm:$0xff]   ;;  %v870_v10 = vld [vmem:[%s1005_s7 + $0xd0] sm:$0xff]  }
  0x1e   : > { %v863_v3 = vld [vmem:[%s1005_s7] sm:$0xff]   ;;  %798 = vmatprep.subr.bf16.mxu1 %v862_v2  ;;  %v867_v7 = vld [vmem:[%s1005_s7 + $0x8] sm:$0xff]   ;;  %v871_v11 = vld [vmem:[%s1005_s7 + $0x10] sm:$0xff]  }
  0x1f   : > { %v864_v4 = vld [vmem:[%s1005_s7 + $0x80] sm:$0xff]   ;;  %777 = vmatpush3.bf16.msra.mxu0 %v863_v3  ;;  %v868_v8 = vld [vmem:[%s1005_s7 + $0x88] sm:$0xff]   ;;  %v872_v12 = vld [vmem:[%s1005_s7 + $0x90] sm:$0xff]  }
  0x20   : > { %799 = vmatpush3.bf16.msra.mxu1 %v864_v4  ;;  %778 = vmatprep.subr.bf16.mxu0 %v865_v5  ;;  %v873_v13 = vld [vmem:[%s1005_s7 + $0x58] sm:$0xff]   ;;  %v877_v17 = vld [vmem:[%s1005_s7 + $0x60] sm:$0xff]   ;;  %v881_v21 = vld [vmem:[%s1005_s7 + $0x68] sm:$0xff]  }
  0x21   : > { %800 = vmatprep.subr.bf16.mxu1 %v866_v6  ;;  %v874_v14 = vld [vmem:[%s1005_s7 + $0xd8] sm:$0xff]   ;;  %v878_v18 = vld [vmem:[%s1005_s7 + $0xe0] sm:$0xff]   ;;  %v882_v22 = vld [vmem:[%s1005_s7 + $0xe8] sm:$0xff]  }
  0x22   : > { %v875_v15 = vld [vmem:[%s1005_s7 + $0x18] sm:$0xff]   ;;  %v879_v19 = vld [vmem:[%s1005_s7 + $0x20] sm:$0xff]   ;;  %v883_v23 = vld [vmem:[%s1005_s7 + $0x28] sm:$0xff]  }
  0x23   : > { %779 = vmatpush3.bf16.msra.mxu0 %v867_v7  ;;  %v876_v16 = vld [vmem:[%s1005_s7 + $0x98] sm:$0xff]   ;;  %v880_v20 = vld [vmem:[%s1005_s7 + $0xa0] sm:$0xff]   ;;  %v884_v24 = vld [vmem:[%s1005_s7 + $0xa8] sm:$0xff]  }
  0x24   : > { %801 = vmatpush3.bf16.msra.mxu1 %v868_v8  ;;  %780 = vmatprep.subr.bf16.mxu0 %v869_v9  ;;  %v885_v25 = vld [vmem:[%s1005_s7 + $0x70] sm:$0xff]   ;;  %v889_v29 = vld [vmem:[%s1005_s7 + $0x78] sm:$0xff]   ;;  %v255_v33 = vld [vmem:[%s1000_s30] sm:$0xff] }
  0x25   : > { %802 = vmatprep.subr.bf16.mxu1 %v870_v10  ;;  %v886_v26 = vld [vmem:[%s1005_s7 + $0xf0] sm:$0xff]   ;;  %v890_v30 = vld [vmem:[%s1005_s7 + $0xf8] sm:$0xff]   ;;  %v256_v34 = vld [vmem:[%s1000_s30 + $0x8] sm:$0xff]  ;;  %v736_v35 = vcombine.low %v255_v33, %v255_v33  ;;  %v737_v36 = vcombine.high %v255_v33, %v255_v33 }
  0x26   : > { %v887_v27 = vld [vmem:[%s1005_s7 + $0x30] sm:$0xff]   ;;  %v891_v31 = vld [vmem:[%s1005_s7 + $0x38] sm:$0xff]   ;;  %v738_v37 = vcombine.low %v256_v34, %v256_v34  ;;  %v739_v38 = vcombine.high %v256_v34, %v256_v34  ;;  %v254_v47 = vld [vmem:[#allocation2] sm:$0xff] }
  0x27   : > { %781 = vmatpush3.bf16.msra.mxu0 %v871_v11  ;;  %v888_v28 = vld [vmem:[%s1005_s7 + $0xb0] sm:$0xff]   ;;  %v892_v32 = vld [vmem:[%s1005_s7 + $0xb8] sm:$0xff]   ;;  %559 = vmatprep.mubr.bf16.mxu0 %v737_v36  ;;  %v773_v53 = vld [vmem:[%s1064_s2] ss:$0 sm:$0xff] (!%p772_p9) }
  0x28   : > { %803 = vmatpush3.bf16.msra.mxu1 %v872_v12  ;;  %782 = vmatprep.subr.bf16.mxu0 %v873_v13 }
  0x29   : > { %804 = vmatprep.subr.bf16.mxu1 %v874_v14  ;;  %599 = vmatprep.mubr.bf16.mxu1 %v739_v38 }
  0x2b   : > { %783 = vmatpush3.bf16.msra.mxu0 %v875_v15 }
  0x2c   : > { %805 = vmatpush3.bf16.msra.mxu1 %v876_v16  ;;  %784 = vmatprep.subr.bf16.mxu0 %v877_v17 }
  0x2d   : > { %806 = vmatprep.subr.bf16.mxu1 %v878_v18 }
  0x2f   : > { %785 = vmatpush3.bf16.msra.mxu0 %v879_v19 }
  0x30   : > { %807 = vmatpush3.bf16.msra.mxu1 %v880_v20  ;;  %786 = vmatprep.subr.bf16.mxu0 %v881_v21 }
  0x31   : > { %808 = vmatprep.subr.bf16.mxu1 %v882_v22 }
  0x33   : > { %787 = vmatpush3.bf16.msra.mxu0 %v883_v23 }
  0x34   : > { %809 = vmatpush3.bf16.msra.mxu1 %v884_v24  ;;  %788 = vmatprep.subr.bf16.mxu0 %v885_v25 }
  0x35   : > { %810 = vmatprep.subr.bf16.mxu1 %v886_v26 }
  0x37   : > { %789 = vmatpush3.bf16.msra.mxu0 %v887_v27 }
  0x38   : > { %811 = vmatpush3.bf16.msra.mxu1 %v888_v28  ;;  %790 = vmatprep.subr.bf16.mxu0 %v889_v29 }
  0x39   : > { %812 = vmatprep.subr.bf16.mxu1 %v890_v30 }
  0x3b   : > { %791 = vmatpush3.bf16.msra.mxu0 %v891_v31 }
  0x3c   : > { %813 = vmatpush3.bf16.msra.mxu1 %v892_v32 }
  0x3e   : > { %560 = vmatmul.mubr.bf16.vlgmr.msra.gmra.mrb[0].mxu0 %v736_v35 }
  0x3f   : > { %600 = vmatmul.mubr.bf16.vlgmr.msra.gmra.mrb[0].mxu1 %v738_v37 }
 0x111   : > { %v792_v39 = vpop.f32.mrb[0].mxu0 }
 0x112   : > { %v814_v40 = vpop.f32.mrb[0].mxu1  ;;  %v793_v41 = vpop.f32.mrb[1].mxu0 }
 0x113   : > { %v815_v42 = vpop.f32.mrb[1].mxu1  ;;  %v794_v43 = vadd.f32 %v793_v41, %v792_v39  ;;  %v795_v45 = vpop.f32.mrb[2].mxu0 }
 0x114   : > { %v816_v44 = vadd.f32 %v815_v42, %v814_v40  ;;  %v817_v46 = vpop.f32.mrb[2].mxu1  ;;  %v796_v48 = vpop.f32.mrb[3].mxu0  ;;  %612 = sbr.rel (%p772_p9) target bundleno = 293 (0x125), region = 40 }
 0x115   : > { %v818_v49 = vpop.f32.mrb[3].mxu1 }
 0x116   : > { %v602_v50 = vadd.f32 %v816_v44, %v794_v43 }
 0x118   : > { %v607_v51 = vadd.f32 %v602_v50, %v254_v47 }
 0x11a   : > { %608 = vst [vmem:[#allocation2] sm:$0xff] %v607_v51 }
 0x121   : > { %v613_v52 = vld [vmem:[#allocation2] sm:$0xff] }
 0x122   : > { %v621_v54 = vadd.f32 %v773_v53, %v613_v52 }
 0x124   : > { %622 = vst [vmem:[%s995_s27] sm:$0xff] %v621_v54 }
 0x125 PF: > { %s13_s16 = sadd.s32 1, %s935_s16   ;;  %s1066_s12 = smov %s927_s14 }
 0x126   : > { %p10_p10 = scmp.ge.s32.totalorder %s13_s16, 34   ;;  %s1067_s13 = smov %s931_s15 }
 0x127   : > { %s1068_s14 = smov %s1071_s17  ;;  %s1069_s15 = smov %s1075_s18 }
 0x128   :  { %12 = sbr.rel (!%p10_p10) target bundleno = 3 (0x3), region = 73 }

</bundles_post_ra>
